<compile_context>
chip_gen: v7x
topology: tpu7x:2x2x1
jax: 0.10.0
libtpu: 0.0.40
codegen_flags: <defaults>
</compile_context>

<pallas_src>
import functools

import jax
import jax.numpy as jnp
from jax.experimental import pallas as pl
from jax.experimental.pallas import tpu as pltpu

INPUT_DIM = 2
HIDDEN_DIM = 64
HALF_DIM = HIDDEN_DIM // 2
OUTPUT_DIM = 1
NEG_SLOPE = 0.2


def _leaky_relu(v):
    # For 0 < slope < 1, max(v, slope*v) == LeakyReLU(slope)(v) exactly.
    return jnp.maximum(v, NEG_SLOPE * v)


def _cdiv(a, b):
    return -(-a // b)


def _round_up(a, b):
    return _cdiv(a, b) * b


def mlp_kernel(x_ref,
               w1_ref, b1_ref,
               w2_ref, b2_ref,
               w3_ref, b3_ref,
               w4t_ref, b4_ref,
               o_ref):
    """Whole MLP fused; one grid step handles a lane tile of points.

    Shapes (tm = lane tile of points):
      x_ref : (2, tm) f32        w1 : (64, 2)  f32   b1: (64, 1) f32
      h1    : (64, tm) f32       w2 : (64, 64) bf16  b2: (64, 1) f32
      h2    : (64, tm) f32       w3 : (32, 64) bf16  b3: (32, 1) f32
      h3    : (32, tm) f32       w4t: (32, 1)  f32   b4: (1, 1)  f32
      o_ref : (1, tm) f32
    """
    x = x_ref[...]                                   # (2, tm) f32
    w1 = w1_ref[...]                                 # (64, 2) f32

    # Layer 1 on the VPU (K=2 would waste the MXU): two broadcast FMAs.
    h = (w1[:, 0:1] * x[0:1, :]
         + w1[:, 1:2] * x[1:2, :]
         + b1_ref[...])                              # (64, tm) f32
    h = _leaky_relu(h)

    # Layers 2 & 3 on the MXU: bf16 operands, f32 accumulation.
    h = _leaky_relu(
        jnp.dot(w2_ref[...], h.astype(jnp.bfloat16),
                preferred_element_type=jnp.float32)
        + b2_ref[...])                               # (64, tm) f32
    h = _leaky_relu(
        jnp.dot(w3_ref[...], h.astype(jnp.bfloat16),
                preferred_element_type=jnp.float32)
        + b3_ref[...])                               # (32, tm) f32

    # Output layer OFF the MXU: VPU broadcast multiply + XLU sublane reduce.
    o_ref[...] = (jnp.sum(w4t_ref[...] * h, axis=0, keepdims=True)
                  + b4_ref[...])                     # (1, tm) f32


def _choose_block(n, tm):
    """Pick a lane block so the grid has an even number of steps (v7x)."""
    if n < 128:
        return n, 1                                  # tiny: one full-dim block
    steps = _cdiv(n, tm)
    pairs = _cdiv(steps, 2)                          # steps per TensorCore
    block_n = _round_up(_cdiv(n, 2 * pairs), 128)    # <= tm since tm % 128 == 0
    return block_n, _cdiv(n, block_n)


@functools.partial(jax.jit, static_argnames=("tm",))
def polynomial2d_forward_t(x, params, tm=4096):
    """Feature-major forward (hot path): x is (2, N) f32 -> (1, N) f32."""
    (w1, b1), (w2, b2), (w3, b3), (w4, b4) = params
    assert x.shape[0] == INPUT_DIM
    assert tm % 128 == 0, "tm must be a multiple of 128 (lane width)"
    N = x.shape[1]

    block_n, steps = _choose_block(N, tm)
    grid = (steps,)

    # MXU operands in bf16 (weights cast once per call; they are tiny).
    w2_b = w2.astype(jnp.bfloat16)
    w3_b = w3.astype(jnp.bfloat16)
    w4_t = jnp.transpose(w4)                         # (32, 1) f32 for the VPU path

    def const_spec(shape):
        return pl.BlockSpec(shape, lambda i: (0,) * len(shape))

    out = pl.pallas_call(
        mlp_kernel,
        out_shape=jax.ShapeDtypeStruct((OUTPUT_DIM, N), jnp.float32),
        grid_spec=pltpu.PrefetchScalarGridSpec(
            num_scalar_prefetch=0,
            grid=grid,
            in_specs=[
                pl.BlockSpec((INPUT_DIM, block_n), lambda i: (0, i)),
                const_spec(w1.shape), const_spec(b1.shape),
                const_spec(w2_b.shape), const_spec(b2.shape),
                const_spec(w3_b.shape), const_spec(b3.shape),
                const_spec(w4_t.shape), const_spec(b4.shape),
            ],
            out_specs=pl.BlockSpec((OUTPUT_DIM, block_n), lambda i: (0, i)),
        ),
        compiler_params=pltpu.CompilerParams(
            dimension_semantics=("parallel",)),
    )(x, w1, b1, w2_b, b2, w3_b, b3, w4_t, b4)

    return out


def polynomial2d_forward(x, params, tm=4096):
    """PyTorch-compatible interface: x is (N, 2) -> (N, 1).

    NOTE: the .T on either side is a separate XLA transpose (extra HBM round
    trip); hot loops should call polynomial2d_forward_t directly.
    """
    out_t = polynomial2d_forward_t(x.T, params, tm=tm)   # (1, N)
    return out_t.T                                       # (N, 1)


def init_params(key):
    """Deterministic parameter init (PyTorch-Linear-like uniform bounds).

    Weights are (out_features, in_features), biases are (out_features, 1),
    matching the feature-major kernel layout (sublane-broadcast bias add).
    """
    def linear(key, fan_in, fan_out):
        kw, kb = jax.random.split(key)
        bound = 1.0 / jnp.sqrt(float(fan_in))
        w = jax.random.uniform(kw, (fan_out, fan_in), jnp.float32, -bound, bound)
        b = jax.random.uniform(kb, (fan_out, 1), jnp.float32, -bound, bound)
        return w, b

    k1, k2, k3, k4 = jax.random.split(key, 4)
    return (
        linear(k1, INPUT_DIM, HIDDEN_DIM),     # network[0]   Linear(2, 64)
        linear(k2, HIDDEN_DIM, HIDDEN_DIM),    # 'hidden'     Linear(64, 64)
        linear(k3, HIDDEN_DIM, HALF_DIM),      # 'downsample' Linear(64, 32)
        linear(k4, HALF_DIM, OUTPUT_DIM),      # 'output'     Linear(32, 1)
    )


def reference_forward(x, params):
    """Pure-f32 JAX reference.  x: (N, 2) -> (N, 1)."""
    (w1, b1), (w2, b2), (w3, b3), (w4, b4) = params
    h = _leaky_relu(x @ w1.T + b1.T)
    h = _leaky_relu(h @ w2.T + b2.T)
    h = _leaky_relu(h @ w3.T + b3.T)
    return h @ w4.T + b4.T


def reference_forward_mixed_t(x_t, params):
    """Feature-major reference matching the kernel's mixed precision."""
    (w1, b1), (w2, b2), (w3, b3), (w4, b4) = params
    h = _leaky_relu(w1 @ x_t + b1)
    h = _leaky_relu(jnp.dot(w2.astype(jnp.bfloat16), h.astype(jnp.bfloat16),
                            preferred_element_type=jnp.float32) + b2)
    h = _leaky_relu(jnp.dot(w3.astype(jnp.bfloat16), h.astype(jnp.bfloat16),
                            preferred_element_type=jnp.float32) + b3)
    return jnp.sum(w4.T * h, axis=0, keepdims=True) + b4


# TODO(synk): the fit() training loop (Adam, MSE loss, LR scheduler, early
# stopping) is host-side PyTorch training logic and is not translated here.


if __name__ == "__main__":
    key = jax.random.PRNGKey(0)
    k_params, k_x, k_y = jax.random.split(key, 3)

    params = init_params(k_params)

    # The module consumes flattened (x, y) coordinate pairs.  Stacking on
    # axis=0 yields the feature-major (2, N) layout for free.
    N = 4096
    xs = jax.random.uniform(k_x, (N,), jnp.float32, -1.0, 1.0)
    ys = jax.random.uniform(k_y, (N,), jnp.float32, -1.0, 1.0)

    inp_t = jnp.stack([xs, ys], axis=0)            # (2, N) feature-major
    out_t = polynomial2d_forward_t(inp_t, params)  # (1, N); grid=2 lane blocks
    out_t = jax.block_until_ready(out_t)
    assert out_t.shape == (OUTPUT_DIM, N), out_t.shape

    # Tight check against a reference with the same mixed precision as the kernel.
    ref_mixed = reference_forward_mixed_t(inp_t, params)
    assert jnp.allclose(out_t, ref_mixed, atol=1e-3, rtol=1e-3), \
        "mismatch vs mixed-precision JAX reference"

    # Loose sanity check against the pure-f32 reference (bf16 MXU operands).
    inp = jnp.stack([xs, ys], axis=1)              # (N, 2) like torch.cat((x, y), dim=1)
    ref_f32 = reference_forward(inp, params)       # (N, 1)
    assert jnp.allclose(out_t, ref_f32.T, atol=5e-2, rtol=5e-2), \
        "mismatch vs f32 JAX reference"

    # Also exercise the PyTorch-shaped interface and a batch that does not
    # divide 128 (even 2-step grid with a masked partial last block, no pad).
    M = 700
    inp_small = inp[:M]                            # (700, 2)
    out_small = polynomial2d_forward(inp_small, params)
    out_small = jax.block_until_ready(out_small)
    assert out_small.shape == (M, OUTPUT_DIM), out_small.shape
    ref_small_mixed = reference_forward_mixed_t(inp_small.T, params).T
    assert jnp.allclose(out_small, ref_small_mixed, atol=1e-3, rtol=1e-3), \
        "mismatch (partial block)"

    print("KERNEL_OK")
</pallas_src>

<mosaic_0001>
module attributes {stable_mosaic.version = 11 : i64} {
  func.func @mlp_kernel(%arg0: i32, %arg1: memref<2x2048xf32, #tpu.memory_space<vmem>>, %arg2: memref<64x2xf32, #tpu.memory_space<vmem>>, %arg3: memref<64x1xf32, #tpu.memory_space<vmem>>, %arg4: memref<64x64xbf16, #tpu.memory_space<vmem>>, %arg5: memref<64x1xf32, #tpu.memory_space<vmem>>, %arg6: memref<32x64xbf16, #tpu.memory_space<vmem>>, %arg7: memref<32x1xf32, #tpu.memory_space<vmem>>, %arg8: memref<32x1xf32, #tpu.memory_space<vmem>>, %arg9: memref<1x1xf32, #tpu.memory_space<vmem>>, %arg10: memref<1x2048xf32, #tpu.memory_space<vmem>>) attributes {dimension_semantics = [#tpu.dimension_semantics<parallel>], iteration_bounds = array<i64: 2>, scalar_prefetch = 0 : i64, scratch_operands = 0 : i64, tpu.core_type = #tpu.core_type<tc>, window_params = [{transform_indices = @transform_0, window_bounds = array<i64: 2, 2048>}, {pipeline_mode = #tpu.pipeline_mode<synchronous>, transform_indices = @transform_1, window_bounds = array<i64: 64, 2>}, {pipeline_mode = #tpu.pipeline_mode<synchronous>, transform_indices = @transform_2, window_bounds = array<i64: 64, 1>}, {pipeline_mode = #tpu.pipeline_mode<synchronous>, transform_indices = @transform_3, window_bounds = array<i64: 64, 64>}, {pipeline_mode = #tpu.pipeline_mode<synchronous>, transform_indices = @transform_4, window_bounds = array<i64: 64, 1>}, {pipeline_mode = #tpu.pipeline_mode<synchronous>, transform_indices = @transform_5, window_bounds = array<i64: 32, 64>}, {pipeline_mode = #tpu.pipeline_mode<synchronous>, transform_indices = @transform_6, window_bounds = array<i64: 32, 1>}, {pipeline_mode = #tpu.pipeline_mode<synchronous>, transform_indices = @transform_7, window_bounds = array<i64: 32, 1>}, {pipeline_mode = #tpu.pipeline_mode<synchronous>, transform_indices = @transform_8, window_bounds = array<i64: 1, 1>}, {transform_indices = @transform_9, window_bounds = array<i64: 1, 2048>}]} {
    %c0 = arith.constant 0 : index
    %c0_0 = arith.constant 0 : index
    %0 = vector.load %arg1[%c0, %c0_0] : memref<2x2048xf32, #tpu.memory_space<vmem>>, vector<2x2048xf32>
    %c0_1 = arith.constant 0 : index
    %c0_2 = arith.constant 0 : index
    %1 = vector.load %arg2[%c0_1, %c0_2] : memref<64x2xf32, #tpu.memory_space<vmem>>, vector<64x2xf32>
    %2 = vector.extract_strided_slice %1 {offsets = [0, 0], sizes = [64, 1], strides = [1, 1]} : vector<64x2xf32> to vector<64x1xf32>
    %3 = vector.extract_strided_slice %0 {offsets = [0, 0], sizes = [1, 2048], strides = [1, 1]} : vector<2x2048xf32> to vector<1x2048xf32>
    %4 = vector.broadcast %2 : vector<64x1xf32> to vector<64x2048xf32>
    %5 = vector.broadcast %3 : vector<1x2048xf32> to vector<64x2048xf32>
    %6 = arith.mulf %4, %5 : vector<64x2048xf32>
    %7 = vector.extract_strided_slice %1 {offsets = [0, 1], sizes = [64, 1], strides = [1, 1]} : vector<64x2xf32> to vector<64x1xf32>
    %8 = vector.extract_strided_slice %0 {offsets = [1, 0], sizes = [1, 2048], strides = [1, 1]} : vector<2x2048xf32> to vector<1x2048xf32>
    %9 = vector.broadcast %7 : vector<64x1xf32> to vector<64x2048xf32>
    %10 = vector.broadcast %8 : vector<1x2048xf32> to vector<64x2048xf32>
    %11 = arith.mulf %9, %10 : vector<64x2048xf32>
    %12 = arith.addf %6, %11 : vector<64x2048xf32>
    %c0_3 = arith.constant 0 : index
    %c0_4 = arith.constant 0 : index
    %13 = vector.load %arg3[%c0_3, %c0_4] : memref<64x1xf32, #tpu.memory_space<vmem>>, vector<64x1xf32>
    %14 = vector.broadcast %13 : vector<64x1xf32> to vector<64x2048xf32>
    %15 = arith.addf %12, %14 : vector<64x2048xf32>
    %cst = arith.constant 2.000000e-01 : f32
    %16 = vector.broadcast %cst : f32 to vector<64x2048xf32>
    %17 = arith.mulf %16, %15 : vector<64x2048xf32>
    %18 = arith.maximumf %15, %17 : vector<64x2048xf32>
    %c0_5 = arith.constant 0 : index
    %c0_6 = arith.constant 0 : index
    %19 = vector.load %arg4[%c0_5, %c0_6] : memref<64x64xbf16, #tpu.memory_space<vmem>>, vector<64x64xbf16>
    %20 = arith.truncf %18 : vector<64x2048xf32> to vector<64x2048xbf16>
    %cst_7 = arith.constant dense<0.000000e+00> : vector<64x2048xf32>
    %21 = tpu.matmul %19, %20, %cst_7 {dimension_numbers = #tpu.dot_dimension_numbers<[1], [0], [0], [1], [0, 0, 1, 1], [], []>} : vector<64x64xbf16>, vector<64x2048xbf16>, vector<64x2048xf32> -> vector<64x2048xf32>
    %c0_8 = arith.constant 0 : index
    %c0_9 = arith.constant 0 : index
    %22 = vector.load %arg5[%c0_8, %c0_9] : memref<64x1xf32, #tpu.memory_space<vmem>>, vector<64x1xf32>
    %23 = vector.broadcast %22 : vector<64x1xf32> to vector<64x2048xf32>
    %24 = arith.addf %21, %23 : vector<64x2048xf32>
    %cst_10 = arith.constant 2.000000e-01 : f32
    %25 = vector.broadcast %cst_10 : f32 to vector<64x2048xf32>
    %26 = arith.mulf %25, %24 : vector<64x2048xf32>
    %27 = arith.maximumf %24, %26 : vector<64x2048xf32>
    %c0_11 = arith.constant 0 : index
    %c0_12 = arith.constant 0 : index
    %28 = vector.load %arg6[%c0_11, %c0_12] : memref<32x64xbf16, #tpu.memory_space<vmem>>, vector<32x64xbf16>
    %29 = arith.truncf %27 : vector<64x2048xf32> to vector<64x2048xbf16>
    %cst_13 = arith.constant dense<0.000000e+00> : vector<32x2048xf32>
    %30 = tpu.matmul %28, %29, %cst_13 {dimension_numbers = #tpu.dot_dimension_numbers<[1], [0], [0], [1], [0, 0, 1, 1], [], []>} : vector<32x64xbf16>, vector<64x2048xbf16>, vector<32x2048xf32> -> vector<32x2048xf32>
    %c0_14 = arith.constant 0 : index
    %c0_15 = arith.constant 0 : index
    %31 = vector.load %arg7[%c0_14, %c0_15] : memref<32x1xf32, #tpu.memory_space<vmem>>, vector<32x1xf32>
    %32 = vector.broadcast %31 : vector<32x1xf32> to vector<32x2048xf32>
    %33 = arith.addf %30, %32 : vector<32x2048xf32>
    %cst_16 = arith.constant 2.000000e-01 : f32
    %34 = vector.broadcast %cst_16 : f32 to vector<32x2048xf32>
    %35 = arith.mulf %34, %33 : vector<32x2048xf32>
    %36 = arith.maximumf %33, %35 : vector<32x2048xf32>
    %c0_17 = arith.constant 0 : index
    %c0_18 = arith.constant 0 : index
    %37 = vector.load %arg8[%c0_17, %c0_18] : memref<32x1xf32, #tpu.memory_space<vmem>>, vector<32x1xf32>
    %38 = vector.broadcast %37 : vector<32x1xf32> to vector<32x2048xf32>
    %39 = arith.mulf %38, %36 : vector<32x2048xf32>
    %cst_19 = arith.constant dense<0.000000e+00> : vector<2048xf32>
    %40 = vector.multi_reduction <add>, %39, %cst_19 [0] : vector<32x2048xf32> to vector<2048xf32>
    %41 = vector.shape_cast %40 : vector<2048xf32> to vector<1x2048xf32>
    %c0_20 = arith.constant 0 : index
    %c0_21 = arith.constant 0 : index
    %42 = vector.load %arg9[%c0_20, %c0_21] : memref<1x1xf32, #tpu.memory_space<vmem>>, vector<1x1xf32>
    %43 = vector.broadcast %42 : vector<1x1xf32> to vector<1x2048xf32>
    %44 = arith.addf %41, %43 : vector<1x2048xf32>
    %c0_22 = arith.constant 0 : index
    %c0_23 = arith.constant 0 : index
    %45 = vector.load %arg10[%c0_22, %c0_23] : memref<1x2048xf32, #tpu.memory_space<vmem>>, vector<1x2048xf32>
    tpu.vector_store %arg10[%c0_22, %c0_23], %44 {strides = array<i32>} : memref<1x2048xf32, #tpu.memory_space<vmem>>, vector<1x2048xf32>,
    return
  }
  func.func @transform_0(%arg0: i32) -> (i32, i32) {
    %c0_i32 = arith.constant 0 : i32
    %c0_i32_0 = arith.constant 0 : i32
    return %c0_i32, %arg0 : i32, i32
  }
  func.func @transform_1(%arg0: i32) -> (i32, i32) {
    %c0_i32 = arith.constant 0 : i32
    %c0_i32_0 = arith.constant 0 : i32
    %c0_i32_1 = arith.constant 0 : i32
    return %c0_i32, %c0_i32_0 : i32, i32
  }
  func.func @transform_2(%arg0: i32) -> (i32, i32) {
    %c0_i32 = arith.constant 0 : i32
    %c0_i32_0 = arith.constant 0 : i32
    %c0_i32_1 = arith.constant 0 : i32
    return %c0_i32, %c0_i32_0 : i32, i32
  }
  func.func @transform_3(%arg0: i32) -> (i32, i32) {
    %c0_i32 = arith.constant 0 : i32
    %c0_i32_0 = arith.constant 0 : i32
    %c0_i32_1 = arith.constant 0 : i32
    return %c0_i32, %c0_i32_0 : i32, i32
  }
  func.func @transform_4(%arg0: i32) -> (i32, i32) {
    %c0_i32 = arith.constant 0 : i32
    %c0_i32_0 = arith.constant 0 : i32
    %c0_i32_1 = arith.constant 0 : i32
    return %c0_i32, %c0_i32_0 : i32, i32
  }
  func.func @transform_5(%arg0: i32) -> (i32, i32) {
    %c0_i32 = arith.constant 0 : i32
    %c0_i32_0 = arith.constant 0 : i32
    %c0_i32_1 = arith.constant 0 : i32
    return %c0_i32, %c0_i32_0 : i32, i32
  }
  func.func @transform_6(%arg0: i32) -> (i32, i32) {
    %c0_i32 = arith.constant 0 : i32
    %c0_i32_0 = arith.constant 0 : i32
    %c0_i32_1 = arith.constant 0 : i32
    return %c0_i32, %c0_i32_0 : i32, i32
  }
  func.func @transform_7(%arg0: i32) -> (i32, i32) {
    %c0_i32 = arith.constant 0 : i32
    %c0_i32_0 = arith.constant 0 : i32
    %c0_i32_1 = arith.constant 0 : i32
    return %c0_i32, %c0_i32_0 : i32, i32
  }
  func.func @transform_8(%arg0: i32) -> (i32, i32) {
    %c0_i32 = arith.constant 0 : i32
    %c0_i32_0 = arith.constant 0 : i32
    %c0_i32_1 = arith.constant 0 : i32
    return %c0_i32, %c0_i32_0 : i32, i32
  }
  func.func @transform_9(%arg0: i32) -> (i32, i32) {
    %c0_i32 = arith.constant 0 : i32
    %c0_i32_0 = arith.constant 0 : i32
    return %c0_i32, %arg0 : i32, i32
  }
}

</mosaic_0001>

<bundles_post_ra>
// kernel: polynomial2d_forward_t.1
= control target key start
LH: loop header
LB: loop body
LE: loop exit
PB: predicated region body
PF: predicated region fallthrough
CT: control target
= control target key end

     0   :  { %s5684_s0 = inlined_call_operand.vmem [shape: f32[2,4096], index: 0, kind: input, shape index: {}]   ;;  %s5685_s1 = inlined_call_operand.vmem [shape: f32[64,2], index: 1, kind: input, shape index: {}]   ;;  %s5686_s2 = inlined_call_operand.vmem [shape: f32[64,1], index: 2, kind: input, shape index: {}]   ;;  %s5687_s3 = inlined_call_operand.vmem [shape: bf16[64,64], index: 3, kind: input, shape index: {}]   ;;  %s5688_s4 = inlined_call_operand.vmem [shape: f32[64,1], index: 4, kind: input, shape index: {}]   ;;  %s5689_s5 = inlined_call_operand.vmem [shape: bf16[32,64], index: 5, kind: input, shape index: {}]   ;;  %s5690_s6 = inlined_call_operand.vmem [shape: f32[32,1], index: 6, kind: input, shape index: {}]   ;;  %s5691_s7 = inlined_call_operand.vmem [shape: f32[32,1], index: 7, kind: input, shape index: {}]   ;;  %s5692_s8 = inlined_call_operand.<no memory space> [shape: f32[1,1], index: 8, kind: input, shape index: {}]   ;;  %s5693_s9 = inlined_call_operand.hbm [shape: f32[1,4096], index: 9, kind: output, shape index: {}]  }
   0x1   :  { %v14_v0 = vstv %s5692_s8 }
   0x2   :  { %15 = vst [vmem:[#allocation2] sm:$0x1] %v14_v0 }
   0x3   :  { %16 = vsyncpa [#allocation4], 0 }
   0x4   :  { %18 = vsyncpa [#allocation4 + $0x1], 0  ;;  %s3883_s11 = smov 0   ;;  %s3885_s12 = smov 0  }
   0x5   :  { %s3887_s13 = smov 0   ;;  %s3889_s14 = smov 0  }
   0x6 LB: > { %s3904_s8 = sadd.s32 4294967295, %s3824_s14   ;;  %s3632_s15 = sadd.s32 4294967294, %s3824_s14   ;;  %s3824_s14 = sphi %s3889_s14, %s5890_s14   ;;  %s3820_s13 = sphi %s3887_s13, %s5889_s13   ;;  %s3816_s12 = sphi %s3885_s12, %s5888_s12   ;;  %s3812_s11 = sphi %s3883_s11, %s5887_s11  }
   0x7   : > { %s3908_s16 = sadd.s32 1, %s3824_s14   ;;  %s225_s17 = sadd.s32 1, %s3820_s13 }
   0x8   : > { %s222_s18 = ssub.s32 %s3824_s14, %s3908_s16  ;;  %p235_p0 = scmp.ne.s32.totalorder %s3820_s13, %s3816_s12 }
   0x9   : > { %p223_p1 = scmp.eq.s32.totalorder %s222_s18, 0  ;;  %p236_p2 = scmp.eq.s32.totalorder %s3904_s8, 1 }
   0xa   : > { %p241_p3 = scmp.ne.s32.totalorder %s3816_s12, %s3812_s11  ;;  %p242_p4 = scmp.eq.s32.totalorder %s3632_s15, 1 }
   0xb   : > { %s3919_s19 = scalar_select %p223_p1, %s3820_s13, %s225_s17  }
   0xc   : > { %p3921_p5 = por %p236_p2, %p235_p0  ;;  %p3925_p6 = por %p242_p4, %p241_p3 }
   0xd   : > { %p3635_p7 = scmp.ge.s32.totalorder %s3824_s14, 1  ;;  %p293_p8 = scmp.lt.s32.totalorder %s3824_s14, 3 }
   0xf   : > { %p294_p9 = pnand %p3635_p7, %p293_p8 }
  0x11   : > { %297 = sbr.rel (%p294_p9) target bundleno = 906 (0x38a), region = 56 }
  0x18   : > { %v343_v1 = vld [vmem:[%s5685_s1 + $0x10] sm:$0xff]  ;;  %v341_v2 = vld [vmem:[%s5685_s1] sm:$0xff]  ;;  %v3826_v3 = vmov 1   ;;  %v342_v5 = vld [vmem:[%s5685_s1 + $0x8] sm:$0xff]  ;;  %v5694_v6 = vmov 0   ;;  %s3637_s18 = sshll.u32 %s3904_s8, 4  ;;  %v393_v36 = vlaneseq }
  0x19   : > { %3743 = vset.pattern.permute.xlu0 %v3826_v3  ;;  %3741 = vset.pattern.permute.xlu1 %v3826_v3  ;;  %v345_v4 = vld [vmem:[%s5685_s1 + $0x20] sm:$0xff]  ;;  %v347_v7 = vld [vmem:[%s5685_s1 + $0x30] sm:$0xff]  ;;  %v344_v8 = vld [vmem:[%s5685_s1 + $0x18] sm:$0xff]  ;;  %p330_p10 = scmp.lt.s32.totalorder %s3637_s18, 31  ;;  %vm1669_vm0 = vcmask 523264   ;;  %s3829_s10 = smov [#allocation3]  }
  0x1a   : > { %674 = vperm.xlu0 %3743, %v343_v1   ;;  %666 = vperm.xlu1 %3741, %v341_v2   ;;  %v1097_v9 = vld [vmem:[%s5686_s2] sm:$0xff]  ;;  %v1098_v10 = vld [vmem:[%s5686_s2 + $0x8] sm:$0xff]  ;;  %v1100_v12 = vld [vmem:[%s5686_s2 + $0x18] sm:$0xff]  ;;  %v4035_v37 = vshrl.u32 %v393_v36, 7  ;;  %s3766_s15 = sshll.u32 %s3829_s10, 4  ;;  %s3767_s15 = int_to_ptr.vmem [resolvable:$false] %s3766_s15 }
  0x1b   : > { %1714 = vmatprep.mubr.bf16.mxu0 %v5694_v6  ;;  %1787 = vmatprep.mubr.bf16.mxu1 %v5694_v6  ;;  %v346_v11 = vld [vmem:[%s5685_s1 + $0x28] sm:$0xff]  ;;  %v1601_v14 = vld [vmem:[%s5688_s4] sm:$0xff]  ;;  %v1099_v15 = vld [vmem:[%s5686_s2 + $0x10] sm:$0xff]  ;;  %s5892_s18 = smov (!%p330_p10, %s3637_s18), 31  ;;  %s3768_s17 = scalar_lea.vmem %s3767_s15, 512 }
  0x1c   : > { %v1102_v13 = vld [vmem:[%s5686_s2 + $0x28] sm:$0xff]  ;;  %v1603_v16 = vld [vmem:[%s5688_s4 + $0x10] sm:$0xff]  ;;  %v1605_v17 = vld [vmem:[%s5688_s4 + $0x20] sm:$0xff]  ;;  %s3638_s22 = sshll.u32 %s5892_s18, 1  ;;  %5757 = vst [vmem:[#allocation6_spill] sm:$0xff] %v4035_v37  ;;  %v4043_v38 = vsub.s32 2, %v4035_v37 }
  0x1d   : > { %v348_v18 = vld [vmem:[%s5685_s1 + $0x38] sm:$0xff]  ;;  %v1607_v19 = vld [vmem:[%s5688_s4 + $0x30] sm:$0xff]  ;;  %v2590_v20 = vld [vmem:[%s5690_s6] sm:$0xff]  ;;  %s4040_s25 = scalar_lea.vmem %s5684_s0, %s3638_s22  ;;  %v4046_v39 = vsub.s32 3, %v4035_v37  ;;  %v4050_v41 = vsub.s32 0, %v4035_v37  ;;  %v4053_v42 = vsub.s32 1, %v4035_v37 }
  0x1e   : > { %682 = vperm.xlu0 %3743, %v345_v4   ;;  %670 = vperm.xlu1 %3741, %v342_v5   ;;  %v1101_v21 = vld [vmem:[%s5686_s2 + $0x20] sm:$0xff]  ;;  %v2592_v22 = vld [vmem:[%s5690_s6 + $0x10] sm:$0xff]  ;;  %v1104_v25 = vld [vmem:[%s5686_s2 + $0x38] sm:$0xff]  ;;  %5758 = vst [vmem:[#allocation7_spill] sm:$0xff] %v4043_v38  ;;  %v4056_v43 = vsub.s32 6, %v4035_v37  ;;  %v4059_v44 = vsub.s32 7, %v4035_v37 }
  0x1f   : > { %v1103_v23 = vld [vmem:[%s5686_s2 + $0x30] sm:$0xff]  ;;  %v3182_v24 = vld [vmem:[%s5691_s7] sm:$0xff]  ;;  %v1602_v27 = vld [vmem:[%s5688_s4 + $0x8] sm:$0xff]  ;;  %5759 = vst [vmem:[#allocation8_spill] sm:$0xff] %v4046_v39  ;;  %v4062_v45 = vsub.s32 4, %v4035_v37  ;;  %v4065_v46 = vsub.s32 5, %v4035_v37 }
  0x20   : > { %v3184_v26 = vld [vmem:[%s5691_s7 + $0x10] sm:$0xff]  ;;  %v3414_v28 = vld [vmem:[#allocation2] sm:$0x1]  ;;  %v1604_v29 = vld [vmem:[%s5688_s4 + $0x18] sm:$0xff]  ;;  %5760 = vst [vmem:[#allocation9_spill] sm:$0xff] %v4050_v41  ;;  %s326_s22 = sand.u32 1, %s3816_s12  }
  0x21   : > { %v1606_v30 = vld [vmem:[%s5688_s4 + $0x28] sm:$0xff]  ;;  %v1608_v31 = vld [vmem:[%s5688_s4 + $0x38] sm:$0xff]  ;;  %v337_v40 = vld [vmem:[%s4040_s25] sm:$0xff]  ;;  %5761 = vst [vmem:[#allocation10_spill] sm:$0xff] %v4053_v42  ;;  %s3636_s23 = sshll.u32 %s326_s22, 4 }
  0x22   : > { %690 = vperm.xlu0 %3743, %v347_v7   ;;  %3742 = vset.pattern.permute.xlu1 %v5694_v6  ;;  %v2591_v32 = vld [vmem:[%s5690_s6 + $0x8] sm:$0xff]  ;;  %v2593_v33 = vld [vmem:[%s5690_s6 + $0x18] sm:$0xff]  ;;  %5762 = vst [vmem:[#allocation11_spill] sm:$0xff] %v4056_v43  ;;  %5763 = vst [vmem:[#allocation12_spill] sm:$0xff] %v4059_v44  ;;  %v400_v47 = vrot.slane %v337_v40, %v4043_v38  ;;  %v704_v48 = vrot.slane %v337_v40, %v4046_v39  ;;  %s5544_s24 = scalar_lea.vmem [#allocation3], %s3636_s23 }
  0x23   : > { %366 = vperm.xlu1 %3742, %v344_v8   ;;  %v3183_v34 = vld [vmem:[%s5691_s7 + $0x8] sm:$0xff]  ;;  %v3185_v35 = vld [vmem:[%s5691_s7 + $0x18] sm:$0xff]  ;;  %5764 = vst [vmem:[#allocation13_spill] sm:$0xff] %v4062_v45  ;;  %5765 = vst [vmem:[#allocation14_spill] sm:$0xff] %v4065_v46  ;;  %v408_v49 = vrot.slane %v337_v40, %v4056_v43  ;;  %v712_v50 = vrot.slane %v337_v40, %v4059_v44  ;;  %v396_v51 = vrot.slane %v337_v40, %v4050_v41  ;;  %s3573_s26 = sshll.u32 %s5544_s24, 4  ;;  %s5641_s26 = int_to_ptr.vmem [resolvable:$true] %s3573_s26 }
  0x24   : > { %v700_v52 = vrot.slane %v337_v40, %v4053_v42  ;;  %v404_v53 = vrot.slane %v337_v40, %v4062_v45  ;;  %v708_v54 = vrot.slane %v337_v40, %v4065_v46  ;;  %v338_v55 = vld [vmem:[%s4040_s25 + $0x8] sm:$0xff]  ;;  %v4077_v56 = vrot.slane %v400_v47, %v4050_v41  ;;  %v339_v62 = vld [vmem:[%s4040_s25 + $0x10] sm:$0xff]  ;;  %s3762_s30 = scalar_lea.vmem %s5641_s26, 256  ;;  %p3769_p0 = scmp.lt.s32.totalorder %s5641_s26, %s3767_s15 }
  0x25   : > { %v4080_v57 = vrot.slane %v704_v48, %v4053_v42  ;;  %v4083_v58 = vrot.slane %v408_v49, %v4050_v41  ;;  %v4086_v59 = vrot.slane %v712_v50, %v4053_v42  ;;  %v4089_v60 = vrot.slane %v396_v51, %v4050_v41  ;;  %p3763_p11 = scmp.ne.s32.totalorder %s5641_s26, %s3762_s30  ;;  %p3770_p1 = scmp.lt.s32.totalorder %s3768_s17, %s3762_s30 }
  0x26   : > { %3748 = vset.pattern.permute.xlu0 %v5694_v6  ;;  %v4092_v61 = vrot.slane %v700_v52, %v4053_v42  ;;  %v4096_v63 = vrot.slane %v404_v53, %v4050_v41  ;;  %v4099_v0 = vrot.slane %v708_v54, %v4053_v42 }
  0x27   : > { %351 = vperm.xlu0 %3748, %v341_v2   ;;  %3744 = vset.pattern.permute.xlu1 %v3826_v3  ;;  %v720_v2 = vrot.slane %v338_v55, %v4046_v39  ;;  %p3764_p12 = pnand %p3763_p11, %p3921_p5  ;;  %p3771_p2 = por %p3770_p1, %p3769_p0 }
  0x28   : > { %678 = vperm.xlu1 %3744, %v344_v8   ;;  %v420_v8 = vrot.slane %v338_v55, %v4062_v45 }
  0x29   : > { %p3765_p13 = pneg %p3764_p12 }
  0x2b   : > { %356 = vperm.xlu0 %3748, %v342_v5   ;;  %v412_v5 = vrot.slane %v338_v55, %v4050_v41  ;;  %p3772_p3 = pnand %p3771_p2, %p3765_p13 }
  0x2c   : > { %3745 = vset.pattern.permute.xlu1 %v5694_v6 }
  0x2d   : > { %1107 = vperm.xlu1 %3745, %v1097_v9   ;;  %v724_v9 = vrot.slane %v338_v55, %v4065_v46 }
  0x2f   : > { %361 = vperm.xlu0 %3748, %v343_v1   ;;  %v416_v1 = vrot.slane %v338_v55, %v4043_v38 }
  0x31   : > { %371 = vperm.xlu1 %3745, %v345_v4   ;;  %v728_v4 = vrot.slane %v338_v55, %v4059_v44 }
  0x33   : > { %1112 = vperm.xlu0 %3748, %v1098_v10   ;;  %v432_v10 = vrot.slane %v339_v62, %v4043_v38 }
  0x35   : > { %376 = vperm.xlu1 %3745, %v346_v11  }
  0x37   : > { %1122 = vperm.xlu0 %3748, %v1100_v12   ;;  %v440_v12 = vrot.slane %v339_v62, %v4056_v43 }
  0x39   : > { %3746 = vset.pattern.permute.xlu1 %v3826_v3 }
  0x3a   : > { %686 = vperm.xlu1 %3746, %v346_v11   ;;  %v736_v11 = vrot.slane %v339_v62, %v4046_v39 }
  0x3b   : > { %1132 = vperm.xlu0 %3748, %v1102_v13   ;;  %v744_v13 = vrot.slane %v339_v62, %v4059_v44 }
  0x3e   : > { %3747 = vset.pattern.permute.xlu1 %v5694_v6 }
  0x3f   : > { %1611 = vperm.xlu0 %3748, %v1601_v14   ;;  %1117 = vperm.xlu1 %3747, %v1099_v15   ;;  %v428_v14 = vrot.slane %v339_v62, %v4050_v41  ;;  %v732_v15 = vrot.slane %v339_v62, %v4053_v42 }
  0x43   : > { %1621 = vperm.xlu0 %3748, %v1603_v16   ;;  %381 = vperm.xlu1 %3747, %v347_v7   ;;  %v716_v7 = vrot.slane %v338_v55, %v4053_v42  ;;  %v4116_v16 = vrot.slane %v416_v1, %v4050_v41 }
  0x45   : > { %5766 = vst [vmem:[#allocation15_spill] sm:$0xff] %v4116_v16 }
  0x47   : > { %1631 = vperm.xlu0 %3748, %v1605_v17   ;;  %386 = vperm.xlu1 %3747, %v348_v18   ;;  %v4119_v17 = vrot.slane %v720_v2, %v4053_v42 }
  0x49   : > { %5767 = vst [vmem:[#allocation16_spill] sm:$0xff] %v4119_v17 }
  0x4b   : > { %1641 = vperm.xlu0 %3748, %v1607_v19   ;;  %3749 = vset.pattern.permute.xlu1 %v3826_v3  ;;  %v424_v3 = vrot.slane %v338_v55, %v4056_v43  ;;  %v740_v19 = vrot.slane %v339_v62, %v4065_v46 }
  0x4c   : > { %694 = vperm.xlu1 %3749, %v348_v18   ;;  %v436_v18 = vrot.slane %v339_v62, %v4062_v45 }
  0x4d   : > { %v4175_v40 = vrot.slane %v740_v19, %v4053_v42 }
  0x4e   : > { %v4172_v36 = vrot.slane %v436_v18, %v4050_v41 }
  0x4f   : > { %2596 = vperm.xlu0 %3748, %v2590_v20   ;;  %v4124_v20 = vrot.slane %v424_v3, %v4050_v41  ;;  %5783 = vst [vmem:[#allocation32_spill] sm:$0xff] %v4175_v40 }
  0x50   : > { %3750 = vset.pattern.permute.xlu1 %v5694_v6  ;;  %5782 = vst [vmem:[#allocation31_spill] sm:$0xff] %v4172_v36 }
  0x51   : > { %1127 = vperm.xlu1 %3750, %v1101_v21   ;;  %5768 = vst [vmem:[#allocation17_spill] sm:$0xff] %v4124_v20  ;;  %v4127_v21 = vrot.slane %v728_v4, %v4053_v42 }
  0x53   : > { %2606 = vperm.xlu0 %3748, %v2592_v22   ;;  %5769 = vst [vmem:[#allocation18_spill] sm:$0xff] %v4127_v21  ;;  %v4130_v22 = vrot.slane %v412_v5, %v4050_v41 }
  0x55   : > { %1137 = vperm.xlu1 %3750, %v1103_v23   ;;  %5770 = vst [vmem:[#allocation19_spill] sm:$0xff] %v4130_v22  ;;  %v4133_v23 = vrot.slane %v716_v7, %v4053_v42 }
  0x57   : > { %3188 = vperm.xlu0 %3748, %v3182_v24   ;;  %5771 = vst [vmem:[#allocation20_spill] sm:$0xff] %v4133_v23  ;;  %v4136_v24 = vrot.slane %v420_v8, %v4050_v41 }
  0x59   : > { %1142 = vperm.xlu1 %3750, %v1104_v25   ;;  %5772 = vst [vmem:[#allocation21_spill] sm:$0xff] %v4136_v24  ;;  %v4139_v25 = vrot.slane %v724_v9, %v4053_v42 }
  0x5b   : > { %3198 = vperm.xlu0 %3748, %v3184_v26   ;;  %5773 = vst [vmem:[#allocation22_spill] sm:$0xff] %v4139_v25  ;;  %v4142_v26 = vrot.slane %v432_v10, %v4050_v41 }
  0x5d   : > { %1616 = vperm.xlu1 %3750, %v1602_v27   ;;  %5774 = vst [vmem:[#allocation23_spill] sm:$0xff] %v4142_v26  ;;  %v4145_v27 = vrot.slane %v736_v11, %v4053_v42 }
  0x5f   : > { %3417 = vperm.xlu0 %3748, %v3414_v28   ;;  %5775 = vst [vmem:[#allocation24_spill] sm:$0xff] %v4145_v27 }
  0x61   : > { %1626 = vperm.xlu1 %3750, %v1604_v29  }
  0x65   : > { %1636 = vperm.xlu1 %3750, %v1606_v30   ;;  %v4152_v30 = vrot.slane %v440_v12, %v4050_v41 }
  0x67   : > { %5778 = vst [vmem:[#allocation27_spill] sm:$0xff] %v4152_v30 }
  0x69   : > { %1646 = vperm.xlu1 %3750, %v1608_v31   ;;  %v4155_v31 = vrot.slane %v744_v13, %v4053_v42 }
  0x6b   : > { %5779 = vst [vmem:[#allocation28_spill] sm:$0xff] %v4155_v31 }
  0x6d   : > { %2601 = vperm.xlu1 %3750, %v2591_v32   ;;  %v4158_v32 = vrot.slane %v428_v14, %v4050_v41 }
  0x6f   : > { %5780 = vst [vmem:[#allocation29_spill] sm:$0xff] %v4158_v32 }
  0x71   : > { %2611 = vperm.xlu1 %3750, %v2593_v33   ;;  %v4161_v33 = vrot.slane %v732_v15, %v4053_v42 }
  0x73   : > { %5781 = vst [vmem:[#allocation30_spill] sm:$0xff] %v4161_v33 }
  0x75   : > { %3193 = vperm.xlu1 %3750, %v3183_v34  }
  0x79   : > { %3203 = vperm.xlu1 %3750, %v3185_v35  }
  0x99   : > { %v4147_v28 = vpop.permute.xlu1 %666  ;;  %v4149_v29 = vpop.permute.xlu0 %674 }
  0x9a   : > { %5776 = vst [vmem:[#allocation25_spill] sm:$0xff] %v4147_v28  ;;  %5777 = vst [vmem:[#allocation26_spill] sm:$0xff] %v4149_v29  ;;  %v4165_v34 = vmul.f32 %v4080_v57, %v4147_v28  ;;  %v4169_v35 = vmul.f32 %v4086_v59, %v4147_v28  ;;  %v4179_v47 = vmul.f32 %v4092_v61, %v4147_v28 }
  0x9b   : > { %v4183_v48 = vmul.f32 %v4099_v0, %v4147_v28  ;;  %v4187_v49 = vmul.f32 %v4080_v57, %v4149_v29  ;;  %v4191_v50 = vmul.f32 %v4086_v59, %v4149_v29  ;;  %v4195_v51 = vmul.f32 %v4092_v61, %v4149_v29 }
  0x9c   : > { %v4199_v52 = vmul.f32 %v4099_v0, %v4149_v29  ;;  %v4203_v53 = vmul.f32 %v4119_v17, %v4147_v28  ;;  %v4207_v54 = vmul.f32 %v4127_v21, %v4147_v28  ;;  %v4215_v1 = vmul.f32 %v4133_v23, %v4147_v28 }
  0x9d   : > { %v4209_v55 = vpop.permute.xlu1 %670  ;;  %v4211_v62 = vpop.permute.xlu0 %682  ;;  %v4219_v2 = vmul.f32 %v4139_v25, %v4147_v28  ;;  %v4223_v3 = vmul.f32 %v4119_v17, %v4149_v29  ;;  %v4227_v4 = vmul.f32 %v4127_v21, %v4149_v29  ;;  %v4239_v8 = vmul.f32 %v4133_v23, %v4149_v29 }
  0x9e   : > { %5784 = vst [vmem:[#allocation33_spill] sm:$0xff] %v4209_v55  ;;  %5785 = vst [vmem:[#allocation34_spill] sm:$0xff] %v4211_v62  ;;  %v4231_v5 = vmul.f32 %v4080_v57, %v4209_v55  ;;  %v4235_v7 = vmul.f32 %v4086_v59, %v4209_v55  ;;  %v4243_v9 = vmul.f32 %v4139_v25, %v4149_v29 }
  0x9f   : > { %5786 = vst [vmem:[#allocation35_spill] sm:$0xff] %v4215_v1  ;;  %5787 = vst [vmem:[#allocation36_spill] sm:$0xff] %v4219_v2  ;;  %v4247_v10 = vmul.f32 %v4092_v61, %v4209_v55  ;;  %v4251_v11 = vmul.f32 %v4099_v0, %v4209_v55  ;;  %v4255_v12 = vmul.f32 %v4080_v57, %v4211_v62 }
  0xa0   : > { %5788 = vst [vmem:[#allocation37_spill] sm:$0xff] %v4223_v3  ;;  %5789 = vst [vmem:[#allocation38_spill] sm:$0xff] %v4227_v4  ;;  %v4259_v13 = vmul.f32 %v4086_v59, %v4211_v62  ;;  %v4263_v14 = vmul.f32 %v4092_v61, %v4211_v62  ;;  %v4267_v15 = vmul.f32 %v4099_v0, %v4211_v62 }
  0xa1   : > { %5790 = vst [vmem:[#allocation39_spill] sm:$0xff] %v4239_v8  ;;  %5791 = vst [vmem:[#allocation40_spill] sm:$0xff] %v4243_v9  ;;  %v4271_v18 = vmul.f32 %v4119_v17, %v4209_v55  ;;  %v4275_v19 = vmul.f32 %v4127_v21, %v4209_v55  ;;  %v4277_v6 = vpop.permute.xlu0 %690  ;;  %v4281_v37 = vmul.f32 %v4133_v23, %v4209_v55 }
  0xa2   : > { %5792 = vst [vmem:[#allocation41_spill] sm:$0xff] %v4277_v6  ;;  %v4285_v46 = vmul.f32 %v4139_v25, %v4209_v55  ;;  %v4289_v45 = vmul.f32 %v4119_v17, %v4211_v62  ;;  %v4293_v44 = vmul.f32 %v4127_v21, %v4211_v62  ;;  %v4295_v42 = vpop.permute.xlu1 %366  ;;  %v4299_v43 = vmul.f32 %v4080_v57, %v4277_v6 }
  0xa3   : > { %5793 = vst [vmem:[#allocation42_spill] sm:$0xff] %v4281_v37  ;;  %5797 = vst [vmem:[#allocation46_spill] sm:$0xff] %v4295_v42  ;;  %v4303_v39 = vmul.f32 %v4086_v59, %v4277_v6  ;;  %v4307_v41 = vmul.f32 %v4133_v23, %v4211_v62  ;;  %v4311_v38 = vmul.f32 %v4139_v25, %v4211_v62 }
  0xa4   : > { %5794 = vst [vmem:[#allocation43_spill] sm:$0xff] %v4285_v46  ;;  %5795 = vst [vmem:[#allocation44_spill] sm:$0xff] %v4289_v45  ;;  %v586_v29 = vmul.f32 %v4077_v56, %v4295_v42  ;;  %v588_v40 = vmul.f32 %v4083_v58, %v4295_v42  ;;  %v4319_v36 = vmul.f32 %v4092_v61, %v4277_v6 }
  0xa5   : > { %5796 = vst [vmem:[#allocation45_spill] sm:$0xff] %v4293_v44  ;;  %5798 = vst [vmem:[#allocation47_spill] sm:$0xff] %v4307_v41  ;;  %v4323_v33 = vmul.f32 %v4099_v0, %v4277_v6  ;;  %v585_v32 = vmul.f32 %v4089_v60, %v4295_v42  ;;  %v587_v62 = vmul.f32 %v4096_v63, %v4295_v42 }
  0xa6   : > { %5799 = vst [vmem:[#allocation48_spill] sm:$0xff] %v4311_v38  ;;  %5800 = vst [vmem:[#allocation49_spill] sm:$0xff] %v4319_v36  ;;  %v4331_v30 = vmul.f32 %v4116_v16, %v4295_v42  ;;  %v4335_v26 = vmul.f32 %v4124_v20, %v4295_v42  ;;  %v4339_v38 = vmul.f32 %v4130_v22, %v4295_v42  ;;  %v4353_v9 = vpop.permute.xlu0 %351 }
  0xa7   : > { %5801 = vst [vmem:[#allocation50_spill] sm:$0xff] %v4323_v33  ;;  %v4343_v41 = vmul.f32 %v4136_v24, %v4295_v42  ;;  %v4347_v44 = vmul.f32 %v4119_v17, %v4277_v6  ;;  %v4351_v45 = vmul.f32 %v4127_v21, %v4277_v6  ;;  %5808 = vst [vmem:[#allocation57_spill] sm:$0xff] %v4353_v9 }
  0xa8   : > { %5802 = vst [vmem:[#allocation51_spill] sm:$0xff] %v4331_v30  ;;  %5803 = vst [vmem:[#allocation52_spill] sm:$0xff] %v4335_v26  ;;  %v4357_v8 = vmul.f32 %v4133_v23, %v4277_v6  ;;  %v4365_v42 = vmul.f32 %v4145_v27, %v4147_v28  ;;  %v4393_v4 = vmul.f32 %v4155_v31, %v4147_v28 }
  0xa9   : > { %5804 = vst [vmem:[#allocation53_spill] sm:$0xff] %v4339_v38  ;;  %5805 = vst [vmem:[#allocation54_spill] sm:$0xff] %v4343_v41  ;;  %v4361_v38 = vmul.f32 %v4139_v25, %v4277_v6  ;;  %v4371_v41 = vpop.permute.xlu1 %678  ;;  %v537_v6 = vmul.f32 %v4089_v60, %v4353_v9  ;;  %v4397_v21 = vmul.f32 %v4155_v31, %v4209_v55 }
  0xaa   : > { %5806 = vst [vmem:[#allocation55_spill] sm:$0xff] %v4347_v44  ;;  %5807 = vst [vmem:[#allocation56_spill] sm:$0xff] %v4351_v45  ;;  %v4369_v44 = vmul.f32 %v4145_v27, %v4209_v55  ;;  %v538_v45 = vmul.f32 %v4077_v56, %v4353_v9  ;;  %v892_v27 = vmul.f32 %v4086_v59, %v4371_v41  ;;  %v4399_v30 = vpop.permute.xlu0 %356 }
  0xab   : > { %5809 = vst [vmem:[#allocation58_spill] sm:$0xff] %v4357_v8  ;;  %5810 = vst [vmem:[#allocation59_spill] sm:$0xff] %v4361_v38  ;;  %v540_v8 = vmul.f32 %v4083_v58, %v4353_v9  ;;  %v539_v38 = vmul.f32 %v4096_v63, %v4353_v9  ;;  %v891_v25 = vmul.f32 %v4099_v0, %v4371_v41 }
  0xac   : > { %5811 = vst [vmem:[#allocation60_spill] sm:$0xff] %v4365_v42  ;;  %5812 = vst [vmem:[#allocation61_spill] sm:$0xff] %v4369_v44  ;;  %v890_v42 = vmul.f32 %v4080_v57, %v4371_v41  ;;  %v889_v44 = vmul.f32 %v4092_v61, %v4371_v41  ;;  %v970_v23 = vadd.f32 %v4165_v34, %v538_v45 }
  0xad   : > { %5813 = vst [vmem:[#allocation62_spill] sm:$0xff] %v4371_v41  ;;  %v972_v26 = vadd.f32 %v4169_v35, %v540_v8  ;;  %5814 = vst [vmem:[#allocation63_spill] sm:$0xff] %v4393_v4  ;;  %v969_v3 = vadd.f32 %v4179_v47, %v537_v6  ;;  %v971_v17 = vadd.f32 %v4183_v48, %v539_v38  ;;  %v4407_v28 = vpop.permute.xlu1 %1107 }
  0xae   : > { %5815 = vst [vmem:[#allocation64_spill] sm:$0xff] %v4397_v21  ;;  %5816 = vst [vmem:[#allocation65_spill] sm:$0xff] %v4399_v30  ;;  %v1018_v46 = vadd.f32 %v890_v42, %v586_v29  ;;  %v1020_v41 = vadd.f32 %v892_v27, %v588_v40  ;;  %v554_v45 = vmul.f32 %v4077_v56, %v4399_v30 }
  0xaf   : > { %v556_v34 = vmul.f32 %v4083_v58, %v4399_v30  ;;  %v1017_v35 = vadd.f32 %v889_v44, %v585_v32  ;;  %v1019_v8 = vadd.f32 %v891_v25, %v587_v62  ;;  %v553_v31 = vmul.f32 %v4089_v60, %v4399_v30  ;;  %v4431_v32 = vpop.permute.xlu0 %361 }
  0xb0   : > { %v555_v6 = vmul.f32 %v4096_v63, %v4399_v30  ;;  %v4415_v38 = vmul.f32 %v4116_v16, %v4353_v9  ;;  %v4419_v42 = vmul.f32 %v4116_v16, %v4399_v30  ;;  %v1146_v27 = vadd.f32 %v4407_v28, %v970_v23  ;;  %5817 = vst [vmem:[#allocation66_spill] sm:$0xff] %v4431_v32 }
  0xb1   : > { %v1148_v44 = vadd.f32 %v4407_v28, %v972_v26  ;;  %v4425_v25 = vmul.f32 %v4124_v20, %v4353_v9  ;;  %v4429_v29 = vmul.f32 %v4124_v20, %v4399_v30  ;;  %v986_v40 = vadd.f32 %v4231_v5, %v554_v45  ;;  %v4441_v4 = vpop.permute.xlu1 %371 }
  0xb2   : > { %v988_v47 = vadd.f32 %v4235_v7, %v556_v34  ;;  %v1145_v48 = vadd.f32 %v4407_v28, %v969_v3  ;;  %v1147_v23 = vadd.f32 %v4407_v28, %v971_v17  ;;  %v1274_v62 = vmul.f32 0.2, %v1146_v27  ;;  %5818 = vst [vmem:[#allocation67_spill] sm:$0xff] %v4441_v4 }
  0xb3   : > { %v1276_v26 = vmul.f32 0.2, %v1148_v44  ;;  %v570_v55 = vmul.f32 %v4077_v56, %v4431_v32  ;;  %v572_v21 = vmul.f32 %v4083_v58, %v4431_v32  ;;  %v569_v5 = vmul.f32 %v4089_v60, %v4431_v32  ;;  %v4449_v2 = vpop.permute.xlu0 %1112 }
  0xb4   : > { %v1273_v20 = vmul.f32 0.2, %v1145_v48  ;;  %v1275_v16 = vmul.f32 0.2, %v1147_v23  ;;  %v571_v3 = vmul.f32 %v4096_v63, %v4431_v32  ;;  %v1402_v7 = vmax.f32 %v1146_v27, %v1274_v62 }
  0xb5   : > { %v1404_v17 = vmax.f32 %v1148_v44, %v1276_v26  ;;  %v985_v45 = vadd.f32 %v4247_v10, %v553_v31  ;;  %v987_v34 = vadd.f32 %v4251_v11, %v555_v6  ;;  %v1002_v1 = vadd.f32 %v4187_v49, %v570_v55  ;;  %v4457_v44 = vpop.permute.xlu1 %376 }
  0xb6   : > { %v1401_v24 = vmax.f32 %v1145_v48, %v1273_v20  ;;  %v1403_v37 = vmax.f32 %v1147_v23, %v1275_v16  ;;  %v1004_v33 = vadd.f32 %v4191_v50, %v572_v21  ;;  %v1162_v36 = vadd.f32 %v4449_v2, %v986_v40 }
  0xb7   : > { %v1164_v30 = vadd.f32 %v4449_v2, %v988_v47  ;;  %v1161_v32 = vadd.f32 %v4449_v2, %v985_v45  ;;  %v1163_v27 = vadd.f32 %v4449_v2, %v987_v34  ;;  %v1001_v31 = vadd.f32 %v4195_v51, %v569_v5  ;;  %v4467_v11 = vpop.permute.xlu0 %1122 }
  0xb8   : > { %v1003_v10 = vadd.f32 %v4199_v52, %v571_v3  ;;  %v602_v16 = vmul.f32 %v4077_v56, %v4441_v4  ;;  %v604_v20 = vmul.f32 %v4083_v58, %v4441_v4  ;;  %v1290_v21 = vmul.f32 0.2, %v1162_v36 }
  0xb9   : > { %v1292_v49 = vmul.f32 0.2, %v1164_v30  ;;  %v1289_v50 = vmul.f32 0.2, %v1161_v32  ;;  %v601_v55 = vmul.f32 %v4089_v60, %v4441_v4  ;;  %v1291_v6 = vmul.f32 0.2, %v1163_v27  ;;  %v4480_v34 = vpop.permute.xlu1 %686 }
  0xba   : > { %v618_v51 = vmul.f32 %v4077_v56, %v4457_v44  ;;  %v4472_v52 = vadd.f32 %v4255_v12, %v602_v16  ;;  %v603_v40 = vmul.f32 %v4096_v63, %v4441_v4  ;;  %v1418_v47 = vmax.f32 %v1162_v36, %v1290_v21 }
  0xbb   : > { %v1420_v48 = vmax.f32 %v1164_v30, %v1292_v49  ;;  %v1417_v23 = vmax.f32 %v1161_v32, %v1289_v50  ;;  %v1194_v62 = vadd.f32 %v4467_v11, %v1018_v46  ;;  %v1419_v26 = vmax.f32 %v1163_v27, %v1291_v6 }
  0xbc   : > { %5819 = vst [vmem:[#allocation68_spill] sm:$0xff] %v4472_v52  ;;  %v1196_v5 = vadd.f32 %v4467_v11, %v1020_v41  ;;  %v1193_v3 = vadd.f32 %v4467_v11, %v1017_v35  ;;  %v1195_v45 = vadd.f32 %v4467_v11, %v1019_v8  ;;  %v1538_v22 = vpack.c.bf16 %v1418_v47, %v1402_v7 }
  0xbd   : > { %v1540_v12 = vpack.c.bf16 %v1420_v48, %v1404_v17  ;;  %v1537_v16 = vpack.c.bf16 %v1417_v23, %v1401_v24  ;;  %v1322_v52 = vmul.f32 0.2, %v1194_v62  ;;  %v1539_v9 = vpack.c.bf16 %v1419_v26, %v1403_v37 }
  0xbe   : > { %v1324_v4 = vmul.f32 0.2, %v1196_v5  ;;  %v1321_v36 = vmul.f32 0.2, %v1193_v3  ;;  %v1323_v30 = vmul.f32 0.2, %v1195_v45  ;;  %1682 = vmatprep.subr.bf16.mxu0 %v1538_v22  ;;  %v922_v46 = vmul.f32 %v4080_v57, %v4480_v34  ;;  %v4493_v27 = vpop.permute.xlu1 %1117 }
  0xbf   : > { %1755 = vmatprep.subr.bf16.mxu1 %v1540_v12  ;;  %v620_v41 = vmul.f32 %v4083_v58, %v4457_v44  ;;  %v924_v35 = vmul.f32 %v4086_v59, %v4480_v34  ;;  %1683 = vmatpush1.bf16.msra.mxu0 %v1537_v16  ;;  %v1450_v8 = vmax.f32 %v1194_v62, %v1322_v52 }
  0xc0   : > { %1756 = vmatpush1.bf16.msra.mxu1 %v1539_v9  ;;  %v1452_v24 = vmax.f32 %v1196_v5, %v1324_v4  ;;  %v4489_v37 = vadd.f32 %v4259_v13, %v604_v20  ;;  %v1449_v32 = vmax.f32 %v1193_v3, %v1321_v36  ;;  %v1050_v7 = vadd.f32 %v922_v46, %v618_v51  ;;  %v4501_v13 = vpop.permute.xlu0 %1132 }
  0xc1   : > { %v1052_v22 = vadd.f32 %v924_v35, %v620_v41  ;;  %v921_v17 = vmul.f32 %v4092_v61, %v4480_v34  ;;  %v1451_v21 = vmax.f32 %v1195_v45, %v1323_v30  ;;  %v617_v49 = vmul.f32 %v4089_v60, %v4457_v44 }
  0xc2   : > { %v619_v9 = vmul.f32 %v4096_v63, %v4457_v44  ;;  %v923_v4 = vmul.f32 %v4099_v0, %v4480_v34  ;;  %v1178_v20 = vadd.f32 %v4493_v27, %v1002_v1  ;;  %v1180_v50 = vadd.f32 %v4493_v27, %v1004_v33  ;;  %v4516_v1 = vpop.permute.xlu1 %381 }
  0xc3   : > { %v1177_v6 = vadd.f32 %v4493_v27, %v1001_v31  ;;  %v1179_v51 = vadd.f32 %v4493_v27, %v1003_v10  ;;  %v4508_v52 = vadd.f32 %v4501_v13, %v1050_v7  ;;  %v4511_v47 = vadd.f32 %v4501_v13, %v1052_v22 }
  0xc4   : > { %v1049_v48 = vadd.f32 %v921_v17, %v617_v49  ;;  %v1051_v23 = vadd.f32 %v923_v4, %v619_v9  ;;  %v1306_v62 = vmul.f32 0.2, %v1178_v20  ;;  %v1308_v26 = vmul.f32 0.2, %v1180_v50 }
  0xc5   : > { %v1305_v5 = vmul.f32 0.2, %v1177_v6  ;;  %v4514_v3 = vadd.f32 %v4263_v14, %v601_v55  ;;  %v1307_v33 = vmul.f32 0.2, %v1179_v51  ;;  %v4519_v31 = vmul.f32 0.2, %v4508_v52 }
  0xc6   : > { %v4522_v10 = vmul.f32 0.2, %v4511_v47  ;;  %v4525_v45 = vadd.f32 %v4501_v13, %v1049_v48  ;;  %v1434_v12 = vmax.f32 %v1178_v20, %v1306_v62  ;;  %v1436_v16 = vmax.f32 %v1180_v50, %v1308_v26  ;;  %v4539_v49 = vpop.permute.xlu1 %386  ;;  %v5820_v62 = vld [vmem:[#allocation57_spill] sm:$0xff] }
  0xc7   : > { %v1433_v36 = vmax.f32 %v1177_v6, %v1305_v5  ;;  %v4528_v30 = vadd.f32 %v4501_v13, %v1051_v23  ;;  %v1435_v14 = vmax.f32 %v1179_v51, %v1307_v33  ;;  %v1035_v46 = vadd.f32 %v4267_v15, %v603_v40  ;;  %v5822_v26 = vld [vmem:[#allocation65_spill] sm:$0xff] }
  0xc8   : > { %v4531_v55 = vmul.f32 0.2, %v4525_v45  ;;  %v974_v41 = vadd.f32 %v4203_v53, %v4415_v38  ;;  %v1554_v35 = vpack.c.bf16 %v1450_v8, %v1434_v12  ;;  %v1556_v7 = vpack.c.bf16 %v1452_v24, %v1436_v16  ;;  %v5826_v38 = vld [vmem:[#allocation42_spill] sm:$0xff]  ;;  %v5827_v53 = vld [vmem:[#allocation68_spill] sm:$0xff] }
  0xc9   : > { %v1553_v22 = vpack.c.bf16 %v1449_v32, %v1433_v36  ;;  %v4537_v17 = vmul.f32 0.2, %v4528_v30  ;;  %v1555_v9 = vpack.c.bf16 %v1451_v21, %v1435_v14  ;;  %v1482_v4 = vmax.f32 %v4508_v52, %v4519_v31 }
  0xca   : > { %v634_v20 = vmul.f32 %v4077_v56, %v4516_v1  ;;  %v636_v15 = vmul.f32 %v4083_v58, %v4516_v1  ;;  %1684 = vmatprep.subr.bf16.mxu0 %v1554_v35  ;;  %1757 = vmatprep.subr.bf16.mxu1 %v1556_v7  ;;  %v650_v8 = vmul.f32 %v4077_v56, %v4539_v49 }
  0xcb   : > { %1685 = vmatpush1.bf16.msra.mxu0 %v1553_v22  ;;  %1758 = vmatpush1.bf16.msra.mxu1 %v1555_v9  ;;  %v652_v32 = vmul.f32 %v4083_v58, %v4539_v49  ;;  %v633_v50 = vmul.f32 %v4089_v60, %v4516_v1  ;;  %v649_v6 = vmul.f32 %v4089_v60, %v4539_v49  ;;  %v4572_v58 = vpop.permute.xlu1 %694 }
  0xcc   : > { %v1066_v24 = vadd.f32 %v4299_v43, %v634_v20  ;;  %v1068_v21 = vadd.f32 %v4303_v39, %v636_v15  ;;  %v990_v51 = vadd.f32 %v4271_v18, %v4419_v42  ;;  %v635_v48 = vmul.f32 %v4096_v63, %v4516_v1  ;;  %v5821_v18 = vld [vmem:[#allocation19_spill] sm:$0xff] }
  0xcd   : > { %v651_v43 = vmul.f32 %v4096_v63, %v4539_v49  ;;  %v1150_v56 = vadd.f32 %v4407_v28, %v974_v41  ;;  %v976_v39 = vadd.f32 %v4207_v54, %v4425_v25  ;;  %v992_v60 = vadd.f32 %v4275_v19, %v4429_v29  ;;  %v5823_v41 = vld [vmem:[#allocation49_spill] sm:$0xff] }
  0xce   : > { %v1166_v23 = vadd.f32 %v4449_v2, %v990_v51  ;;  %v541_v42 = vmul.f32 %v5821_v18, %v5820_v62  ;;  %v557_v5 = vmul.f32 %v5821_v18, %v5822_v26  ;;  %v954_v63 = vmul.f32 %v4080_v57, %v4572_v58  ;;  %v5824_v57 = vld [vmem:[#allocation50_spill] sm:$0xff]  ;;  %v5825_v51 = vld [vmem:[#allocation35_spill] sm:$0xff] }
  0xcf   : > { %v956_v33 = vmul.f32 %v4086_v59, %v4572_v58  ;;  %v953_v54 = vmul.f32 %v4092_v61, %v4572_v58  ;;  %v955_v25 = vmul.f32 %v4099_v0, %v4572_v58  ;;  %v1278_v12 = vmul.f32 0.2, %v1150_v56 }
  0xd0   : > { %v1294_v19 = vmul.f32 0.2, %v1166_v23  ;;  %v1152_v29 = vadd.f32 %v4407_v28, %v976_v39  ;;  %v1168_v16 = vadd.f32 %v4449_v2, %v992_v60  ;;  %v1082_v36 = vadd.f32 %v954_v63, %v650_v8  ;;  %v4593_v61 = vpop.permute.xlu1 %1127 }
  0xd1   : > { %v1084_v14 = vadd.f32 %v956_v33, %v652_v32  ;;  %v1065_v35 = vadd.f32 %v5823_v41, %v633_v50  ;;  %v1067_v7 = vadd.f32 %v5824_v57, %v635_v48  ;;  %v1081_v22 = vadd.f32 %v953_v54, %v649_v6 }
  0xd2   : > { %v1422_v59 = vmax.f32 %v1166_v23, %v1294_v19  ;;  %v1280_v9 = vmul.f32 0.2, %v1152_v29  ;;  %v1296_v20 = vmul.f32 0.2, %v1168_v16  ;;  %v1083_v15 = vadd.f32 %v955_v25, %v651_v43  ;;  %v5828_v43 = vld [vmem:[#allocation21_spill] sm:$0xff] }
  0xd3   : > { %v1406_v0 = vmax.f32 %v1150_v56, %v1278_v12  ;;  %v973_v40 = vadd.f32 %v5825_v51, %v541_v42  ;;  %v989_v39 = vadd.f32 %v5826_v38, %v557_v5  ;;  %v1210_v8 = vadd.f32 %v4593_v61, %v5827_v53 }
  0xd4   : > { %v1212_v32 = vadd.f32 %v4593_v61, %v4489_v37  ;;  %v1209_v50 = vadd.f32 %v4593_v61, %v4514_v3  ;;  %v1211_v6 = vadd.f32 %v4593_v61, %v1035_v46  ;;  %v1408_v48 = vmax.f32 %v1152_v29, %v1280_v9  ;;  %v4610_v63 = vpop.permute.xlu1 %1137 }
  0xd5   : > { %v1424_v23 = vmax.f32 %v1168_v16, %v1296_v20  ;;  %v543_v56 = vmul.f32 %v5828_v43, %v5820_v62  ;;  %v559_v60 = vmul.f32 %v5828_v43, %v5822_v26  ;;  %v1338_v38 = vmul.f32 0.2, %v1210_v8 }
  0xd6   : > { %v1340_v42 = vmul.f32 0.2, %v1212_v32  ;;  %v1337_v5 = vmul.f32 0.2, %v1209_v50  ;;  %v4608_v53 = vpack.c.bf16 %v1422_v59, %v1406_v0  ;;  %v1339_v37 = vmul.f32 0.2, %v1211_v6 }
  0xd7   : > { %v4612_v33 = vpack.c.bf16 %v1424_v23, %v1408_v48  ;;  %v1149_v3 = vadd.f32 %v4407_v28, %v973_v40  ;;  %v1165_v46 = vadd.f32 %v4449_v2, %v989_v39  ;;  %v1466_v54 = vmax.f32 %v1210_v8, %v1338_v38 }
  0xd8   : > { %v1468_v25 = vmax.f32 %v1212_v32, %v1340_v42  ;;  %v1465_v12 = vmax.f32 %v1209_v50, %v1337_v5  ;;  %v1242_v19 = vadd.f32 %v4610_v63, %v1066_v24  ;;  %v1467_v29 = vmax.f32 %v1211_v6, %v1339_v37  ;;  %v4629_v51 = vpop.permute.xlu1 %1142  ;;  %v5833_v42 = vld [vmem:[#allocation43_spill] sm:$0xff] }
  0xd9   : > { %v1244_v16 = vadd.f32 %v4610_v63, %v1068_v21  ;;  %v1241_v41 = vadd.f32 %v4610_v63, %v1065_v35  ;;  %v1243_v57 = vadd.f32 %v4610_v63, %v1067_v7  ;;  %v1570_v59 = vpack.c.bf16 %v1482_v4, %v1466_v54 }
  0xda   : > { %v5829_v40 = vmax.f32 %v4511_v47, %v4522_v10  ;;  %v5830_v20 = vmax.f32 %v4525_v45, %v4531_v55  ;;  %v1370_v24 = vmul.f32 0.2, %v1242_v19  ;;  %v5831_v21 = vmax.f32 %v4528_v30, %v4537_v17  ;;  %v5832_v10 = vld [vmem:[#allocation36_spill] sm:$0xff] }
  0xdb   : > { %v1372_v7 = vmul.f32 0.2, %v1244_v16  ;;  %v1369_v39 = vmul.f32 0.2, %v1241_v41  ;;  %v1277_v8 = vmul.f32 0.2, %v1149_v3  ;;  %1686 = vmatprep.subr.bf16.mxu0 %v1570_v59  ;;  %v1258_v52 = vadd.f32 %v4629_v51, %v1082_v36 }
  0xdc   : > { %v1572_v9 = vpack.c.bf16 %v5829_v40, %v1468_v25  ;;  %v1569_v0 = vpack.c.bf16 %v5830_v20, %v1465_v12  ;;  %v1571_v35 = vpack.c.bf16 %v5831_v21, %v1467_v29  ;;  %v1260_v47 = vadd.f32 %v4629_v51, %v1084_v14  ;;  %v5835_v29 = vld [vmem:[#allocation15_spill] sm:$0xff]  ;;  %v5837_v20 = vld [vmem:[#allocation16_spill] sm:$0xff]  ;;  %v5838_v21 = vld [vmem:[#allocation37_spill] sm:$0xff] }
  0xdd   : > { %v1293_v31 = vmul.f32 0.2, %v1165_v46  ;;  %v975_v45 = vadd.f32 %v5832_v10, %v543_v56  ;;  %v1498_v55 = vmax.f32 %v1242_v19, %v1370_v24  ;;  %v1500_v4 = vmax.f32 %v1244_v16, %v1372_v7  ;;  %v5834_v19 = vld [vmem:[#allocation66_spill] sm:$0xff]  ;;  %v5839_v7 = vld [vmem:[#allocation17_spill] sm:$0xff] }
  0xde   : > { %1759 = vmatprep.subr.bf16.mxu1 %v1572_v9  ;;  %1687 = vmatpush1.bf16.msra.mxu0 %v1569_v0  ;;  %v1257_v32 = vadd.f32 %v4629_v51, %v1081_v22  ;;  %v1371_v30 = vmul.f32 0.2, %v1243_v57  ;;  %v1386_v17 = vmul.f32 0.2, %v1258_v52  ;;  %v1388_v50 = vmul.f32 0.2, %v1260_v47 }
  0xdf   : > { %1760 = vmatpush1.bf16.msra.mxu1 %v1571_v35  ;;  %v1497_v6 = vmax.f32 %v1241_v41, %v1369_v39  ;;  %v1259_v48 = vadd.f32 %v4629_v51, %v1083_v15  ;;  %v1405_v38 = vmax.f32 %v1149_v3, %v1277_v8  ;;  %v1421_v36 = vmax.f32 %v1165_v46, %v1293_v31  ;;  %v5841_v10 = vld [vmem:[#allocation18_spill] sm:$0xff] }
  0xe0   : > { %v1385_v23 = vmul.f32 0.2, %v1257_v32  ;;  %v991_v14 = vadd.f32 %v5833_v42, %v559_v60  ;;  %v1514_v5 = vmax.f32 %v1258_v52, %v1386_v17  ;;  %v1516_v37 = vmax.f32 %v1260_v47, %v1388_v50  ;;  %v5836_v60 = vld [vmem:[#allocation62_spill] sm:$0xff]  ;;  %v5840_v47 = vld [vmem:[#allocation51_spill] sm:$0xff] }
  0xe1   : > { %v1387_v56 = vmul.f32 0.2, %v1259_v48  ;;  %v1151_v54 = vadd.f32 %v4407_v28, %v975_v45  ;;  %v1499_v12 = vmax.f32 %v1243_v57, %v1371_v30  ;;  %v574_v16 = vmul.f32 %v5835_v29, %v5834_v19  ;;  %v4649_v57 = vld [vmem:[%s5687_s3] sm:$0xff]   ;;  %v5845_v42 = vld [vmem:[#allocation39_spill] sm:$0xff] }
  0xe2   : > { %v1513_v25 = vmax.f32 %v1257_v32, %v1385_v23  ;;  %v1167_v22 = vadd.f32 %v4449_v2, %v991_v14  ;;  %v1586_v41 = vpack.c.bf16 %v1514_v5, %v1498_v55  ;;  %v1588_v59 = vpack.c.bf16 %v1516_v37, %v1500_v4  ;;  %v5842_v4 = vld [vmem:[#allocation38_spill] sm:$0xff]  ;;  %v5844_v23 = vld [vmem:[#allocation20_spill] sm:$0xff] }
  0xe3   : > { %v1515_v15 = vmax.f32 %v1259_v48, %v1387_v56  ;;  %v1541_v40 = vpack.c.bf16 %v1421_v36, %v1405_v38  ;;  %v1279_v46 = vmul.f32 0.2, %v1151_v54  ;;  %v894_v0 = vmul.f32 %v5837_v20, %v5836_v60  ;;  %v5846_v56 = vld [vmem:[#allocation53_spill] sm:$0xff] }
  0xe4   : > { %v1585_v3 = vpack.c.bf16 %v1513_v25, %v1497_v6  ;;  %v1295_v9 = vmul.f32 0.2, %v1167_v22  ;;  %1688 = vmatprep.subr.bf16.mxu0 %v1586_v41  ;;  %1761 = vmatprep.subr.bf16.mxu1 %v1588_v59  ;;  %v1006_v35 = vadd.f32 %v5838_v21, %v574_v16  ;;  %v576_v39 = vmul.f32 %v5839_v7, %v5834_v19  ;;  %v5843_v6 = vld [vmem:[#allocation52_spill] sm:$0xff]  ;;  %v5847_v25 = vld [vmem:[#allocation22_spill] sm:$0xff] }
  0xe5   : > { %v1587_v24 = vpack.c.bf16 %v1515_v15, %v1499_v12  ;;  %v1407_v8 = vmax.f32 %v1151_v54, %v1279_v46  ;;  %v1022_v31 = vadd.f32 %v894_v0, %v5840_v47  ;;  %v896_v45 = vmul.f32 %v5841_v10, %v5836_v60  ;;  %v5848_v59 = vld [vmem:[#allocation40_spill] sm:$0xff]  ;;  %v5850_v0 = vld [vmem:[#allocation54_spill] sm:$0xff] }
  0xe6   : > { %1689 = vmatpush1.bf16.msra.mxu0 %v1585_v3  ;;  %v1423_v52 = vmax.f32 %v1167_v22, %v1295_v9  ;;  %v1182_v55 = vadd.f32 %v4493_v27, %v1006_v35  ;;  %v1008_v32 = vadd.f32 %v5842_v4, %v576_v39  ;;  %v573_v30 = vmul.f32 %v5821_v18, %v5834_v19  ;;  %v4691_v47 = vld [vmem:[%s5687_s3 + $0x8] sm:$0xff]  }
  0xe7   : > { %1762 = vmatpush1.bf16.msra.mxu1 %v1587_v24  ;;  %1828 = vmatprep.subr.bf16.mxu0 %v4608_v53  ;;  %v1198_v50 = vadd.f32 %v4467_v11, %v1022_v31  ;;  %v1024_v48 = vadd.f32 %v896_v45, %v5843_v6  ;;  %v893_v38 = vmul.f32 %v5844_v23, %v5836_v60  ;;  %v5849_v3 = vmov 0  }
  0xe8   : > { %1901 = vmatprep.subr.bf16.mxu1 %v4612_v33  ;;  %v1543_v17 = vpack.c.bf16 %v1423_v52, %v1407_v8  ;;  %v1310_v53 = vmul.f32 0.2, %v1182_v55  ;;  %v1184_v36 = vadd.f32 %v4493_v27, %v1008_v32  ;;  %v1005_v14 = vadd.f32 %v5845_v42, %v573_v30  ;;  %v5851_v8 = vld [vmem:[#allocation67_spill] sm:$0xff] }
  0xe9   : > { %3643 = vmatmul.mubr.msk.bf16.vlgmr.msra.gmra.mrb[0].mxu0 %vm1669_vm0, %v4649_v57  ;;  %v575_v5 = vmul.f32 %v5828_v43, %v5834_v19  ;;  %v1326_v33 = vmul.f32 0.2, %v1198_v50  ;;  %v1200_v37 = vadd.f32 %v4467_v11, %v1024_v48  ;;  %v1021_v54 = vadd.f32 %v893_v38, %v5846_v56 }
  0xea   : > { %3647 = vmatmul.mubr.msk.bf16.vlgmr.msra.gmra.mrb[0].mxu1 %vm1669_vm0, %v4649_v57  ;;  %1829 = vmatpush1.bf16.msra.mxu0 %v1541_v40  ;;  %v895_v12 = vmul.f32 %v5847_v25, %v5836_v60  ;;  %v1438_v22 = vmax.f32 %v1182_v55, %v1310_v53  ;;  %v1312_v16 = vmul.f32 0.2, %v1184_v36  ;;  %v1181_v41 = vadd.f32 %v4493_v27, %v1005_v14  ;;  %v5852_v53 = vld [vmem:[#allocation44_spill] sm:$0xff] }
  0xeb   : > { %1902 = vmatpush1.bf16.msra.mxu1 %v1543_v17  ;;  %v1007_v15 = vadd.f32 %v5848_v59, %v575_v5  ;;  %1724 = vmatprep.mubr.bf16.mxu0 %v5849_v3  ;;  %v1454_v46 = vmax.f32 %v1198_v50, %v1326_v33  ;;  %v1328_v9 = vmul.f32 0.2, %v1200_v37  ;;  %v1197_v40 = vadd.f32 %v4467_v11, %v1021_v54 }
  0xec   : > { %v1023_v24 = vadd.f32 %v895_v12, %v5850_v0  ;;  %1797 = vmatprep.mubr.bf16.mxu1 %v5849_v3  ;;  %v1440_v21 = vmax.f32 %v1184_v36, %v1312_v16  ;;  %v1309_v35 = vmul.f32 0.2, %v1181_v41  ;;  %v606_v52 = vmul.f32 %v5835_v29, %v5851_v8  ;;  %v5853_v16 = vld [vmem:[#allocation45_spill] sm:$0xff] }
  0xed   : > { %v1183_v39 = vadd.f32 %v4493_v27, %v1007_v15  ;;  %v1558_v31 = vpack.c.bf16 %v1454_v46, %v1438_v22  ;;  %v1456_v45 = vmax.f32 %v1200_v37, %v1328_v9  ;;  %v1325_v55 = vmul.f32 0.2, %v1197_v40 }
  0xee   : > { %v1199_v4 = vadd.f32 %v4467_v11, %v1023_v24  ;;  %v1437_v32 = vmax.f32 %v1181_v41, %v1309_v35  ;;  %v622_v17 = vmul.f32 %v5835_v29, %v4457_v44  ;;  %v926_v50 = vmul.f32 %v5837_v20, %v4480_v34  ;;  %v5854_v35 = vld [vmem:[#allocation47_spill] sm:$0xff] }
  0xef   : > { %v1311_v30 = vmul.f32 0.2, %v1183_v39  ;;  %1830 = vmatprep.subr.bf16.mxu0 %v1558_v31  ;;  %v1560_v6 = vpack.c.bf16 %v1456_v45, %v1440_v21  ;;  %v1453_v48 = vmax.f32 %v1197_v40, %v1325_v55  ;;  %v1038_v36 = vadd.f32 %v5852_v53, %v606_v52  ;;  %v4727_v31 = vld [vmem:[%s5687_s3 + $0x10] sm:$0xff]  }
  0xf0   : > { %v1327_v38 = vmul.f32 0.2, %v1199_v4  ;;  %v1054_v14 = vadd.f32 %v926_v50, %v622_v17  ;;  %v608_v5 = vmul.f32 %v5839_v7, %v5851_v8  ;;  %v624_v33 = vmul.f32 %v5839_v7, %v4457_v44  ;;  %v5855_v53 = vld [vmem:[#allocation48_spill] sm:$0xff] }
  0xf1   : > { %v1439_v42 = vmax.f32 %v1183_v39, %v1311_v30  ;;  %3644 = vmatmul.mubr.msk.bf16.gmra.mrb[4].mxu0 %vm1669_vm0, %v4691_v47  ;;  %1903 = vmatprep.subr.bf16.mxu1 %v1560_v6  ;;  %v1557_v37 = vpack.c.bf16 %v1453_v48, %v1437_v32  ;;  %v1214_v54 = vadd.f32 %v4593_v61, %v1038_v36 }
  0xf2   : > { %v1455_v56 = vmax.f32 %v1199_v4, %v1327_v38  ;;  %v928_v12 = vmul.f32 %v5841_v10, %v4480_v34  ;;  %v1230_v22 = vadd.f32 %v4501_v13, %v1054_v14  ;;  %v1040_v41 = vadd.f32 %v5853_v16, %v608_v5  ;;  %3648 = vmatmul.mubr.msk.bf16.gmra.mrb[4].mxu1 %vm1669_vm0, %v4691_v47 }
  0xf3   : > { %v605_v59 = vmul.f32 %v5821_v18, %v5851_v8  ;;  %v621_v15 = vmul.f32 %v5821_v18, %v4457_v44  ;;  %1831 = vmatpush1.bf16.msra.mxu0 %v1557_v37  ;;  %v1342_v9 = vmul.f32 0.2, %v1214_v54  ;;  %v925_v0 = vmul.f32 %v5844_v23, %v4480_v34  ;;  %1734 = vmatprep.mubr.bf16.mxu0 %v5849_v3 }
  0xf4   : > { %v1559_v46 = vpack.c.bf16 %v1455_v56, %v1439_v42  ;;  %v1056_v40 = vadd.f32 %v928_v12, %v624_v33  ;;  %v1358_v24 = vmul.f32 0.2, %v1230_v22  ;;  %v1216_v21 = vadd.f32 %v4593_v61, %v1040_v41  ;;  %1807 = vmatprep.mubr.bf16.mxu1 %v5849_v3 }
  0xf5   : > { %v1037_v39 = vadd.f32 %v5854_v35, %v605_v59  ;;  %v607_v52 = vmul.f32 %v5828_v43, %v5851_v8  ;;  %v1470_v45 = vmax.f32 %v1214_v54, %v1342_v9  ;;  %v1053_v4 = vadd.f32 %v925_v0, %v621_v15  ;;  %v5856_v15 = vld [vmem:[#allocation55_spill] sm:$0xff] }
  0xf6   : > { %1904 = vmatpush1.bf16.msra.mxu1 %v1559_v46  ;;  %v1232_v55 = vadd.f32 %v4501_v13, %v1056_v40  ;;  %v623_v32 = vmul.f32 %v5828_v43, %v4457_v44  ;;  %v1486_v30 = vmax.f32 %v1230_v22, %v1358_v24  ;;  %v1344_v17 = vmul.f32 0.2, %v1216_v21 }
  0xf7   : > { %v1213_v50 = vadd.f32 %v4593_v61, %v1037_v39  ;;  %v927_v6 = vmul.f32 %v5847_v25, %v4480_v34  ;;  %v1229_v38 = vadd.f32 %v4501_v13, %v1053_v4  ;;  %v1039_v36 = vadd.f32 %v5855_v53, %v607_v52  ;;  %v5857_v4 = vld [vmem:[#allocation56_spill] sm:$0xff] }
  0xf8   : > { %v1360_v48 = vmul.f32 0.2, %v1232_v55  ;;  %v638_v42 = vmul.f32 %v5835_v29, %v4516_v1  ;;  %v1574_v14 = vpack.c.bf16 %v1486_v30, %v1470_v45  ;;  %v1472_v5 = vmax.f32 %v1216_v21, %v1344_v17 }
  0xf9   : > { %v1341_v33 = vmul.f32 0.2, %v1213_v50  ;;  %v1055_v37 = vadd.f32 %v927_v6, %v623_v32  ;;  %3645 = vmatmul.mubr.msk.bf16.gmra.mrb[8].mxu0 %vm1669_vm0, %v4727_v31  ;;  %v1357_v54 = vmul.f32 0.2, %v1229_v38  ;;  %v1215_v12 = vadd.f32 %v4593_v61, %v1039_v36 }
  0xfa   : > { %v1488_v56 = vmax.f32 %v1232_v55, %v1360_v48  ;;  %v654_v22 = vmul.f32 %v5835_v29, %v4539_v49  ;;  %1744 = vmatprep.mubr.bf16.mxu0 %v5849_v3  ;;  %1832 = vmatprep.subr.bf16.mxu0 %v1574_v14  ;;  %v958_v59 = vmul.f32 %v5837_v20, %v4572_v58  ;;  %v4760_v20 = vld [vmem:[%s5687_s3 + $0x18] sm:$0xff]   ;;  %v5858_v14 = vld [vmem:[#allocation58_spill] sm:$0xff] }
  0xfb   : > { %v1469_v16 = vmax.f32 %v1213_v50, %v1341_v33  ;;  %v1231_v41 = vadd.f32 %v4501_v13, %v1055_v37  ;;  %v1070_v46 = vadd.f32 %v5856_v15, %v638_v42  ;;  %v1485_v40 = vmax.f32 %v1229_v38, %v1357_v54  ;;  %3649 = vmatmul.mubr.msk.bf16.gmra.mrb[8].mxu1 %vm1669_vm0, %v4727_v31  ;;  %v5859_v15 = vld [vmem:[#allocation59_spill] sm:$0xff] }
  0xfc   : > { %v1576_v9 = vpack.c.bf16 %v1488_v56, %v1472_v5  ;;  %v1343_v0 = vmul.f32 0.2, %v1215_v12  ;;  %v640_v24 = vmul.f32 %v5839_v7, %v4516_v1  ;;  %v1086_v21 = vadd.f32 %v958_v59, %v654_v22  ;;  %1817 = vmatprep.mubr.bf16.mxu1 %v5849_v3 }
  0xfd   : > { %v1359_v29 = vmul.f32 0.2, %v1231_v41  ;;  %v1246_v35 = vadd.f32 %v4610_v63, %v1070_v46  ;;  %v656_v39 = vmul.f32 %v5839_v7, %v4539_v49  ;;  %v1573_v52 = vpack.c.bf16 %v1485_v40, %v1469_v16 }
  0xfe   : > { %1905 = vmatprep.subr.bf16.mxu1 %v1576_v9  ;;  %v1471_v45 = vmax.f32 %v1215_v12, %v1343_v0  ;;  %v960_v55 = vmul.f32 %v5841_v10, %v4572_v58  ;;  %v1072_v32 = vadd.f32 %v5857_v4, %v640_v24  ;;  %v1262_v17 = vadd.f32 %v4629_v51, %v1086_v21  ;;  %v5860_v24 = vld [vmem:[#allocation23_spill] sm:$0xff] }
  0xff   : > { %v1487_v30 = vmax.f32 %v1231_v41, %v1359_v29  ;;  %v1374_v50 = vmul.f32 0.2, %v1246_v35  ;;  %v637_v7 = vmul.f32 %v5821_v18, %v4516_v1  ;;  %1833 = vmatpush1.bf16.msra.mxu0 %v1573_v52  ;;  %v653_v38 = vmul.f32 %v5821_v18, %v4539_v49  ;;  %v5862_v4 = vld [vmem:[#allocation27_spill] sm:$0xff] }
 0x100   : > { %v1088_v6 = vadd.f32 %v960_v55, %v656_v39  ;;  %v1248_v48 = vadd.f32 %v4610_v63, %v1072_v32  ;;  %v957_v53 = vmul.f32 %v5844_v23, %v4572_v58  ;;  %v1390_v36 = vmul.f32 0.2, %v1262_v17 }
 0x101   : > { %v1575_v10 = vpack.c.bf16 %v1487_v30, %v1471_v45  ;;  %v1502_v42 = vmax.f32 %v1246_v35, %v1374_v50  ;;  %v1069_v5 = vadd.f32 %v5858_v14, %v637_v7  ;;  %3646 = vmatmul.mubr.msk.bf16.gmra.mrb[12].mxu0 %vm1669_vm0, %v4760_v20  ;;  %v639_v54 = vmul.f32 %v5828_v43, %v4516_v1  ;;  %v5861_v45 = vld [vmem:[#allocation60_spill] sm:$0xff]  ;;  %v5863_v7 = vld [vmem:[#allocation61_spill] sm:$0xff] }
 0x102   : > { %v1264_v33 = vadd.f32 %v4629_v51, %v1088_v6  ;;  %v1376_v37 = vmul.f32 0.2, %v1248_v48  ;;  %v1085_v56 = vadd.f32 %v957_v53, %v653_v38  ;;  %1860 = vmatprep.mubr.bf16.mxu0 %v5849_v3  ;;  %v1518_v18 = vmax.f32 %v1262_v17, %v1390_v36 }
 0x103   : > { %1906 = vmatpush1.bf16.msra.mxu1 %v1575_v10  ;;  %v1245_v23 = vadd.f32 %v4610_v63, %v1069_v5  ;;  %v655_v12 = vmul.f32 %v5828_v43, %v4539_v49  ;;  %v959_v22 = vmul.f32 %v5847_v25, %v4572_v58  ;;  %v1071_v46 = vadd.f32 %v5859_v15, %v639_v54  ;;  %v5864_v10 = vld [vmem:[#allocation63_spill] sm:$0xff] }
 0x104   : > { %v1392_v16 = vmul.f32 0.2, %v1264_v33  ;;  %v1504_v41 = vmax.f32 %v1248_v48, %v1376_v37  ;;  %v1261_v59 = vadd.f32 %v4629_v51, %v1085_v56  ;;  %3650 = vmatmul.mubr.msk.bf16.gmra.mrb[12].mxu1 %vm1669_vm0, %v4760_v20  ;;  %v1590_v9 = vpack.c.bf16 %v1518_v18, %v1502_v42  ;;  %v5866_v18 = vld [vmem:[#allocation64_spill] sm:$0xff] }
 0x105   : > { %v1373_v40 = vmul.f32 0.2, %v1245_v23  ;;  %v1087_v0 = vadd.f32 %v959_v22, %v655_v12  ;;  %v546_v29 = vmul.f32 %v5860_v24, %v5820_v62  ;;  %1933 = vmatprep.mubr.bf16.mxu1 %v5849_v3  ;;  %v1247_v25 = vadd.f32 %v4610_v63, %v1071_v46  ;;  %v5869_v46 = vld [vmem:[#allocation33_spill] sm:$0xff] }
 0x106   : > { %v1520_v43 = vmax.f32 %v1264_v33, %v1392_v16  ;;  %v1389_v21 = vmul.f32 0.2, %v1261_v59  ;;  %v562_v35 = vmul.f32 %v5860_v24, %v5822_v26  ;;  %1834 = vmatprep.subr.bf16.mxu0 %v1590_v9  ;;  %v548_v32 = vmul.f32 %v5862_v4, %v5820_v62  ;;  %v5865_v33 = vld [vmem:[#allocation29_spill] sm:$0xff] }
 0x107   : > { %v1501_v39 = vmax.f32 %v1245_v23, %v1373_v40  ;;  %v1263_v52 = vadd.f32 %v4629_v51, %v1087_v0  ;;  %v978_v55 = vadd.f32 %v5861_v45, %v546_v29  ;;  %v1375_v50 = vmul.f32 0.2, %v1247_v25 }
 0x108   : > { %v1592_v30 = vpack.c.bf16 %v1520_v43, %v1504_v41  ;;  %v1517_v17 = vmax.f32 %v1261_v59, %v1389_v21  ;;  %v994_v6 = vadd.f32 %v5863_v7, %v562_v35  ;;  %v564_v53 = vmul.f32 %v5862_v4, %v5822_v26  ;;  %v5867_v41 = vld [vmem:[#allocation25_spill] sm:$0xff]  ;;  %v5868_v59 = vld [vmem:[#allocation30_spill] sm:$0xff] }
 0x109   : > { %v1391_v48 = vmul.f32 0.2, %v1263_v52  ;;  %v1154_v38 = vadd.f32 %v4407_v28, %v978_v55  ;;  %v980_v36 = vadd.f32 %v5864_v10, %v548_v32  ;;  %v1503_v14 = vmax.f32 %v1247_v25, %v1375_v50 }
 0x10a   : > { %1907 = vmatprep.subr.bf16.mxu1 %v1592_v30  ;;  %v1589_v42 = vpack.c.bf16 %v1517_v17, %v1501_v39  ;;  %v1170_v5 = vadd.f32 %v4449_v2, %v994_v6  ;;  %v545_v37 = vmul.f32 %v5865_v33, %v5820_v62  ;;  %v996_v23 = vadd.f32 %v5866_v18, %v564_v53  ;;  %v5870_v39 = vld [vmem:[#allocation31_spill] sm:$0xff]  ;;  %v5871_v30 = vld [vmem:[#allocation32_spill] sm:$0xff] }
 0x10b   : > { %v1519_v56 = vmax.f32 %v1263_v52, %v1391_v48  ;;  %v1282_v54 = vmul.f32 0.2, %v1154_v38  ;;  %v1156_v12 = vadd.f32 %v4407_v28, %v980_v36  ;;  %v561_v16 = vmul.f32 %v5865_v33, %v5822_v26  ;;  %v5872_v36 = vld [vmem:[#allocation46_spill] sm:$0xff] }
 0x10c   : > { %1835 = vmatpush1.bf16.msra.mxu0 %v1589_v42  ;;  %v1298_v22 = vmul.f32 0.2, %v1170_v5  ;;  %v849_v15 = vmul.f32 %v5868_v59, %v5867_v41  ;;  %v865_v9 = vmul.f32 %v5868_v59, %v5869_v46  ;;  %v1172_v29 = vadd.f32 %v4449_v2, %v996_v23 }
 0x10d   : > { %v1591_v40 = vpack.c.bf16 %v1519_v56, %v1503_v14  ;;  %v1410_v0 = vmax.f32 %v1154_v38, %v1282_v54  ;;  %v1284_v43 = vmul.f32 0.2, %v1156_v12  ;;  %v547_v52 = vmul.f32 %v5870_v39, %v5820_v62  ;;  %v5873_v56 = vld [vmem:[#allocation26_spill] sm:$0xff]  ;;  %v5874_v54 = vld [vmem:[#allocation24_spill] sm:$0xff] }
 0x10e   : > { %v1426_v21 = vmax.f32 %v1170_v5, %v1298_v22  ;;  %v977_v25 = vadd.f32 %v849_v15, %v545_v37  ;;  %v993_v35 = vadd.f32 %v865_v9, %v561_v16  ;;  %v1300_v45 = vmul.f32 0.2, %v1172_v29 }
 0x10f   : > { %1908 = vmatpush1.bf16.msra.mxu1 %v1591_v40  ;;  %v1412_v55 = vmax.f32 %v1156_v12, %v1284_v43  ;;  %3651 = vmatmul.mubr.msk.bf16.vlgmr.msra.gmra.mrb[16].mxu0 %vm1669_vm0, %v4649_v57  ;;  %v563_v32 = vmul.f32 %v5870_v39, %v5822_v26  ;;  %v851_v17 = vmul.f32 %v5871_v30, %v5867_v41 }
 0x110   : > { %v1546_v50 = vpack.c.bf16 %v1426_v21, %v1410_v0  ;;  %v1153_v7 = vadd.f32 %v4407_v28, %v977_v25  ;;  %v1169_v6 = vadd.f32 %v4449_v2, %v993_v35  ;;  %v867_v48 = vmul.f32 %v5871_v30, %v5869_v46  ;;  %1870 = vmatprep.mubr.bf16.mxu0 %v5849_v3  ;;  %v5875_v25 = vld [vmem:[#allocation28_spill] sm:$0xff] }
 0x111   : > { %v1428_v38 = vmax.f32 %v1172_v29, %v1300_v45  ;;  %v979_v53 = vadd.f32 %v851_v17, %v547_v52  ;;  %v578_v10 = vmul.f32 %v5860_v24, %v5834_v19  ;;  %v594_v42 = vmul.f32 %v5860_v24, %v5872_v36 }
 0x112   : > { %1974 = vmatprep.subr.bf16.mxu0 %v1546_v50  ;;  %3655 = vmatmul.mubr.msk.bf16.vlgmr.msra.gmra.mrb[16].mxu1 %vm1669_vm0, %v4649_v57  ;;  %v1281_v14 = vmul.f32 0.2, %v1153_v7  ;;  %v1297_v5 = vmul.f32 0.2, %v1169_v6  ;;  %v995_v37 = vadd.f32 %v867_v48, %v563_v32  ;;  %v882_v18 = vmul.f32 %v5874_v54, %v5873_v56 }
 0x113   : > { %v1548_v23 = vpack.c.bf16 %v1428_v38, %v1412_v55  ;;  %v1155_v12 = vadd.f32 %v4407_v28, %v979_v53  ;;  %v898_v22 = vmul.f32 %v5874_v54, %v5836_v60  ;;  %v580_v16 = vmul.f32 %v5862_v4, %v5834_v19  ;;  %1943 = vmatprep.mubr.bf16.mxu1 %v5849_v3 }
 0x114   : > { %v1409_v15 = vmax.f32 %v1153_v7, %v1281_v14  ;;  %v1425_v9 = vmax.f32 %v1169_v6, %v1297_v5  ;;  %v1171_v40 = vadd.f32 %v4449_v2, %v995_v37  ;;  %v1010_v0 = vadd.f32 %v882_v18, %v578_v10 }
 0x115   : > { %2047 = vmatprep.subr.bf16.mxu1 %v1548_v23  ;;  %v1283_v29 = vmul.f32 0.2, %v1155_v12  ;;  %v1026_v43 = vadd.f32 %v898_v22, %v594_v42  ;;  %v596_v21 = vmul.f32 %v5862_v4, %v5872_v36  ;;  %v884_v35 = vmul.f32 %v5875_v25, %v5873_v56 }
 0x116   : > { %v1545_v52 = vpack.c.bf16 %v1425_v9, %v1409_v15  ;;  %v1299_v45 = vmul.f32 0.2, %v1171_v40  ;;  %v1186_v55 = vadd.f32 %v4493_v27, %v1010_v0  ;;  %v900_v32 = vmul.f32 %v5875_v25, %v5836_v60 }
 0x117   : > { %v1411_v17 = vmax.f32 %v1155_v12, %v1283_v29  ;;  %v1202_v50 = vadd.f32 %v4467_v11, %v1026_v43  ;;  %v1012_v7 = vadd.f32 %v884_v35, %v580_v16  ;;  %v577_v6 = vmul.f32 %v5865_v33, %v5834_v19  ;;  %3652 = vmatmul.mubr.msk.bf16.gmra.mrb[20].mxu0 %vm1669_vm0, %v4691_v47 }
 0x118   : > { %1975 = vmatpush1.bf16.msra.mxu0 %v1545_v52  ;;  %v1427_v48 = vmax.f32 %v1171_v40, %v1299_v45  ;;  %v1314_v38 = vmul.f32 0.2, %v1186_v55  ;;  %v1028_v53 = vadd.f32 %v900_v32, %v596_v21  ;;  %v593_v10 = vmul.f32 %v5865_v33, %v5872_v36  ;;  %1880 = vmatprep.mubr.bf16.mxu0 %v5849_v3 }
 0x119   : > { %v1330_v42 = vmul.f32 0.2, %v1202_v50  ;;  %v1188_v14 = vadd.f32 %v4493_v27, %v1012_v7  ;;  %v881_v5 = vmul.f32 %v5868_v59, %v5873_v56  ;;  %v897_v37 = vmul.f32 %v5868_v59, %v5836_v60 }
 0x11a   : > { %v1547_v18 = vpack.c.bf16 %v1427_v48, %v1411_v17  ;;  %v1442_v23 = vmax.f32 %v1186_v55, %v1314_v38  ;;  %v1204_v12 = vadd.f32 %v4467_v11, %v1028_v53  ;;  %v579_v22 = vmul.f32 %v5870_v39, %v5834_v19  ;;  %3656 = vmatmul.mubr.msk.bf16.gmra.mrb[20].mxu1 %vm1669_vm0, %v4691_v47  ;;  %v5876_v53 = vld [vmem:[#allocation34_spill] sm:$0xff] }
 0x11b   : > { %v1458_v16 = vmax.f32 %v1202_v50, %v1330_v42  ;;  %v1316_v15 = vmul.f32 0.2, %v1188_v14  ;;  %v1009_v9 = vadd.f32 %v881_v5, %v577_v6  ;;  %v1025_v40 = vadd.f32 %v897_v37, %v593_v10  ;;  %1953 = vmatprep.mubr.bf16.mxu1 %v5849_v3 }
 0x11c   : > { %2048 = vmatpush1.bf16.msra.mxu1 %v1547_v18  ;;  %v1332_v0 = vmul.f32 0.2, %v1204_v12  ;;  %v595_v29 = vmul.f32 %v5870_v39, %v5872_v36  ;;  %v883_v43 = vmul.f32 %v5871_v30, %v5873_v56  ;;  %v899_v21 = vmul.f32 %v5871_v30, %v5836_v60 }
 0x11d   : > { %v1562_v35 = vpack.c.bf16 %v1458_v16, %v1442_v23  ;;  %v1444_v52 = vmax.f32 %v1188_v14, %v1316_v15  ;;  %v1185_v45 = vadd.f32 %v4493_v27, %v1009_v9  ;;  %v1201_v55 = vadd.f32 %v4467_v11, %v1025_v40 }
 0x11e   : > { %v1460_v32 = vmax.f32 %v1204_v12, %v1332_v0  ;;  %v1011_v17 = vadd.f32 %v883_v43, %v579_v22  ;;  %v1027_v50 = vadd.f32 %v899_v21, %v595_v29  ;;  %v610_v7 = vmul.f32 %v5860_v24, %v5851_v8 }
 0x11f   : > { %1976 = vmatprep.subr.bf16.mxu0 %v1562_v35  ;;  %v1313_v6 = vmul.f32 0.2, %v1185_v45  ;;  %v1329_v48 = vmul.f32 0.2, %v1201_v55  ;;  %v626_v38 = vmul.f32 %v5860_v24, %v4457_v44  ;;  %v914_v10 = vmul.f32 %v5874_v54, %v5876_v53  ;;  %3653 = vmatmul.mubr.msk.bf16.gmra.mrb[24].mxu0 %vm1669_vm0, %v4727_v31 }
 0x120   : > { %v1564_v42 = vpack.c.bf16 %v1460_v32, %v1444_v52  ;;  %v1187_v14 = vadd.f32 %v4493_v27, %v1011_v17  ;;  %v1203_v5 = vadd.f32 %v4467_v11, %v1027_v50  ;;  %v930_v37 = vmul.f32 %v5874_v54, %v4480_v34  ;;  %1890 = vmatprep.mubr.bf16.mxu0 %v5849_v3 }
 0x121   : > { %v1441_v18 = vmax.f32 %v1185_v45, %v1313_v6  ;;  %v1457_v23 = vmax.f32 %v1201_v55, %v1329_v48  ;;  %v1042_v12 = vadd.f32 %v914_v10, %v610_v7  ;;  %v612_v22 = vmul.f32 %v5862_v4, %v5851_v8 }
 0x122   : > { %2049 = vmatprep.subr.bf16.mxu1 %v1564_v42  ;;  %v1315_v16 = vmul.f32 0.2, %v1187_v14  ;;  %v1331_v15 = vmul.f32 0.2, %v1203_v5  ;;  %v1058_v9 = vadd.f32 %v930_v37, %v626_v38  ;;  %v628_v40 = vmul.f32 %v5862_v4, %v4457_v44  ;;  %3657 = vmatmul.mubr.msk.bf16.gmra.mrb[24].mxu1 %vm1669_vm0, %v4727_v31 }
 0x123   : > { %v1561_v0 = vpack.c.bf16 %v1457_v23, %v1441_v18  ;;  %v1218_v29 = vadd.f32 %v4593_v61, %v1042_v12  ;;  %v916_v43 = vmul.f32 %v5875_v25, %v5876_v53  ;;  %v932_v21 = vmul.f32 %v5875_v25, %v4480_v34  ;;  %1963 = vmatprep.mubr.bf16.mxu1 %v5849_v3 }
 0x124   : > { %v1443_v35 = vmax.f32 %v1187_v14, %v1315_v16  ;;  %v1459_v52 = vmax.f32 %v1203_v5, %v1331_v15  ;;  %v1234_v45 = vadd.f32 %v4501_v13, %v1058_v9  ;;  %v609_v55 = vmul.f32 %v5865_v33, %v5851_v8 }
 0x125   : > { %1977 = vmatpush1.bf16.msra.mxu0 %v1561_v0  ;;  %v1346_v32 = vmul.f32 0.2, %v1218_v29  ;;  %v1044_v17 = vadd.f32 %v916_v43, %v612_v22  ;;  %v1060_v50 = vadd.f32 %v932_v21, %v628_v40  ;;  %v625_v7 = vmul.f32 %v5865_v33, %v4457_v44 }
 0x126   : > { %v1563_v6 = vpack.c.bf16 %v1459_v52, %v1443_v35  ;;  %v1362_v48 = vmul.f32 0.2, %v1234_v45  ;;  %v913_v38 = vmul.f32 %v5868_v59, %v5876_v53  ;;  %v929_v10 = vmul.f32 %v5868_v59, %v4480_v34 }
 0x127   : > { %v1474_v42 = vmax.f32 %v1218_v29, %v1346_v32  ;;  %v1220_v14 = vadd.f32 %v4593_v61, %v1044_v17  ;;  %v1236_v5 = vadd.f32 %v4501_v13, %v1060_v50  ;;  %v611_v37 = vmul.f32 %v5870_v39, %v5851_v8  ;;  %3654 = vmatmul.mubr.msk.bf16.gmra.mrb[28].mxu0 %vm1669_vm0, %v4760_v20 }
 0x128   : > { %2050 = vmatpush1.bf16.msra.mxu1 %v1563_v6  ;;  %v1490_v18 = vmax.f32 %v1234_v45, %v1362_v48  ;;  %v1041_v23 = vadd.f32 %v913_v38, %v609_v55  ;;  %v1057_v12 = vadd.f32 %v929_v10, %v625_v7  ;;  %v627_v22 = vmul.f32 %v5870_v39, %v4457_v44  ;;  %v5877_v7 = vld [vmem:[#allocation41_spill] sm:$0xff] }
 0x129   : > { %v1348_v16 = vmul.f32 0.2, %v1220_v14  ;;  %v1364_v15 = vmul.f32 0.2, %v1236_v5  ;;  %v915_v9 = vmul.f32 %v5871_v30, %v5876_v53  ;;  %v931_v40 = vmul.f32 %v5871_v30, %v4480_v34  ;;  %2006 = vmatprep.mubr.bf16.mxu0 %v5849_v3 }
 0x12a   : > { %v1578_v0 = vpack.c.bf16 %v1490_v18, %v1474_v42  ;;  %v1217_v29 = vadd.f32 %v4593_v61, %v1041_v23  ;;  %v1233_v43 = vadd.f32 %v4501_v13, %v1057_v12  ;;  %v642_v21 = vmul.f32 %v5860_v24, %v4516_v1  ;;  %3658 = vmatmul.mubr.msk.bf16.gmra.mrb[28].mxu1 %vm1669_vm0, %v4760_v20 }
 0x12b   : > { %v1476_v35 = vmax.f32 %v1220_v14, %v1348_v16  ;;  %v1492_v52 = vmax.f32 %v1236_v5, %v1364_v15  ;;  %v1043_v45 = vadd.f32 %v915_v9, %v611_v37  ;;  %v1059_v55 = vadd.f32 %v931_v40, %v627_v22  ;;  %2079 = vmatprep.mubr.bf16.mxu1 %v5849_v3 }
 0x12c   : > { %1978 = vmatprep.subr.bf16.mxu0 %v1578_v0  ;;  %v1345_v32 = vmul.f32 0.2, %v1217_v29  ;;  %v1361_v17 = vmul.f32 0.2, %v1233_v43  ;;  %v658_v50 = vmul.f32 %v5860_v24, %v4539_v49  ;;  %v946_v6 = vmul.f32 %v5874_v54, %v5877_v7 }
 0x12d   : > { %v1580_v48 = vpack.c.bf16 %v1492_v52, %v1476_v35  ;;  %v1219_v38 = vadd.f32 %v4593_v61, %v1043_v45  ;;  %v1235_v10 = vadd.f32 %v4501_v13, %v1059_v55  ;;  %v962_v42 = vmul.f32 %v5874_v54, %v4572_v58 }
 0x12e   : > { %v1473_v14 = vmax.f32 %v1217_v29, %v1345_v32  ;;  %v1489_v5 = vmax.f32 %v1233_v43, %v1361_v17  ;;  %v1074_v37 = vadd.f32 %v946_v6, %v642_v21  ;;  %v644_v18 = vmul.f32 %v5862_v4, %v4516_v1 }
 0x12f   : > { %2051 = vmatprep.subr.bf16.mxu1 %v1580_v48  ;;  %v1347_v23 = vmul.f32 0.2, %v1219_v38  ;;  %v1363_v24 = vmul.f32 0.2, %v1235_v10  ;;  %v1090_v12 = vadd.f32 %v962_v42, %v658_v50  ;;  %v660_v22 = vmul.f32 %v5862_v4, %v4539_v49 }
 0x130   : > { %v1577_v16 = vpack.c.bf16 %v1489_v5, %v1473_v14  ;;  %v1250_v15 = vadd.f32 %v4610_v63, %v1074_v37  ;;  %v948_v9 = vmul.f32 %v5875_v25, %v5877_v7  ;;  %v964_v54 = vmul.f32 %v5875_v25, %v4572_v58 }
 0x131   : > { %v1475_v40 = vmax.f32 %v1219_v38, %v1347_v23  ;;  %v1491_v0 = vmax.f32 %v1235_v10, %v1363_v24  ;;  %v1266_v29 = vadd.f32 %v4629_v51, %v1090_v12  ;;  %v641_v43 = vmul.f32 %v5865_v33, %v4516_v1 }
 0x132   : > { %1979 = vmatpush1.bf16.msra.mxu0 %v1577_v16  ;;  %v1378_v21 = vmul.f32 0.2, %v1250_v15  ;;  %v1076_v35 = vadd.f32 %v948_v9, %v644_v18  ;;  %v1092_v4 = vadd.f32 %v964_v54, %v660_v22  ;;  %v657_v52 = vmul.f32 %v5865_v33, %v4539_v49  ;;  %v4969_v18 = vld [vmem:[%s4040_s25 + $0x18] sm:$0xff]  ;;  %v5878_v22 = vld [vmem:[#allocation7_spill] sm:$0xff]  ;;  %s3698_s25 = sshll.u32 %s3904_s8, 8  ;;  %s3559_s8 = scalar_lea.sflag [#allocation4], %s326_s22 }
 0x133   : > { %v1579_v45 = vpack.c.bf16 %v1491_v0, %v1475_v40  ;;  %v1394_v55 = vmul.f32 0.2, %v1266_v29  ;;  %v945_v25 = vmul.f32 %v5868_v59, %v5877_v7  ;;  %v961_v32 = vmul.f32 %v5868_v59, %v4572_v58  ;;  %s5639_s29 = scalar_lea.hbm %s5693_s9, %s3698_s25 }
 0x134   : > { %v1506_v17 = vmax.f32 %v1250_v15, %v1378_v21  ;;  %v1252_v50 = vadd.f32 %v4610_v63, %v1076_v35  ;;  %v1268_v6 = vadd.f32 %v4629_v51, %v1092_v4  ;;  %v643_v48 = vmul.f32 %v5870_v39, %v4516_v1 }
 0x135   : > { %2052 = vmatpush1.bf16.msra.mxu1 %v1579_v45  ;;  %v1522_v38 = vmax.f32 %v1266_v29, %v1394_v55  ;;  %v1073_v33 = vadd.f32 %v945_v25, %v641_v43  ;;  %v1089_v10 = vadd.f32 %v961_v32, %v657_v52  ;;  %v659_v42 = vmul.f32 %v5870_v39, %v4539_v49  ;;  %v5879_v29 = vld [vmem:[#allocation9_spill] sm:$0xff]  ;;  %v5881_v45 = vld [vmem:[#allocation11_spill] sm:$0xff] }
 0x136   : > { %v1380_v14 = vmul.f32 0.2, %v1252_v50  ;;  %v1396_v5 = vmul.f32 0.2, %v1268_v6  ;;  %v947_v59 = vmul.f32 %v5871_v30, %v5877_v7  ;;  %v963_v37 = vmul.f32 %v5871_v30, %v4572_v58  ;;  %v5880_v30 = vld [vmem:[#allocation8_spill] sm:$0xff] }
 0x137   : > { %v1594_v23 = vpack.c.bf16 %v1522_v38, %v1506_v17  ;;  %v1249_v24 = vadd.f32 %v4610_v63, %v1073_v33  ;;  %v1265_v12 = vadd.f32 %v4629_v51, %v1089_v10  ;;  %v448_v16 = vrot.slane %v4969_v18, %v5878_v22  ;;  %v5882_v38 = vld [vmem:[#allocation10_spill] sm:$0xff] }
 0x138   : > { %v1508_v15 = vmax.f32 %v1252_v50, %v1380_v14  ;;  %v1524_v39 = vmax.f32 %v1268_v6, %v1396_v5  ;;  %v1075_v9 = vadd.f32 %v947_v59, %v643_v48  ;;  %v1091_v54 = vadd.f32 %v963_v37, %v659_v42  ;;  %v5883_v14 = vld [vmem:[#allocation12_spill] sm:$0xff] }
 0x139   : > { %1980 = vmatprep.subr.bf16.mxu0 %v1594_v23  ;;  %v1377_v40 = vmul.f32 0.2, %v1249_v24  ;;  %v1393_v0 = vmul.f32 0.2, %v1265_v12  ;;  %v4976_v43 = vrot.slane %v448_v16, %v5879_v29  ;;  %v752_v21 = vrot.slane %v4969_v18, %v5880_v30 }
 0x13a   : > { %v1596_v35 = vpack.c.bf16 %v1524_v39, %v1508_v15  ;;  %v1251_v4 = vadd.f32 %v4610_v63, %v1075_v9  ;;  %v1267_v52 = vadd.f32 %v4629_v51, %v1091_v54  ;;  %v456_v55 = vrot.slane %v4969_v18, %v5881_v45 }
 0x13b   : > { %v1505_v25 = vmax.f32 %v1249_v24, %v1377_v40  ;;  %v1521_v32 = vmax.f32 %v1265_v12, %v1393_v0  ;;  %v550_v17 = vmul.f32 %v4976_v43, %v5820_v62  ;;  %v566_v50 = vmul.f32 %v4976_v43, %v5822_v26 }
 0x13c   : > { %2053 = vmatprep.subr.bf16.mxu1 %v1596_v35  ;;  %v1379_v6 = vmul.f32 0.2, %v1251_v4  ;;  %v1395_v48 = vmul.f32 0.2, %v1267_v52  ;;  %v4989_v33 = vrot.slane %v752_v21, %v5882_v38  ;;  %v4992_v10 = vrot.slane %v456_v55, %v5879_v29 }
 0x13d   : > { %v1593_v42 = vpack.c.bf16 %v1521_v32, %v1505_v25  ;;  %v760_v5 = vrot.slane %v4969_v18, %v5883_v14  ;;  %v444_v59 = vrot.slane %v4969_v18, %v5879_v29  ;;  %v748_v37 = vrot.slane %v4969_v18, %v5882_v38 }
 0x13e   : > { %v1507_v23 = vmax.f32 %v1251_v4, %v1379_v6  ;;  %v1523_v24 = vmax.f32 %v1267_v52, %v1395_v48  ;;  %v854_v12 = vmul.f32 %v4989_v33, %v5867_v41  ;;  %v870_v22 = vmul.f32 %v4989_v33, %v5869_v46  ;;  %v5884_v6 = vld [vmem:[#allocation13_spill] sm:$0xff] }
 0x13f   : > { %1981 = vmatpush1.bf16.msra.mxu0 %v1593_v42  ;;  %v552_v16 = vmul.f32 %v4992_v10, %v5820_v62  ;;  %v568_v15 = vmul.f32 %v4992_v10, %v5822_v26  ;;  %v5009_v39 = vrot.slane %v760_v5, %v5882_v38  ;;  %v5012_v9 = vrot.slane %v444_v59, %v5879_v29  ;;  %v5885_v59 = vld [vmem:[#allocation14_spill] sm:$0xff] }
 0x140   : > { %v1595_v54 = vpack.c.bf16 %v1523_v24, %v1507_v23  ;;  %v982_v40 = vadd.f32 %v854_v12, %v550_v17  ;;  %v998_v0 = vadd.f32 %v870_v22, %v566_v50  ;;  %v5015_v30 = vrot.slane %v748_v37, %v5882_v38 }
 0x141   : > { %v856_v21 = vmul.f32 %v5009_v39, %v5867_v41  ;;  %v872_v35 = vmul.f32 %v5009_v39, %v5869_v46  ;;  %v549_v4 = vmul.f32 %v5012_v9, %v5820_v62  ;;  %v565_v52 = vmul.f32 %v5012_v9, %v5822_v26 }
 0x142   : > { %2054 = vmatpush1.bf16.msra.mxu1 %v1595_v54  ;;  %v1158_v45 = vadd.f32 %v4407_v28, %v982_v40  ;;  %v1174_v55 = vadd.f32 %v4449_v2, %v998_v0  ;;  %3659 = vmatmul.mubr.msk.bf16.vlgmr.msra.gmra.mrb[32].mxu0 %vm1669_vm0, %v4649_v57  ;;  %v853_v25 = vmul.f32 %v5015_v30, %v5867_v41 }
 0x143   : > { %v984_v32 = vadd.f32 %v856_v21, %v552_v16  ;;  %v1000_v17 = vadd.f32 %v872_v35, %v568_v15  ;;  %v869_v50 = vmul.f32 %v5015_v30, %v5869_v46  ;;  %v452_v48 = vrot.slane %v4969_v18, %v5884_v6  ;;  %2016 = vmatprep.mubr.bf16.mxu0 %v5849_v3 }
 0x144   : > { %v1286_v42 = vmul.f32 0.2, %v1158_v45  ;;  %v1302_v14 = vmul.f32 0.2, %v1174_v55  ;;  %v981_v5 = vadd.f32 %v853_v25, %v549_v4  ;;  %v756_v37 = vrot.slane %v4969_v18, %v5885_v59 }
 0x145   : > { %v1160_v23 = vadd.f32 %v4407_v28, %v984_v32  ;;  %v1176_v24 = vadd.f32 %v4449_v2, %v1000_v17  ;;  %3663 = vmatmul.mubr.msk.bf16.vlgmr.msra.gmra.mrb[32].mxu1 %vm1669_vm0, %v4649_v57  ;;  %v997_v12 = vadd.f32 %v869_v50, %v565_v52  ;;  %v5043_v22 = vrot.slane %v452_v48, %v5879_v29 }
 0x146   : > { %v1414_v16 = vmax.f32 %v1158_v45, %v1286_v42  ;;  %v1430_v15 = vmax.f32 %v1174_v55, %v1302_v14  ;;  %v1157_v54 = vadd.f32 %v4407_v28, %v981_v5  ;;  %v5047_v40 = vrot.slane %v756_v37, %v5882_v38  ;;  %2089 = vmatprep.mubr.bf16.mxu1 %v5849_v3 }
 0x147   : > { %v1288_v18 = vmul.f32 0.2, %v1160_v23  ;;  %v1304_v0 = vmul.f32 0.2, %v1176_v24  ;;  %v1173_v21 = vadd.f32 %v4449_v2, %v997_v12  ;;  %v551_v57 = vmul.f32 %v5043_v22, %v5820_v62 }
 0x148   : > { %v1550_v35 = vpack.c.bf16 %v1430_v15, %v1414_v16  ;;  %v1285_v4 = vmul.f32 0.2, %v1157_v54  ;;  %v567_v52 = vmul.f32 %v5043_v22, %v5822_v26  ;;  %v855_v45 = vmul.f32 %v5047_v40, %v5867_v41 }
 0x149   : > { %v1416_v55 = vmax.f32 %v1160_v23, %v1288_v18  ;;  %v1432_v38 = vmax.f32 %v1176_v24, %v1304_v0  ;;  %v1301_v25 = vmul.f32 0.2, %v1173_v21  ;;  %v871_v32 = vmul.f32 %v5047_v40, %v5869_v46 }
 0x14a   : > { %2120 = vmatprep.subr.bf16.mxu0 %v1550_v35  ;;  %v1413_v17 = vmax.f32 %v1157_v54, %v1285_v4  ;;  %v983_v50 = vadd.f32 %v855_v45, %v551_v57  ;;  %v582_v62 = vmul.f32 %v4976_v43, %v5834_v19  ;;  %v598_v6 = vmul.f32 %v4976_v43, %v5872_v36 }
 0x14b   : > { %v1552_v48 = vpack.c.bf16 %v1432_v38, %v1416_v55  ;;  %v1429_v26 = vmax.f32 %v1173_v21, %v1301_v25  ;;  %v999_v42 = vadd.f32 %v871_v32, %v567_v52  ;;  %v886_v41 = vmul.f32 %v4989_v33, %v5873_v56  ;;  %3660 = vmatmul.mubr.msk.bf16.gmra.mrb[36].mxu0 %vm1669_vm0, %v4691_v47 }
 0x14c   : > { %v1159_v46 = vadd.f32 %v4407_v28, %v983_v50  ;;  %v902_v14 = vmul.f32 %v4989_v33, %v5836_v60  ;;  %v584_v5 = vmul.f32 %v4992_v10, %v5834_v19  ;;  %v600_v59 = vmul.f32 %v4992_v10, %v5872_v36  ;;  %2026 = vmatprep.mubr.bf16.mxu0 %v5849_v3 }
 0x14d   : > { %2193 = vmatprep.subr.bf16.mxu1 %v1552_v48  ;;  %v1549_v37 = vpack.c.bf16 %v1429_v26, %v1413_v17  ;;  %v1175_v23 = vadd.f32 %v4449_v2, %v999_v42  ;;  %v1014_v24 = vadd.f32 %v886_v41, %v582_v62  ;;  %v888_v12 = vmul.f32 %v5009_v39, %v5873_v56 }
 0x14e   : > { %v1287_v28 = vmul.f32 0.2, %v1159_v46  ;;  %v1030_v16 = vadd.f32 %v902_v14, %v598_v6  ;;  %v904_v15 = vmul.f32 %v5009_v39, %v5836_v60  ;;  %v581_v54 = vmul.f32 %v5012_v9, %v5834_v19  ;;  %3664 = vmatmul.mubr.msk.bf16.gmra.mrb[36].mxu1 %vm1669_vm0, %v4691_v47 }
 0x14f   : > { %2121 = vmatpush1.bf16.msra.mxu0 %v1549_v37  ;;  %v1303_v18 = vmul.f32 0.2, %v1175_v23  ;;  %v1190_v0 = vadd.f32 %v4493_v27, %v1014_v24  ;;  %v1016_v2 = vadd.f32 %v888_v12, %v584_v5  ;;  %v597_v21 = vmul.f32 %v5012_v9, %v5872_v36  ;;  %2099 = vmatprep.mubr.bf16.mxu1 %v5849_v3 }
 0x150   : > { %v1415_v57 = vmax.f32 %v1159_v46, %v1287_v28  ;;  %v1206_v35 = vadd.f32 %v4467_v11, %v1030_v16  ;;  %v1032_v4 = vadd.f32 %v904_v15, %v600_v59  ;;  %v885_v52 = vmul.f32 %v5015_v30, %v5873_v56 }
 0x151   : > { %v1431_v45 = vmax.f32 %v1175_v23, %v1303_v18  ;;  %v1318_v55 = vmul.f32 0.2, %v1190_v0  ;;  %v1192_v47 = vadd.f32 %v4493_v27, %v1016_v2  ;;  %v901_v38 = vmul.f32 %v5015_v30, %v5836_v60 }
 0x152   : > { %v1334_v25 = vmul.f32 0.2, %v1206_v35  ;;  %v1208_v32 = vadd.f32 %v4467_v11, %v1032_v4  ;;  %v1013_v17 = vadd.f32 %v885_v52, %v581_v54  ;;  %v583_v50 = vmul.f32 %v5043_v22, %v5834_v19 }
 0x153   : > { %v1551_v62 = vpack.c.bf16 %v1431_v45, %v1415_v57  ;;  %v1446_v6 = vmax.f32 %v1190_v0, %v1318_v55  ;;  %v1320_v48 = vmul.f32 0.2, %v1192_v47  ;;  %v1029_v26 = vadd.f32 %v901_v38, %v597_v21  ;;  %3661 = vmatmul.mubr.msk.bf16.gmra.mrb[40].mxu0 %vm1669_vm0, %v4727_v31 }
 0x154   : > { %v1462_v42 = vmax.f32 %v1206_v35, %v1334_v25  ;;  %v1336_v41 = vmul.f32 0.2, %v1208_v32  ;;  %v1189_v46 = vadd.f32 %v4493_v27, %v1013_v17  ;;  %v599_v14 = vmul.f32 %v5043_v22, %v5872_v36  ;;  %2036 = vmatprep.mubr.bf16.mxu0 %v5849_v3 }
 0x155   : > { %2194 = vmatpush1.bf16.msra.mxu1 %v1551_v62  ;;  %v1448_v5 = vmax.f32 %v1192_v47, %v1320_v48  ;;  %v1205_v19 = vadd.f32 %v4467_v11, %v1029_v26  ;;  %v887_v59 = vmul.f32 %v5047_v40, %v5873_v56  ;;  %v903_v37 = vmul.f32 %v5047_v40, %v5836_v60 }
 0x156   : > { %v1566_v23 = vpack.c.bf16 %v1462_v42, %v1446_v6  ;;  %v1464_v24 = vmax.f32 %v1208_v32, %v1336_v41  ;;  %v1317_v12 = vmul.f32 0.2, %v1189_v46  ;;  %v614_v28 = vmul.f32 %v4976_v43, %v5851_v8  ;;  %3665 = vmatmul.mubr.msk.bf16.gmra.mrb[40].mxu1 %vm1669_vm0, %v4727_v31 }
 0x157   : > { %v1333_v36 = vmul.f32 0.2, %v1205_v19  ;;  %v1015_v16 = vadd.f32 %v887_v59, %v583_v50  ;;  %v1031_v15 = vadd.f32 %v903_v37, %v599_v14  ;;  %v630_v54 = vmul.f32 %v4976_v43, %v4457_v44  ;;  %2109 = vmatprep.mubr.bf16.mxu1 %v5849_v3 }
 0x158   : > { %2122 = vmatprep.subr.bf16.mxu0 %v1566_v23  ;;  %v1568_v56 = vpack.c.bf16 %v1464_v24, %v1448_v5  ;;  %v1445_v60 = vmax.f32 %v1189_v46, %v1317_v12  ;;  %v918_v18 = vmul.f32 %v4989_v33, %v5876_v53  ;;  %v934_v0 = vmul.f32 %v4989_v33, %v4480_v34 }
 0x159   : > { %v1461_v2 = vmax.f32 %v1205_v19, %v1333_v36  ;;  %v1191_v31 = vadd.f32 %v4493_v27, %v1015_v16  ;;  %v1207_v21 = vadd.f32 %v4467_v11, %v1031_v15  ;;  %v616_v57 = vmul.f32 %v4992_v10, %v5851_v8 }
 0x15a   : > { %2195 = vmatprep.subr.bf16.mxu1 %v1568_v56  ;;  %v1046_v35 = vadd.f32 %v918_v18, %v614_v28  ;;  %v1062_v4 = vadd.f32 %v934_v0, %v630_v54  ;;  %v632_v52 = vmul.f32 %v4992_v10, %v4457_v44  ;;  %v920_v45 = vmul.f32 %v5009_v39, %v5876_v53 }
 0x15b   : > { %v1565_v55 = vpack.c.bf16 %v1461_v2, %v1445_v60  ;;  %v1319_v47 = vmul.f32 0.2, %v1191_v31  ;;  %v1335_v38 = vmul.f32 0.2, %v1207_v21  ;;  %v936_v27 = vmul.f32 %v5009_v39, %v4480_v34  ;;  %3662 = vmatmul.mubr.msk.bf16.gmra.mrb[44].mxu0 %vm1669_vm0, %v4760_v20 }
 0x15c   : > { %v1222_v11 = vadd.f32 %v4593_v61, %v1046_v35  ;;  %v1238_v25 = vadd.f32 %v4501_v13, %v1062_v4  ;;  %v1048_v32 = vadd.f32 %v920_v45, %v616_v57  ;;  %v613_v17 = vmul.f32 %v5012_v9, %v5851_v8  ;;  %2152 = vmatprep.mubr.bf16.mxu0 %v5849_v3 }
 0x15d   : > { %2123 = vmatpush1.bf16.msra.mxu0 %v1565_v55  ;;  %v1447_v50 = vmax.f32 %v1191_v31, %v1319_v47  ;;  %v1463_v62 = vmax.f32 %v1207_v21, %v1335_v38  ;;  %v1064_v6 = vadd.f32 %v936_v27, %v632_v52  ;;  %v629_v48 = vmul.f32 %v5012_v9, %v4457_v44 }
 0x15e   : > { %v1350_v26 = vmul.f32 0.2, %v1222_v11  ;;  %v1366_v42 = vmul.f32 0.2, %v1238_v25  ;;  %v1224_v41 = vadd.f32 %v4593_v61, %v1048_v32  ;;  %v917_v46 = vmul.f32 %v5015_v30, %v5876_v53  ;;  %3666 = vmatmul.mubr.msk.bf16.gmra.mrb[44].mxu1 %vm1669_vm0, %v4760_v20 }
 0x15f   : > { %v1567_v14 = vpack.c.bf16 %v1463_v62, %v1447_v50  ;;  %v1240_v5 = vadd.f32 %v4501_v13, %v1064_v6  ;;  %v933_v19 = vmul.f32 %v5015_v30, %v4480_v34  ;;  %v615_v59 = vmul.f32 %v5043_v22, %v5851_v8  ;;  %2225 = vmatprep.mubr.bf16.mxu1 %v5849_v3 }
 0x160   : > { %v1478_v37 = vmax.f32 %v1222_v11, %v1350_v26  ;;  %v1494_v23 = vmax.f32 %v1238_v25, %v1366_v42  ;;  %v1352_v24 = vmul.f32 0.2, %v1224_v41  ;;  %v1045_v12 = vadd.f32 %v917_v46, %v613_v17 }
 0x161   : > { %2196 = vmatpush1.bf16.msra.mxu1 %v1567_v14  ;;  %v1368_v28 = vmul.f32 0.2, %v1240_v5  ;;  %v1061_v36 = vadd.f32 %v933_v19, %v629_v48  ;;  %v631_v20 = vmul.f32 %v5043_v22, %v4457_v44  ;;  %v919_v16 = vmul.f32 %v5047_v40, %v5876_v53 }
 0x162   : > { %v1582_v15 = vpack.c.bf16 %v1494_v23, %v1478_v37  ;;  %v1480_v54 = vmax.f32 %v1224_v41, %v1352_v24  ;;  %v1221_v56 = vadd.f32 %v4593_v61, %v1045_v12  ;;  %v935_v8 = vmul.f32 %v5047_v40, %v4480_v34 }
 0x163   : > { %v1496_v60 = vmax.f32 %v1240_v5, %v1368_v28  ;;  %v1237_v18 = vadd.f32 %v4501_v13, %v1061_v36  ;;  %v1047_v0 = vadd.f32 %v919_v16, %v615_v59  ;;  %v646_v2 = vmul.f32 %v4976_v43, %v4516_v1 }
 0x164   : > { %2124 = vmatprep.subr.bf16.mxu0 %v1582_v15  ;;  %v1349_v31 = vmul.f32 0.2, %v1221_v56  ;;  %v1063_v44 = vadd.f32 %v935_v8, %v631_v20  ;;  %v662_v53 = vmul.f32 %v4976_v43, %v4539_v49  ;;  %v950_v21 = vmul.f32 %v4989_v33, %v5877_v7 }
 0x165   : > { %v1584_v57 = vpack.c.bf16 %v1496_v60, %v1480_v54  ;;  %v1365_v35 = vmul.f32 0.2, %v1237_v18  ;;  %v1223_v34 = vadd.f32 %v4593_v61, %v1047_v0  ;;  %v966_v4 = vmul.f32 %v4989_v33, %v4572_v58 }
 0x166   : > { %v1477_v52 = vmax.f32 %v1221_v56, %v1349_v31  ;;  %v1239_v45 = vadd.f32 %v4501_v13, %v1063_v44  ;;  %v1078_v55 = vadd.f32 %v950_v21, %v646_v2  ;;  %v648_v47 = vmul.f32 %v4992_v10, %v4516_v1 }
 0x167   : > { %2197 = vmatprep.subr.bf16.mxu1 %v1584_v57  ;;  %v1493_v38 = vmax.f32 %v1237_v18, %v1365_v35  ;;  %v1351_v43 = vmul.f32 0.2, %v1223_v34  ;;  %v1094_v27 = vadd.f32 %v966_v4, %v662_v53  ;;  %v664_v11 = vmul.f32 %v4992_v10, %v4539_v49  ;;  %v3757_v35 = vld [vmem:[%s5687_s3] sm:$0xff]   ;;  %v5227_v4 = vpop.permute.xlu0 %1611 }
 0x168   : > { %v1367_v25 = vmul.f32 0.2, %v1239_v45  ;;  %v1254_v61 = vadd.f32 %v4610_v63, %v1078_v55  ;;  %v952_v33 = vmul.f32 %v5009_v39, %v5877_v7  ;;  %v968_v13 = vmul.f32 %v5009_v39, %v4572_v58 }
 0x169   : > { %v1581_v32 = vpack.c.bf16 %v1493_v38, %v1477_v52  ;;  %v1479_v17 = vmax.f32 %v1223_v34, %v1351_v43  ;;  %v1270_v50 = vadd.f32 %v4629_v51, %v1094_v27  ;;  %v645_v62 = vmul.f32 %v5012_v9, %v4516_v1  ;;  %v3760_v34 = vld [vmem:[%s5687_s3 + $0x18] sm:$0xff]   ;;  %v5229_v52 = vpop.permute.xlu1 %1616 }
 0x16a   : > { %v1495_v6 = vmax.f32 %v1239_v45, %v1367_v25  ;;  %v1382_v48 = vmul.f32 0.2, %v1254_v61  ;;  %v1080_v26 = vadd.f32 %v952_v33, %v648_v47  ;;  %v1096_v10 = vadd.f32 %v968_v13, %v664_v11 }
 0x16b   : > { %2125 = vmatpush1.bf16.msra.mxu0 %v1581_v32  ;;  %v1398_v42 = vmul.f32 0.2, %v1270_v50  ;;  %v661_v41 = vmul.f32 %v5012_v9, %v4539_v49  ;;  %v949_v46 = vmul.f32 %v5015_v30, %v5877_v7  ;;  %v965_v39 = vmul.f32 %v5015_v30, %v4572_v58 }
 0x16c   : > { %v1583_v14 = vpack.c.bf16 %v1495_v6, %v1479_v17  ;;  %v1510_v5 = vmax.f32 %v1254_v61, %v1382_v48  ;;  %v1256_v19 = vadd.f32 %v4610_v63, %v1080_v26  ;;  %v1272_v59 = vadd.f32 %v4629_v51, %v1096_v10 }
 0x16d   : > { %v1526_v37 = vmax.f32 %v1270_v50, %v1398_v42  ;;  %v1077_v23 = vadd.f32 %v949_v46, %v645_v62  ;;  %v1093_v24 = vadd.f32 %v965_v39, %v661_v41  ;;  %v647_v12 = vmul.f32 %v5043_v22, %v4516_v1 }
 0x16e   : > { %2198 = vmatpush1.bf16.msra.mxu1 %v1583_v14  ;;  %v1384_v9 = vmul.f32 0.2, %v1256_v19  ;;  %v1400_v28 = vmul.f32 0.2, %v1272_v59  ;;  %v663_v36 = vmul.f32 %v5043_v22, %v4539_v49  ;;  %v951_v30 = vmul.f32 %v5047_v40, %v5877_v7 }
 0x16f   : > { %v1598_v20 = vpack.c.bf16 %v1526_v37, %v1510_v5  ;;  %v1253_v16 = vadd.f32 %v4610_v63, %v1077_v23  ;;  %v1269_v15 = vadd.f32 %v4629_v51, %v1093_v24  ;;  %v967_v54 = vmul.f32 %v5047_v40, %v4572_v58 }
 0x170   : > { %v1512_v56 = vmax.f32 %v1256_v19, %v1384_v9  ;;  %v1528_v8 = vmax.f32 %v1272_v59, %v1400_v28  ;;  %v1079_v1 = vadd.f32 %v951_v30, %v647_v12  ;;  %v5239_v59 = vpop.permute.xlu0 %1621  ;;  %v5241_v28 = vpop.permute.xlu1 %1626 }
 0x171   : > { %2126 = vmatprep.subr.bf16.mxu0 %v1598_v20  ;;  %v1381_v60 = vmul.f32 0.2, %v1253_v16  ;;  %v1397_v18 = vmul.f32 0.2, %v1269_v15  ;;  %v1095_v0 = vadd.f32 %v967_v54, %v663_v36 }
 0x172   : > { %v1600_v2 = vpack.c.bf16 %v1528_v8, %v1512_v56  ;;  %v1255_v49 = vadd.f32 %v4610_v63, %v1079_v1  ;;  %v3758_v63 = vld [vmem:[%s5687_s3 + $0x8] sm:$0xff]  }
 0x173   : > { %v1509_v22 = vmax.f32 %v1253_v16, %v1381_v60  ;;  %v1525_v7 = vmax.f32 %v1269_v15, %v1397_v18  ;;  %v1271_v31 = vadd.f32 %v4629_v51, %v1095_v0  ;;  %v3759_v51 = vld [vmem:[%s5687_s3 + $0x10] sm:$0xff]  }
 0x174   : > { %2199 = vmatprep.subr.bf16.mxu1 %v1600_v2  ;;  %v1383_v44 = vmul.f32 0.2, %v1255_v49 }
 0x175   : > { %v1597_v53 = vpack.c.bf16 %v1525_v7, %v1509_v22  ;;  %v1399_v21 = vmul.f32 0.2, %v1271_v31 }
 0x176   : > { %v1511_v58 = vmax.f32 %v1255_v49, %v1383_v44 }
 0x177   : > { %2127 = vmatpush1.bf16.msra.mxu0 %v1597_v53  ;;  %v1527_v40 = vmax.f32 %v1271_v31, %v1399_v21 }
 0x179   : > { %v1599_v57 = vpack.c.bf16 %v1527_v40, %v1511_v58 }
 0x17a   : > { %3667 = vmatmul.mubr.msk.bf16.vlgmr.msra.gmra.mrb[48].mxu0 %vm1669_vm0, %v3757_v35 }
 0x17b   : > { %2200 = vmatpush1.bf16.msra.mxu1 %v1599_v57  ;;  %2162 = vmatprep.mubr.bf16.mxu0 %v5849_v3 }
 0x17e   : > { %3671 = vmatmul.mubr.msk.bf16.vlgmr.msra.gmra.mrb[48].mxu1 %vm1669_vm0, %v3757_v35 }
 0x17f   : > { %2235 = vmatprep.mubr.bf16.mxu1 %v5849_v3 }
 0x182   : > { %3668 = vmatmul.mubr.msk.bf16.gmra.mrb[52].mxu0 %vm1669_vm0, %v3758_v63 }
 0x183   : > { %2172 = vmatprep.mubr.bf16.mxu0 %v5849_v3 }
 0x186   : > { %3672 = vmatmul.mubr.msk.bf16.gmra.mrb[52].mxu1 %vm1669_vm0, %v3758_v63 }
 0x187   : > { %2245 = vmatprep.mubr.bf16.mxu1 %v5849_v3 }
 0x18a   : > { %3669 = vmatmul.mubr.msk.bf16.gmra.mrb[56].mxu0 %vm1669_vm0, %v3759_v51 }
 0x18b   : > { %2182 = vmatprep.mubr.bf16.mxu0 %v5849_v3 }
 0x18e   : > { %3673 = vmatmul.mubr.msk.bf16.gmra.mrb[56].mxu1 %vm1669_vm0, %v3759_v51 }
 0x18f   : > { %2255 = vmatprep.mubr.bf16.mxu1 %v5849_v3 }
 0x192   : > { %3670 = vmatmul.mubr.msk.bf16.gmra.mrb[60].mxu0 %vm1669_vm0, %v3760_v34 }
 0x193   : > { %2662 = vmatprep.mubr.bf16.mxu0 %v5849_v3 }
 0x196   : > { %3674 = vmatmul.mubr.msk.bf16.gmra.mrb[60].mxu1 %vm1669_vm0, %v3760_v34 }
 0x197   : > { %2715 = vmatprep.mubr.bf16.mxu1 %v5849_v3 }
 0x1bc   : > { %v1716_v45 = vpop.f32.mrb[0].mxu0 }
 0x1bd   : > { %v1717_v55 = vadd.f32 %v1716_v45, %v5227_v4  ;;  %v1789_v47 = vpop.f32.mrb[0].mxu1  ;;  %v1718_v38 = vpop.f32.mrb[1].mxu0 }
 0x1be   : > { %v1790_v43 = vadd.f32 %v1789_v47, %v5227_v4  ;;  %v1719_v27 = vadd.f32 %v1718_v38, %v5227_v4  ;;  %v1791_v11 = vpop.f32.mrb[1].mxu1  ;;  %v1720_v25 = vpop.f32.mrb[2].mxu0 }
 0x1bf   : > { %v2266_v61 = vmul.f32 0.2, %v1717_v55  ;;  %v1792_v33 = vadd.f32 %v1791_v11, %v5227_v4  ;;  %v1721_v13 = vadd.f32 %v1720_v25, %v5229_v52  ;;  %v1793_v32 = vpop.f32.mrb[2].mxu1  ;;  %v1722_v17 = vpop.f32.mrb[3].mxu0 }
 0x1c0   : > { %v2268_v50 = vmul.f32 0.2, %v1790_v43  ;;  %v2267_v62 = vmul.f32 0.2, %v1719_v27  ;;  %v1794_v6 = vadd.f32 %v1793_v32, %v5229_v52  ;;  %v1723_v48 = vadd.f32 %v1722_v17, %v5229_v52  ;;  %v1795_v26 = vpop.f32.mrb[3].mxu1  ;;  %v5251_v38 = vpop.permute.xlu0 %1631 }
 0x1c1   : > { %v2269_v10 = vmul.f32 0.2, %v1792_v33  ;;  %v2282_v42 = vmul.f32 0.2, %v1721_v13  ;;  %v1796_v41 = vadd.f32 %v1795_v26, %v5229_v52  ;;  %v2394_v14 = vmax.f32 %v1717_v55, %v2266_v61 }
 0x1c2   : > { %v2284_v46 = vmul.f32 0.2, %v1794_v6  ;;  %v2283_v39 = vmul.f32 0.2, %v1723_v48  ;;  %v2396_v37 = vmax.f32 %v1790_v43, %v2268_v50  ;;  %v2395_v23 = vmax.f32 %v1719_v27, %v2267_v62  ;;  %v5254_v50 = vpop.permute.xlu1 %1636 }
 0x1c3   : > { %v2410_v5 = vmax.f32 %v1721_v13, %v2282_v42  ;;  %v2285_v19 = vmul.f32 0.2, %v1796_v41  ;;  %v2397_v36 = vmax.f32 %v1792_v33, %v2269_v10 }
 0x1c4   : > { %v2412_v24 = vmax.f32 %v1794_v6, %v2284_v46  ;;  %v2411_v12 = vmax.f32 %v1723_v48, %v2283_v39  ;;  %v1726_v9 = vpop.f32.mrb[4].mxu0 }
 0x1c5   : > { %v2526_v30 = vpack.c.bf16 %v2410_v5, %v2394_v14  ;;  %v2413_v20 = vmax.f32 %v1796_v41, %v2285_v19  ;;  %v1727_v16 = vadd.f32 %v1726_v9, %v5239_v59  ;;  %v1728_v15 = vpop.f32.mrb[5].mxu0  ;;  %v1799_v56 = vpop.f32.mrb[4].mxu1 }
 0x1c6   : > { %v2528_v54 = vpack.c.bf16 %v2412_v24, %v2396_v37  ;;  %v1729_v8 = vadd.f32 %v1728_v15, %v5239_v59  ;;  %v1730_v1 = vpop.f32.mrb[6].mxu0  ;;  %v2527_v60 = vpack.c.bf16 %v2411_v12, %v2395_v23  ;;  %v1800_v0 = vadd.f32 %v1799_v56, %v5239_v59  ;;  %v1801_v2 = vpop.f32.mrb[5].mxu1 }
 0x1c7   : > { %v2298_v18 = vmul.f32 0.2, %v1727_v16  ;;  %v1731_v49 = vadd.f32 %v1730_v1, %v5241_v28  ;;  %v1732_v22 = vpop.f32.mrb[7].mxu0  ;;  %v2529_v7 = vpack.c.bf16 %v2413_v20, %v2397_v36  ;;  %v1802_v44 = vadd.f32 %v1801_v2, %v5239_v59  ;;  %v1803_v53 = vpop.f32.mrb[6].mxu1 }
 0x1c8   : > { %v2299_v31 = vmul.f32 0.2, %v1729_v8  ;;  %v1733_v21 = vadd.f32 %v1732_v22, %v5241_v28  ;;  %2630 = vmatprep.subr.bf16.mxu0 %v2527_v60  ;;  %v2300_v58 = vmul.f32 0.2, %v1800_v0  ;;  %v1804_v57 = vadd.f32 %v1803_v53, %v5241_v28  ;;  %v1805_v35 = vpop.f32.mrb[7].mxu1  ;;  %v5263_v60 = vpop.permute.xlu0 %1641 }
 0x1c9   : > { %v2314_v40 = vmul.f32 0.2, %v1731_v49  ;;  %2683 = vmatprep.subr.bf16.mxu1 %v2529_v7  ;;  %2631 = vmatpush1.bf16.msra.mxu0 %v2526_v30  ;;  %v2301_v63 = vmul.f32 0.2, %v1802_v44  ;;  %v1806_v34 = vadd.f32 %v1805_v35, %v5241_v28  ;;  %v2426_v45 = vmax.f32 %v1727_v16, %v2298_v18  ;;  %v5266_v53 = vpop.permute.xlu1 %1646 }
 0x1ca   : > { %v2315_v51 = vmul.f32 0.2, %v1733_v21  ;;  %2684 = vmatpush1.bf16.msra.mxu1 %v2528_v54  ;;  %v2316_v47 = vmul.f32 0.2, %v1804_v57  ;;  %v2427_v43 = vmax.f32 %v1729_v8, %v2299_v31  ;;  %v2428_v61 = vmax.f32 %v1800_v0, %v2300_v58 }
 0x1cb   : > { %v2442_v55 = vmax.f32 %v1731_v49, %v2314_v40  ;;  %v2317_v11 = vmul.f32 0.2, %v1806_v34  ;;  %v2429_v62 = vmax.f32 %v1802_v44, %v2301_v63 }
 0x1cc   : > { %v2443_v27 = vmax.f32 %v1733_v21, %v2315_v51  ;;  %v1736_v25 = vpop.f32.mrb[8].mxu0  ;;  %v2444_v13 = vmax.f32 %v1804_v57, %v2316_v47 }
 0x1cd   : > { %v2542_v33 = vpack.c.bf16 %v2442_v55, %v2426_v45  ;;  %v1737_v32 = vadd.f32 %v1736_v25, %v5251_v38  ;;  %v1738_v17 = vpop.f32.mrb[9].mxu0  ;;  %v2445_v6 = vmax.f32 %v1806_v34, %v2317_v11 }
 0x1ce   : > { %v1739_v48 = vadd.f32 %v1738_v17, %v5251_v38  ;;  %v1740_v26 = vpop.f32.mrb[10].mxu0  ;;  %v2543_v10 = vpack.c.bf16 %v2443_v27, %v2427_v43  ;;  %v2544_v42 = vpack.c.bf16 %v2444_v13, %v2428_v61  ;;  %v1809_v46 = vpop.f32.mrb[8].mxu1 }
 0x1cf   : > { %v2330_v41 = vmul.f32 0.2, %v1737_v32  ;;  %v1741_v39 = vadd.f32 %v1740_v26, %v5254_v50  ;;  %v1742_v14 = vpop.f32.mrb[11].mxu0  ;;  %v1810_v5 = vadd.f32 %v1809_v46, %v5251_v38  ;;  %v1811_v37 = vpop.f32.mrb[9].mxu1  ;;  %v2545_v24 = vpack.c.bf16 %v2445_v6, %v2429_v62 }
 0x1d0   : > { %v2331_v19 = vmul.f32 0.2, %v1739_v48  ;;  %v1743_v23 = vadd.f32 %v1742_v14, %v5254_v50  ;;  %2632 = vmatprep.subr.bf16.mxu0 %v2543_v10  ;;  %v1812_v12 = vadd.f32 %v1811_v37, %v5251_v38  ;;  %v1813_v36 = vpop.f32.mrb[10].mxu1 }
 0x1d1   : > { %v2346_v9 = vmul.f32 0.2, %v1741_v39  ;;  %2633 = vmatpush1.bf16.msra.mxu0 %v2542_v33  ;;  %v2332_v30 = vmul.f32 0.2, %v1810_v5  ;;  %v1814_v20 = vadd.f32 %v1813_v36, %v5254_v50  ;;  %v1815_v15 = vpop.f32.mrb[11].mxu1  ;;  %2685 = vmatprep.subr.bf16.mxu1 %v2545_v24  ;;  %v2458_v54 = vmax.f32 %v1737_v32, %v2330_v41 }
 0x1d2   : > { %v2347_v16 = vmul.f32 0.2, %v1743_v23  ;;  %v2333_v56 = vmul.f32 0.2, %v1812_v12  ;;  %v1816_v1 = vadd.f32 %v1815_v15, %v5254_v50  ;;  %2686 = vmatpush1.bf16.msra.mxu1 %v2544_v42  ;;  %v2459_v18 = vmax.f32 %v1739_v48, %v2331_v19 }
 0x1d3   : > { %v2474_v8 = vmax.f32 %v1741_v39, %v2346_v9  ;;  %v2348_v0 = vmul.f32 0.2, %v1814_v20  ;;  %v2460_v21 = vmax.f32 %v1810_v5, %v2332_v30 }
 0x1d4   : > { %v2475_v2 = vmax.f32 %v1743_v23, %v2347_v16  ;;  %v1746_v49 = vpop.f32.mrb[12].mxu0  ;;  %v2349_v7 = vmul.f32 0.2, %v1816_v1  ;;  %v2461_v63 = vmax.f32 %v1812_v12, %v2333_v56 }
 0x1d5   : > { %v2558_v22 = vpack.c.bf16 %v2474_v8, %v2458_v54  ;;  %v1747_v31 = vadd.f32 %v1746_v49, %v5263_v60  ;;  %v1748_v44 = vpop.f32.mrb[13].mxu0  ;;  %v2476_v58 = vmax.f32 %v1814_v20, %v2348_v0  ;;  %v5278_v20 = vld [vmem:[%s5689_s5] sm:$0xff]  }
 0x1d6   : > { %v1749_v40 = vadd.f32 %v1748_v44, %v5263_v60  ;;  %v1750_v57 = vpop.f32.mrb[14].mxu0  ;;  %v2559_v35 = vpack.c.bf16 %v2475_v2, %v2459_v18  ;;  %v2477_v51 = vmax.f32 %v1816_v1, %v2349_v7 }
 0x1d7   : > { %v2362_v34 = vmul.f32 0.2, %v1747_v31  ;;  %v1819_v45 = vpop.f32.mrb[12].mxu1  ;;  %v1751_v55 = vadd.f32 %v1750_v57, %v5266_v53  ;;  %v1752_v47 = vpop.f32.mrb[15].mxu0  ;;  %v2560_v43 = vpack.c.bf16 %v2476_v58, %v2460_v21 }
 0x1d8   : > { %v1820_v27 = vadd.f32 %v1819_v45, %v5263_v60  ;;  %v2363_v11 = vmul.f32 0.2, %v1749_v40  ;;  %v1821_v25 = vpop.f32.mrb[13].mxu1  ;;  %v1753_v61 = vadd.f32 %v1752_v47, %v5266_v53  ;;  %2634 = vmatprep.subr.bf16.mxu0 %v2559_v35  ;;  %v2561_v17 = vpack.c.bf16 %v2477_v51, %v2461_v63 }
 0x1d9   : > { %v1822_v33 = vadd.f32 %v1821_v25, %v5263_v60  ;;  %v2378_v13 = vmul.f32 0.2, %v1751_v55  ;;  %v1823_v32 = vpop.f32.mrb[14].mxu1  ;;  %2635 = vmatpush1.bf16.msra.mxu0 %v2558_v22  ;;  %v2490_v10 = vmax.f32 %v1747_v31, %v2362_v34  ;;  %v5296_v34 = vld [vmem:[%s5689_s5 + $0x8] sm:$0xff]  }
 0x1da   : > { %v2364_v62 = vmul.f32 0.2, %v1820_v27  ;;  %v1824_v6 = vadd.f32 %v1823_v32, %v5266_v53  ;;  %v2379_v48 = vmul.f32 0.2, %v1753_v61  ;;  %v1825_v26 = vpop.f32.mrb[15].mxu1  ;;  %2687 = vmatprep.subr.bf16.mxu1 %v2561_v17  ;;  %v2491_v39 = vmax.f32 %v1749_v40, %v2363_v11 }
 0x1db   : > { %v2365_v42 = vmul.f32 0.2, %v1822_v33  ;;  %v2506_v41 = vmax.f32 %v1751_v55, %v2378_v13  ;;  %v1826_v46 = vadd.f32 %v1825_v26, %v5266_v53  ;;  %2688 = vmatpush1.bf16.msra.mxu1 %v2560_v43 }
 0x1dc   : > { %v2380_v14 = vmul.f32 0.2, %v1824_v6  ;;  %v2507_v5 = vmax.f32 %v1753_v61, %v2379_v48  ;;  %v2492_v23 = vmax.f32 %v1820_v27, %v2364_v62 }
 0x1dd   : > { %v2574_v19 = vpack.c.bf16 %v2506_v41, %v2490_v10  ;;  %v2381_v37 = vmul.f32 0.2, %v1826_v46  ;;  %v2493_v9 = vmax.f32 %v1822_v33, %v2365_v42 }
 0x1de   : > { %v2508_v24 = vmax.f32 %v1824_v6, %v2380_v14  ;;  %v2575_v12 = vpack.c.bf16 %v2507_v5, %v2491_v39 }
 0x1df   : > { %v2509_v36 = vmax.f32 %v1826_v46, %v2381_v37 }
 0x1e0   : > { %v2576_v30 = vpack.c.bf16 %v2508_v24, %v2492_v23  ;;  %2636 = vmatprep.subr.bf16.mxu0 %v2575_v12 }
 0x1e1   : > { %v2577_v16 = vpack.c.bf16 %v2509_v36, %v2493_v9  ;;  %2637 = vmatpush1.bf16.msra.mxu0 %v2574_v19 }
 0x1e2   : > { %v1862_v15 = vpop.f32.mrb[16].mxu0 }
 0x1e3   : > { %v1863_v54 = vadd.f32 %v1862_v15, %v5227_v4  ;;  %v1864_v56 = vpop.f32.mrb[17].mxu0  ;;  %2689 = vmatprep.subr.bf16.mxu1 %v2577_v16 }
 0x1e4   : > { %v1865_v8 = vadd.f32 %v1864_v56, %v5227_v4  ;;  %v1866_v1 = vpop.f32.mrb[18].mxu0  ;;  %2690 = vmatpush1.bf16.msra.mxu1 %v2576_v30  ;;  %3677 = vmatmul.mubr.msk.bf16.vlgmr.msra.gmra.mrb[64].mxu0 %vm1669_vm0, %v5278_v20 }
 0x1e5   : > { %v2270_v18 = vmul.f32 0.2, %v1863_v54  ;;  %v1935_v0 = vpop.f32.mrb[16].mxu1  ;;  %v1867_v2 = vadd.f32 %v1866_v1, %v5229_v52  ;;  %v1868_v49 = vpop.f32.mrb[19].mxu0  ;;  %2672 = vmatprep.mubr.bf16.mxu0 %v5849_v3 }
 0x1e6   : > { %v1936_v22 = vadd.f32 %v1935_v0, %v5227_v4  ;;  %v2271_v7 = vmul.f32 0.2, %v1865_v8  ;;  %v1937_v31 = vpop.f32.mrb[17].mxu1  ;;  %v1869_v44 = vadd.f32 %v1868_v49, %v5229_v52 }
 0x1e7   : > { %v1938_v21 = vadd.f32 %v1937_v31, %v5227_v4  ;;  %v2286_v58 = vmul.f32 0.2, %v1867_v2  ;;  %v1939_v40 = vpop.f32.mrb[18].mxu1  ;;  %3679 = vmatmul.mubr.msk.bf16.vlgmr.msra.gmra.mrb[64].mxu1 %vm1669_vm0, %v5278_v20  ;;  %v2398_v45 = vmax.f32 %v1863_v54, %v2270_v18 }
 0x1e8   : > { %v2272_v57 = vmul.f32 0.2, %v1936_v22  ;;  %v1940_v35 = vadd.f32 %v1939_v40, %v5229_v52  ;;  %v2287_v63 = vmul.f32 0.2, %v1869_v44  ;;  %v1941_v51 = vpop.f32.mrb[19].mxu1  ;;  %2725 = vmatprep.mubr.bf16.mxu1 %v5849_v3  ;;  %v2399_v27 = vmax.f32 %v1865_v8, %v2271_v7 }
 0x1e9   : > { %v2273_v55 = vmul.f32 0.2, %v1938_v21  ;;  %v2414_v47 = vmax.f32 %v1867_v2, %v2286_v58  ;;  %v1942_v43 = vadd.f32 %v1941_v51, %v5229_v52 }
 0x1ea   : > { %v2288_v11 = vmul.f32 0.2, %v1940_v35  ;;  %v2415_v25 = vmax.f32 %v1869_v44, %v2287_v63  ;;  %v1872_v61 = vpop.f32.mrb[20].mxu0  ;;  %v2400_v62 = vmax.f32 %v1936_v22, %v2272_v57 }
 0x1eb   : > { %v2530_v33 = vpack.c.bf16 %v2414_v47, %v2398_v45  ;;  %v2289_v13 = vmul.f32 0.2, %v1942_v43  ;;  %v1873_v32 = vadd.f32 %v1872_v61, %v5239_v59  ;;  %v1874_v17 = vpop.f32.mrb[21].mxu0  ;;  %v2401_v42 = vmax.f32 %v1938_v21, %v2273_v55 }
 0x1ec   : > { %v2416_v6 = vmax.f32 %v1940_v35, %v2288_v11  ;;  %v1875_v48 = vadd.f32 %v1874_v17, %v5239_v59  ;;  %v1876_v26 = vpop.f32.mrb[22].mxu0  ;;  %v2531_v10 = vpack.c.bf16 %v2415_v25, %v2399_v27  ;;  %3678 = vmatmul.mubr.msk.bf16.gmra.mrb[68].mxu0 %vm1669_vm0, %v5296_v34 }
 0x1ed   : > { %v2417_v41 = vmax.f32 %v1942_v43, %v2289_v13  ;;  %v2302_v46 = vmul.f32 0.2, %v1873_v32  ;;  %v1945_v39 = vpop.f32.mrb[20].mxu1  ;;  %v1877_v14 = vadd.f32 %v1876_v26, %v5241_v28  ;;  %v1878_v5 = vpop.f32.mrb[23].mxu0  ;;  %2768 = vmatprep.mubr.bf16.mxu0 %v5849_v3 }
 0x1ee   : > { %v2532_v19 = vpack.c.bf16 %v2416_v6, %v2400_v62  ;;  %v1946_v37 = vadd.f32 %v1945_v39, %v5239_v59  ;;  %v2303_v23 = vmul.f32 0.2, %v1875_v48  ;;  %v1947_v24 = vpop.f32.mrb[21].mxu1  ;;  %v1879_v12 = vadd.f32 %v1878_v5, %v5241_v28  ;;  %2736 = vmatprep.subr.bf16.mxu0 %v2531_v10 }
 0x1ef   : > { %v1948_v9 = vadd.f32 %v1947_v24, %v5239_v59  ;;  %v2318_v36 = vmul.f32 0.2, %v1877_v14  ;;  %v1949_v30 = vpop.f32.mrb[22].mxu1  ;;  %v2533_v16 = vpack.c.bf16 %v2417_v41, %v2401_v42  ;;  %2737 = vmatpush1.bf16.msra.mxu0 %v2530_v33  ;;  %3680 = vmatmul.mubr.msk.bf16.gmra.mrb[68].mxu1 %vm1669_vm0, %v5296_v34  ;;  %v2430_v1 = vmax.f32 %v1873_v32, %v2302_v46 }
 0x1f0   : > { %v2304_v15 = vmul.f32 0.2, %v1946_v37  ;;  %v1950_v54 = vadd.f32 %v1949_v30, %v5241_v28  ;;  %v2319_v56 = vmul.f32 0.2, %v1879_v12  ;;  %v1951_v8 = vpop.f32.mrb[23].mxu1  ;;  %2821 = vmatprep.mubr.bf16.mxu1 %v5849_v3  ;;  %v2431_v49 = vmax.f32 %v1875_v48, %v2303_v23 }
 0x1f1   : > { %v2305_v18 = vmul.f32 0.2, %v1948_v9  ;;  %v2446_v0 = vmax.f32 %v1877_v14, %v2318_v36  ;;  %v1952_v2 = vadd.f32 %v1951_v8, %v5241_v28  ;;  %2789 = vmatprep.subr.bf16.mxu1 %v2533_v16 }
 0x1f2   : > { %v2320_v22 = vmul.f32 0.2, %v1950_v54  ;;  %v2447_v7 = vmax.f32 %v1879_v12, %v2319_v56  ;;  %2790 = vmatpush1.bf16.msra.mxu1 %v2532_v19  ;;  %v1882_v31 = vpop.f32.mrb[24].mxu0  ;;  %v2432_v57 = vmax.f32 %v1946_v37, %v2304_v15 }
 0x1f3   : > { %v2546_v44 = vpack.c.bf16 %v2446_v0, %v2430_v1  ;;  %v2321_v21 = vmul.f32 0.2, %v1952_v2  ;;  %v1883_v58 = vadd.f32 %v1882_v31, %v5251_v38  ;;  %v1884_v40 = vpop.f32.mrb[25].mxu0  ;;  %v2433_v55 = vmax.f32 %v1948_v9, %v2305_v18 }
 0x1f4   : > { %v2448_v35 = vmax.f32 %v1950_v54, %v2320_v22  ;;  %v1885_v63 = vadd.f32 %v1884_v40, %v5251_v38  ;;  %v1886_v51 = vpop.f32.mrb[26].mxu0  ;;  %v2547_v45 = vpack.c.bf16 %v2447_v7, %v2431_v49 }
 0x1f5   : > { %v2449_v47 = vmax.f32 %v1952_v2, %v2321_v21  ;;  %v2334_v43 = vmul.f32 0.2, %v1883_v58  ;;  %v1955_v27 = vpop.f32.mrb[24].mxu1  ;;  %v1887_v11 = vadd.f32 %v1886_v51, %v5254_v50  ;;  %v1888_v25 = vpop.f32.mrb[27].mxu0 }
 0x1f6   : > { %v2548_v61 = vpack.c.bf16 %v2448_v35, %v2432_v57  ;;  %v1956_v33 = vadd.f32 %v1955_v27, %v5251_v38  ;;  %v2335_v13 = vmul.f32 0.2, %v1885_v63  ;;  %v1957_v32 = vpop.f32.mrb[25].mxu1  ;;  %v1889_v17 = vadd.f32 %v1888_v25, %v5254_v50  ;;  %2738 = vmatprep.subr.bf16.mxu0 %v2547_v45 }
 0x1f7   : > { %v1958_v62 = vadd.f32 %v1957_v32, %v5251_v38  ;;  %v2350_v6 = vmul.f32 0.2, %v1887_v11  ;;  %v1959_v48 = vpop.f32.mrb[26].mxu1  ;;  %v2549_v26 = vpack.c.bf16 %v2449_v47, %v2433_v55  ;;  %2739 = vmatpush1.bf16.msra.mxu0 %v2546_v44  ;;  %v2462_v39 = vmax.f32 %v1883_v58, %v2334_v43 }
 0x1f8   : > { %v2336_v10 = vmul.f32 0.2, %v1956_v33  ;;  %v1960_v42 = vadd.f32 %v1959_v48, %v5254_v50  ;;  %v2351_v41 = vmul.f32 0.2, %v1889_v17  ;;  %v1961_v46 = vpop.f32.mrb[27].mxu1  ;;  %v2463_v37 = vmax.f32 %v1885_v63, %v2335_v13 }
 0x1f9   : > { %v2337_v14 = vmul.f32 0.2, %v1958_v62  ;;  %v2478_v5 = vmax.f32 %v1887_v11, %v2350_v6  ;;  %v1962_v19 = vadd.f32 %v1961_v46, %v5254_v50  ;;  %2791 = vmatprep.subr.bf16.mxu1 %v2549_v26 }
 0x1fa   : > { %v2352_v23 = vmul.f32 0.2, %v1960_v42  ;;  %v2479_v24 = vmax.f32 %v1889_v17, %v2351_v41  ;;  %2792 = vmatpush1.bf16.msra.mxu1 %v2548_v61  ;;  %v1892_v12 = vpop.f32.mrb[28].mxu0  ;;  %v2464_v15 = vmax.f32 %v1956_v33, %v2336_v10 }
 0x1fb   : > { %v2562_v9 = vpack.c.bf16 %v2478_v5, %v2462_v39  ;;  %v2353_v36 = vmul.f32 0.2, %v1962_v19  ;;  %v1893_v30 = vadd.f32 %v1892_v12, %v5263_v60  ;;  %v1894_v16 = vpop.f32.mrb[29].mxu0  ;;  %v2465_v18 = vmax.f32 %v1958_v62, %v2337_v14 }
 0x1fc   : > { %v2480_v54 = vmax.f32 %v1960_v42, %v2352_v23  ;;  %v1895_v56 = vadd.f32 %v1894_v16, %v5263_v60  ;;  %v1896_v8 = vpop.f32.mrb[30].mxu0  ;;  %v2563_v1 = vpack.c.bf16 %v2479_v24, %v2463_v37 }
 0x1fd   : > { %v2481_v0 = vmax.f32 %v1962_v19, %v2353_v36  ;;  %v2366_v2 = vmul.f32 0.2, %v1893_v30  ;;  %v1965_v49 = vpop.f32.mrb[28].mxu1  ;;  %v1897_v22 = vadd.f32 %v1896_v8, %v5266_v53  ;;  %v1898_v7 = vpop.f32.mrb[31].mxu0 }
 0x1fe   : > { %v2564_v31 = vpack.c.bf16 %v2480_v54, %v2464_v15  ;;  %v1966_v44 = vadd.f32 %v1965_v49, %v5263_v60  ;;  %v2367_v21 = vmul.f32 0.2, %v1895_v56  ;;  %v1967_v58 = vpop.f32.mrb[29].mxu1  ;;  %v1899_v40 = vadd.f32 %v1898_v7, %v5266_v53  ;;  %2740 = vmatprep.subr.bf16.mxu0 %v2563_v1 }
 0x1ff   : > { %v1968_v57 = vadd.f32 %v1967_v58, %v5263_v60  ;;  %v2382_v35 = vmul.f32 0.2, %v1897_v22  ;;  %v1969_v63 = vpop.f32.mrb[30].mxu1  ;;  %v2565_v51 = vpack.c.bf16 %v2481_v0, %v2465_v18  ;;  %2741 = vmatpush1.bf16.msra.mxu0 %v2562_v9  ;;  %v2494_v27 = vmax.f32 %v1893_v30, %v2366_v2 }
 0x200   : > { %v2368_v45 = vmul.f32 0.2, %v1966_v44  ;;  %v1970_v55 = vadd.f32 %v1969_v63, %v5266_v53  ;;  %v2383_v47 = vmul.f32 0.2, %v1899_v40  ;;  %v1971_v43 = vpop.f32.mrb[31].mxu1  ;;  %v2495_v33 = vmax.f32 %v1895_v56, %v2367_v21 }
 0x201   : > { %v2369_v11 = vmul.f32 0.2, %v1968_v57  ;;  %v2510_v25 = vmax.f32 %v1897_v22, %v2382_v35  ;;  %v1972_v61 = vadd.f32 %v1971_v43, %v5266_v53  ;;  %2793 = vmatprep.subr.bf16.mxu1 %v2565_v51 }
 0x202   : > { %v2384_v13 = vmul.f32 0.2, %v1970_v55  ;;  %v2511_v32 = vmax.f32 %v1899_v40, %v2383_v47  ;;  %2794 = vmatpush1.bf16.msra.mxu1 %v2564_v31  ;;  %v2496_v6 = vmax.f32 %v1966_v44, %v2368_v45 }
 0x203   : > { %v2578_v17 = vpack.c.bf16 %v2510_v25, %v2494_v27  ;;  %v2385_v62 = vmul.f32 0.2, %v1972_v61  ;;  %v2497_v10 = vmax.f32 %v1968_v57, %v2369_v11 }
 0x204   : > { %v2512_v48 = vmax.f32 %v1970_v55, %v2384_v13  ;;  %v2579_v26 = vpack.c.bf16 %v2511_v32, %v2495_v33 }
 0x205   : > { %v2513_v42 = vmax.f32 %v1972_v61, %v2385_v62 }
 0x206   : > { %v2580_v41 = vpack.c.bf16 %v2512_v48, %v2496_v6  ;;  %2742 = vmatprep.subr.bf16.mxu0 %v2579_v26 }
 0x207   : > { %v2581_v46 = vpack.c.bf16 %v2513_v42, %v2497_v10  ;;  %2743 = vmatpush1.bf16.msra.mxu0 %v2578_v17 }
 0x209   : > { %2795 = vmatprep.subr.bf16.mxu1 %v2581_v46 }
 0x20a   : > { %2796 = vmatpush1.bf16.msra.mxu1 %v2580_v41  ;;  %3681 = vmatmul.mubr.msk.bf16.vlgmr.msra.gmra.mrb[72].mxu0 %vm1669_vm0, %v5278_v20 }
 0x20b   : > { %2778 = vmatprep.mubr.bf16.mxu0 %v5849_v3 }
 0x20d   : > { %3683 = vmatmul.mubr.msk.bf16.vlgmr.msra.gmra.mrb[72].mxu1 %vm1669_vm0, %v5278_v20 }
 0x20e   : > { %2831 = vmatprep.mubr.bf16.mxu1 %v5849_v3 }
 0x212   : > { %3682 = vmatmul.mubr.msk.bf16.gmra.mrb[76].mxu0 %vm1669_vm0, %v5296_v34 }
 0x213   : > { %2874 = vmatprep.mubr.bf16.mxu0 %v5849_v3 }
 0x215   : > { %v2008_v39 = vpop.f32.mrb[32].mxu0  ;;  %3684 = vmatmul.mubr.msk.bf16.gmra.mrb[76].mxu1 %vm1669_vm0, %v5296_v34 }
 0x216   : > { %v2009_v14 = vadd.f32 %v2008_v39, %v5227_v4  ;;  %v2010_v5 = vpop.f32.mrb[33].mxu0  ;;  %2927 = vmatprep.mubr.bf16.mxu1 %v5849_v3 }
 0x217   : > { %v2011_v19 = vadd.f32 %v2010_v5, %v5227_v4  ;;  %v2012_v37 = vpop.f32.mrb[34].mxu0 }
 0x218   : > { %v2274_v23 = vmul.f32 0.2, %v2009_v14  ;;  %v2081_v24 = vpop.f32.mrb[32].mxu1  ;;  %v2013_v12 = vadd.f32 %v2012_v37, %v5229_v52  ;;  %v2014_v9 = vpop.f32.mrb[35].mxu0 }
 0x219   : > { %v2082_v36 = vadd.f32 %v2081_v24, %v5227_v4  ;;  %v2275_v30 = vmul.f32 0.2, %v2011_v19  ;;  %v2083_v16 = vpop.f32.mrb[33].mxu1  ;;  %v2015_v15 = vadd.f32 %v2014_v9, %v5229_v52 }
 0x21a   : > { %v2084_v54 = vadd.f32 %v2083_v16, %v5227_v4  ;;  %v2290_v56 = vmul.f32 0.2, %v2013_v12  ;;  %v2085_v8 = vpop.f32.mrb[34].mxu1  ;;  %v2402_v49 = vmax.f32 %v2009_v14, %v2274_v23 }
 0x21b   : > { %v2276_v1 = vmul.f32 0.2, %v2082_v36  ;;  %v2086_v18 = vadd.f32 %v2085_v8, %v5229_v52  ;;  %v2291_v0 = vmul.f32 0.2, %v2015_v15  ;;  %v2087_v2 = vpop.f32.mrb[35].mxu1  ;;  %v2403_v44 = vmax.f32 %v2011_v19, %v2275_v30 }
 0x21c   : > { %v2277_v22 = vmul.f32 0.2, %v2084_v54  ;;  %v2418_v7 = vmax.f32 %v2013_v12, %v2290_v56  ;;  %v2088_v31 = vadd.f32 %v2087_v2, %v5229_v52 }
 0x21d   : > { %v2292_v21 = vmul.f32 0.2, %v2086_v18  ;;  %v2419_v58 = vmax.f32 %v2015_v15, %v2291_v0  ;;  %v2404_v63 = vmax.f32 %v2082_v36, %v2276_v1 }
 0x21e   : > { %v2534_v40 = vpack.c.bf16 %v2418_v7, %v2402_v49  ;;  %v2293_v57 = vmul.f32 0.2, %v2088_v31  ;;  %v2018_v35 = vpop.f32.mrb[36].mxu0  ;;  %v2405_v43 = vmax.f32 %v2084_v54, %v2277_v22 }
 0x21f   : > { %v2420_v51 = vmax.f32 %v2086_v18, %v2292_v21  ;;  %v2019_v45 = vadd.f32 %v2018_v35, %v5239_v59  ;;  %v2020_v55 = vpop.f32.mrb[37].mxu0  ;;  %v2535_v47 = vpack.c.bf16 %v2419_v58, %v2403_v44 }
 0x220   : > { %v2421_v27 = vmax.f32 %v2088_v31, %v2293_v57  ;;  %v2021_v11 = vadd.f32 %v2020_v55, %v5239_v59  ;;  %v2022_v25 = vpop.f32.mrb[38].mxu0 }
 0x221   : > { %v2536_v61 = vpack.c.bf16 %v2420_v51, %v2404_v63  ;;  %v2306_v33 = vmul.f32 0.2, %v2019_v45  ;;  %v2091_v13 = vpop.f32.mrb[36].mxu1  ;;  %v2023_v32 = vadd.f32 %v2022_v25, %v5241_v28  ;;  %v2024_v17 = vpop.f32.mrb[39].mxu0  ;;  %2842 = vmatprep.subr.bf16.mxu0 %v2535_v47 }
 0x222   : > { %v2092_v62 = vadd.f32 %v2091_v13, %v5239_v59  ;;  %v2307_v6 = vmul.f32 0.2, %v2021_v11  ;;  %v2093_v48 = vpop.f32.mrb[37].mxu1  ;;  %v2025_v26 = vadd.f32 %v2024_v17, %v5241_v28  ;;  %v2537_v10 = vpack.c.bf16 %v2421_v27, %v2405_v43  ;;  %2843 = vmatpush1.bf16.msra.mxu0 %v2534_v40 }
 0x223   : > { %v2094_v42 = vadd.f32 %v2093_v48, %v5239_v59  ;;  %v2322_v41 = vmul.f32 0.2, %v2023_v32  ;;  %v2095_v46 = vpop.f32.mrb[38].mxu1  ;;  %v2434_v37 = vmax.f32 %v2019_v45, %v2306_v33 }
 0x224   : > { %v2308_v39 = vmul.f32 0.2, %v2092_v62  ;;  %v2096_v14 = vadd.f32 %v2095_v46, %v5241_v28  ;;  %v2323_v5 = vmul.f32 0.2, %v2025_v26  ;;  %v2097_v19 = vpop.f32.mrb[39].mxu1  ;;  %2895 = vmatprep.subr.bf16.mxu1 %v2537_v10  ;;  %v2435_v9 = vmax.f32 %v2021_v11, %v2307_v6 }
 0x225   : > { %v2309_v23 = vmul.f32 0.2, %v2094_v42  ;;  %v2450_v24 = vmax.f32 %v2023_v32, %v2322_v41  ;;  %v2098_v12 = vadd.f32 %v2097_v19, %v5241_v28  ;;  %2896 = vmatpush1.bf16.msra.mxu1 %v2536_v61 }
 0x226   : > { %v2324_v36 = vmul.f32 0.2, %v2096_v14  ;;  %v2451_v30 = vmax.f32 %v2025_v26, %v2323_v5  ;;  %v2028_v16 = vpop.f32.mrb[40].mxu0  ;;  %v2436_v1 = vmax.f32 %v2092_v62, %v2308_v39 }
 0x227   : > { %v2550_v15 = vpack.c.bf16 %v2450_v24, %v2434_v37  ;;  %v2325_v54 = vmul.f32 0.2, %v2098_v12  ;;  %v2029_v56 = vadd.f32 %v2028_v16, %v5251_v38  ;;  %v2030_v8 = vpop.f32.mrb[41].mxu0  ;;  %v2437_v22 = vmax.f32 %v2094_v42, %v2309_v23 }
 0x228   : > { %v2452_v18 = vmax.f32 %v2096_v14, %v2324_v36  ;;  %v2031_v0 = vadd.f32 %v2030_v8, %v5251_v38  ;;  %v2032_v2 = vpop.f32.mrb[42].mxu0  ;;  %v2551_v49 = vpack.c.bf16 %v2451_v30, %v2435_v9 }
 0x229   : > { %v2453_v7 = vmax.f32 %v2098_v12, %v2325_v54  ;;  %v2338_v31 = vmul.f32 0.2, %v2029_v56  ;;  %v2101_v44 = vpop.f32.mrb[40].mxu1  ;;  %v2033_v21 = vadd.f32 %v2032_v2, %v5254_v50  ;;  %v2034_v58 = vpop.f32.mrb[43].mxu0 }
 0x22a   : > { %v2552_v40 = vpack.c.bf16 %v2452_v18, %v2436_v1  ;;  %v2102_v57 = vadd.f32 %v2101_v44, %v5251_v38  ;;  %v2339_v35 = vmul.f32 0.2, %v2031_v0  ;;  %v2103_v63 = vpop.f32.mrb[41].mxu1  ;;  %v2035_v51 = vadd.f32 %v2034_v58, %v5254_v50  ;;  %2844 = vmatprep.subr.bf16.mxu0 %v2551_v49 }
 0x22b   : > { %v2104_v45 = vadd.f32 %v2103_v63, %v5251_v38  ;;  %v2354_v55 = vmul.f32 0.2, %v2033_v21  ;;  %v2105_v47 = vpop.f32.mrb[42].mxu1  ;;  %v2553_v43 = vpack.c.bf16 %v2453_v7, %v2437_v22  ;;  %2845 = vmatpush1.bf16.msra.mxu0 %v2550_v15  ;;  %v2466_v33 = vmax.f32 %v2029_v56, %v2338_v31 }
 0x22c   : > { %v2340_v27 = vmul.f32 0.2, %v2102_v57  ;;  %v2106_v11 = vadd.f32 %v2105_v47, %v5254_v50  ;;  %v2355_v25 = vmul.f32 0.2, %v2035_v51  ;;  %v2107_v61 = vpop.f32.mrb[43].mxu1  ;;  %v2467_v62 = vmax.f32 %v2031_v0, %v2339_v35 }
 0x22d   : > { %v2341_v13 = vmul.f32 0.2, %v2104_v45  ;;  %v2482_v32 = vmax.f32 %v2033_v21, %v2354_v55  ;;  %v2108_v17 = vadd.f32 %v2107_v61, %v5254_v50  ;;  %2897 = vmatprep.subr.bf16.mxu1 %v2553_v43 }
 0x22e   : > { %v2356_v6 = vmul.f32 0.2, %v2106_v11  ;;  %v2483_v48 = vmax.f32 %v2035_v51, %v2355_v25  ;;  %2898 = vmatpush1.bf16.msra.mxu1 %v2552_v40  ;;  %v2038_v26 = vpop.f32.mrb[44].mxu0  ;;  %v2468_v39 = vmax.f32 %v2102_v57, %v2340_v27 }
 0x22f   : > { %v2566_v10 = vpack.c.bf16 %v2482_v32, %v2466_v33  ;;  %v2357_v42 = vmul.f32 0.2, %v2108_v17  ;;  %v2039_v41 = vadd.f32 %v2038_v26, %v5263_v60  ;;  %v2040_v46 = vpop.f32.mrb[45].mxu0  ;;  %v2469_v23 = vmax.f32 %v2104_v45, %v2341_v13 }
 0x230   : > { %v2484_v14 = vmax.f32 %v2106_v11, %v2356_v6  ;;  %v2041_v5 = vadd.f32 %v2040_v46, %v5263_v60  ;;  %v2042_v19 = vpop.f32.mrb[46].mxu0  ;;  %v2567_v37 = vpack.c.bf16 %v2483_v48, %v2467_v62 }
 0x231   : > { %v2485_v24 = vmax.f32 %v2108_v17, %v2357_v42  ;;  %v2370_v12 = vmul.f32 0.2, %v2039_v41  ;;  %v2111_v9 = vpop.f32.mrb[44].mxu1  ;;  %v2043_v36 = vadd.f32 %v2042_v19, %v5266_v53  ;;  %v2044_v30 = vpop.f32.mrb[47].mxu0 }
 0x232   : > { %v2568_v16 = vpack.c.bf16 %v2484_v14, %v2468_v39  ;;  %v2112_v15 = vadd.f32 %v2111_v9, %v5263_v60  ;;  %v2371_v54 = vmul.f32 0.2, %v2041_v5  ;;  %v2113_v56 = vpop.f32.mrb[45].mxu1  ;;  %v2045_v8 = vadd.f32 %v2044_v30, %v5266_v53  ;;  %2846 = vmatprep.subr.bf16.mxu0 %v2567_v37 }
 0x233   : > { %v2114_v1 = vadd.f32 %v2113_v56, %v5263_v60  ;;  %v2386_v18 = vmul.f32 0.2, %v2043_v36  ;;  %v2115_v0 = vpop.f32.mrb[46].mxu1  ;;  %v2569_v2 = vpack.c.bf16 %v2485_v24, %v2469_v23  ;;  %2847 = vmatpush1.bf16.msra.mxu0 %v2566_v10  ;;  %v2498_v44 = vmax.f32 %v2039_v41, %v2370_v12 }
 0x234   : > { %v2372_v49 = vmul.f32 0.2, %v2112_v15  ;;  %v2116_v22 = vadd.f32 %v2115_v0, %v5266_v53  ;;  %v2387_v7 = vmul.f32 0.2, %v2045_v8  ;;  %v2117_v31 = vpop.f32.mrb[47].mxu1  ;;  %v2499_v57 = vmax.f32 %v2041_v5, %v2371_v54 }
 0x235   : > { %v2373_v21 = vmul.f32 0.2, %v2114_v1  ;;  %v2514_v58 = vmax.f32 %v2043_v36, %v2386_v18  ;;  %v2118_v40 = vadd.f32 %v2117_v31, %v5266_v53  ;;  %2899 = vmatprep.subr.bf16.mxu1 %v2569_v2 }
 0x236   : > { %v2388_v35 = vmul.f32 0.2, %v2116_v22  ;;  %v2515_v63 = vmax.f32 %v2045_v8, %v2387_v7  ;;  %2900 = vmatpush1.bf16.msra.mxu1 %v2568_v16  ;;  %v2500_v55 = vmax.f32 %v2112_v15, %v2372_v49 }
 0x237   : > { %v2582_v51 = vpack.c.bf16 %v2514_v58, %v2498_v44  ;;  %v2389_v45 = vmul.f32 0.2, %v2118_v40  ;;  %v2501_v27 = vmax.f32 %v2114_v1, %v2373_v21 }
 0x238   : > { %v2516_v47 = vmax.f32 %v2116_v22, %v2388_v35  ;;  %v2583_v43 = vpack.c.bf16 %v2515_v63, %v2499_v57 }
 0x239   : > { %v2517_v11 = vmax.f32 %v2118_v40, %v2389_v45 }
 0x23a   : > { %v2584_v25 = vpack.c.bf16 %v2516_v47, %v2500_v55  ;;  %2848 = vmatprep.subr.bf16.mxu0 %v2583_v43 }
 0x23b   : > { %v2585_v61 = vpack.c.bf16 %v2517_v11, %v2501_v27  ;;  %2849 = vmatpush1.bf16.msra.mxu0 %v2582_v51 }
 0x23d   : > { %2901 = vmatprep.subr.bf16.mxu1 %v2585_v61 }
 0x23e   : > { %2902 = vmatpush1.bf16.msra.mxu1 %v2584_v25  ;;  %3685 = vmatmul.mubr.msk.bf16.vlgmr.msra.gmra.mrb[80].mxu0 %vm1669_vm0, %v5278_v20 }
 0x23f   : > { %2884 = vmatprep.mubr.bf16.mxu0 %v5849_v3 }
 0x241   : > { %3687 = vmatmul.mubr.msk.bf16.vlgmr.msra.gmra.mrb[80].mxu1 %vm1669_vm0, %v5278_v20 }
 0x242   : > { %2937 = vmatprep.mubr.bf16.mxu1 %v5849_v3 }
 0x246   : > { %3686 = vmatmul.mubr.msk.bf16.gmra.mrb[84].mxu0 %vm1669_vm0, %v5296_v34 }
 0x247   : > { %2980 = vmatprep.mubr.bf16.mxu0 %v5849_v3 }
 0x249   : > { %3688 = vmatmul.mubr.msk.bf16.gmra.mrb[84].mxu1 %vm1669_vm0, %v5296_v34 }
 0x24a   : > { %3033 = vmatprep.mubr.bf16.mxu1 %v5849_v3 }
 0x24d   : > { %v2154_v33 = vpop.f32.mrb[48].mxu0 }
 0x24e   : > { %v2155_v13 = vadd.f32 %v2154_v33, %v5227_v4  ;;  %v2156_v32 = vpop.f32.mrb[49].mxu0 }
 0x24f   : > { %v2157_v17 = vadd.f32 %v2156_v32, %v5227_v4  ;;  %v2158_v62 = vpop.f32.mrb[50].mxu0 }
 0x250   : > { %v2278_v6 = vmul.f32 0.2, %v2155_v13  ;;  %v2159_v48 = vadd.f32 %v2158_v62, %v5229_v52  ;;  %v2160_v26 = vpop.f32.mrb[51].mxu0 }
 0x251   : > { %v2227_v10 = vpop.f32.mrb[48].mxu1  ;;  %v2279_v42 = vmul.f32 0.2, %v2157_v17  ;;  %v2161_v41 = vadd.f32 %v2160_v26, %v5229_v52 }
 0x252   : > { %v2228_v46 = vadd.f32 %v2227_v10, %v5227_v4  ;;  %v2229_v39 = vpop.f32.mrb[49].mxu1  ;;  %v2294_v14 = vmul.f32 0.2, %v2159_v48  ;;  %v2406_v23 = vmax.f32 %v2155_v13, %v2278_v6 }
 0x253   : > { %v2230_v5 = vadd.f32 %v2229_v39, %v5227_v4  ;;  %v2231_v19 = vpop.f32.mrb[50].mxu1  ;;  %v2295_v37 = vmul.f32 0.2, %v2161_v41  ;;  %v2407_v30 = vmax.f32 %v2157_v17, %v2279_v42 }
 0x254   : > { %v2280_v24 = vmul.f32 0.2, %v2228_v46  ;;  %v2422_v12 = vmax.f32 %v2159_v48, %v2294_v14  ;;  %v2232_v9 = vadd.f32 %v2231_v19, %v5229_v52  ;;  %v2233_v36 = vpop.f32.mrb[51].mxu1 }
 0x255   : > { %v2281_v16 = vmul.f32 0.2, %v2230_v5  ;;  %v2423_v15 = vmax.f32 %v2161_v41, %v2295_v37  ;;  %v2234_v54 = vadd.f32 %v2233_v36, %v5229_v52  ;;  %v2164_v56 = vpop.f32.mrb[52].mxu0 }
 0x256   : > { %v2538_v8 = vpack.c.bf16 %v2422_v12, %v2406_v23  ;;  %v2296_v1 = vmul.f32 0.2, %v2232_v9  ;;  %v2165_v18 = vadd.f32 %v2164_v56, %v5239_v59  ;;  %v2166_v0 = vpop.f32.mrb[53].mxu0  ;;  %v2408_v7 = vmax.f32 %v2228_v46, %v2280_v24 }
 0x257   : > { %v2297_v4 = vmul.f32 0.2, %v2234_v54  ;;  %v2167_v2 = vadd.f32 %v2166_v0, %v5239_v59  ;;  %v2168_v49 = vpop.f32.mrb[54].mxu0  ;;  %v2539_v22 = vpack.c.bf16 %v2423_v15, %v2407_v30  ;;  %v2409_v40 = vmax.f32 %v2230_v5, %v2281_v16 }
 0x258   : > { %v2424_v31 = vmax.f32 %v2232_v9, %v2296_v1  ;;  %v2310_v44 = vmul.f32 0.2, %v2165_v18  ;;  %v2169_v21 = vadd.f32 %v2168_v49, %v5241_v28  ;;  %v2170_v58 = vpop.f32.mrb[55].mxu0 }
 0x259   : > { %v2425_v57 = vmax.f32 %v2234_v54, %v2297_v4  ;;  %v2237_v52 = vpop.f32.mrb[52].mxu1  ;;  %v2311_v35 = vmul.f32 0.2, %v2167_v2  ;;  %v2171_v63 = vadd.f32 %v2170_v58, %v5241_v28  ;;  %2948 = vmatprep.subr.bf16.mxu0 %v2539_v22 }
 0x25a   : > { %v2540_v51 = vpack.c.bf16 %v2424_v31, %v2408_v7  ;;  %v2238_v45 = vadd.f32 %v2237_v52, %v5239_v59  ;;  %v2239_v55 = vpop.f32.mrb[53].mxu1  ;;  %v2326_v47 = vmul.f32 0.2, %v2169_v21  ;;  %2949 = vmatpush1.bf16.msra.mxu0 %v2538_v8  ;;  %v2438_v61 = vmax.f32 %v2165_v18, %v2310_v44 }
 0x25b   : > { %v2240_v43 = vadd.f32 %v2239_v55, %v5239_v59  ;;  %v2241_v27 = vpop.f32.mrb[54].mxu1  ;;  %v2327_v11 = vmul.f32 0.2, %v2171_v63  ;;  %v2541_v25 = vpack.c.bf16 %v2425_v57, %v2409_v40  ;;  %v2439_v62 = vmax.f32 %v2167_v2, %v2311_v35 }
 0x25c   : > { %v2312_v33 = vmul.f32 0.2, %v2238_v45  ;;  %v2454_v13 = vmax.f32 %v2169_v21, %v2326_v47  ;;  %v2242_v32 = vadd.f32 %v2241_v27, %v5241_v28  ;;  %v2243_v17 = vpop.f32.mrb[55].mxu1 }
 0x25d   : > { %v2313_v6 = vmul.f32 0.2, %v2240_v43  ;;  %v2455_v48 = vmax.f32 %v2171_v63, %v2327_v11  ;;  %v2244_v26 = vadd.f32 %v2243_v17, %v5241_v28  ;;  %3001 = vmatprep.subr.bf16.mxu1 %v2541_v25  ;;  %v2174_v10 = vpop.f32.mrb[56].mxu0 }
 0x25e   : > { %v2554_v42 = vpack.c.bf16 %v2454_v13, %v2438_v61  ;;  %v2328_v41 = vmul.f32 0.2, %v2242_v32  ;;  %3002 = vmatpush1.bf16.msra.mxu1 %v2540_v51  ;;  %v2175_v59 = vadd.f32 %v2174_v10, %v5251_v38  ;;  %v2176_v46 = vpop.f32.mrb[57].mxu0  ;;  %v2440_v37 = vmax.f32 %v2238_v45, %v2312_v33 }
 0x25f   : > { %v2329_v39 = vmul.f32 0.2, %v2244_v26  ;;  %v2177_v14 = vadd.f32 %v2176_v46, %v5251_v38  ;;  %v2178_v5 = vpop.f32.mrb[58].mxu0  ;;  %v2555_v19 = vpack.c.bf16 %v2455_v48, %v2439_v62  ;;  %v2441_v28 = vmax.f32 %v2240_v43, %v2313_v6 }
 0x260   : > { %v2456_v23 = vmax.f32 %v2242_v32, %v2328_v41  ;;  %v2342_v24 = vmul.f32 0.2, %v2175_v59  ;;  %v2179_v12 = vadd.f32 %v2178_v5, %v5254_v50  ;;  %v2180_v9 = vpop.f32.mrb[59].mxu0 }
 0x261   : > { %v2457_v36 = vmax.f32 %v2244_v26, %v2329_v39  ;;  %v2247_v30 = vpop.f32.mrb[56].mxu1  ;;  %v2343_v16 = vmul.f32 0.2, %v2177_v14  ;;  %v2181_v15 = vadd.f32 %v2180_v9, %v5254_v50  ;;  %2950 = vmatprep.subr.bf16.mxu0 %v2555_v19 }
 0x262   : > { %v2556_v54 = vpack.c.bf16 %v2456_v23, %v2440_v37  ;;  %v2248_v56 = vadd.f32 %v2247_v30, %v5251_v38  ;;  %v2249_v8 = vpop.f32.mrb[57].mxu1  ;;  %v2358_v1 = vmul.f32 0.2, %v2179_v12  ;;  %2951 = vmatpush1.bf16.msra.mxu0 %v2554_v42  ;;  %v2470_v49 = vmax.f32 %v2175_v59, %v2342_v24 }
 0x263   : > { %v2250_v18 = vadd.f32 %v2249_v8, %v5251_v38  ;;  %v2251_v0 = vpop.f32.mrb[58].mxu1  ;;  %v2359_v4 = vmul.f32 0.2, %v2181_v15  ;;  %v2557_v2 = vpack.c.bf16 %v2457_v36, %v2441_v28  ;;  %v2471_v21 = vmax.f32 %v2177_v14, %v2343_v16 }
 0x264   : > { %v2344_v22 = vmul.f32 0.2, %v2248_v56  ;;  %v2486_v7 = vmax.f32 %v2179_v12, %v2358_v1  ;;  %v2252_v31 = vadd.f32 %v2251_v0, %v5254_v50  ;;  %v2253_v44 = vpop.f32.mrb[59].mxu1 }
 0x265   : > { %v2345_v58 = vmul.f32 0.2, %v2250_v18  ;;  %v2487_v40 = vmax.f32 %v2181_v15, %v2359_v4  ;;  %v2254_v57 = vadd.f32 %v2253_v44, %v5254_v50  ;;  %3003 = vmatprep.subr.bf16.mxu1 %v2557_v2  ;;  %v2184_v52 = vpop.f32.mrb[60].mxu0 }
 0x266   : > { %v2570_v35 = vpack.c.bf16 %v2486_v7, %v2470_v49  ;;  %v2360_v63 = vmul.f32 0.2, %v2252_v31  ;;  %3004 = vmatpush1.bf16.msra.mxu1 %v2556_v54  ;;  %v2185_v38 = vadd.f32 %v2184_v52, %v5263_v60  ;;  %v2186_v51 = vpop.f32.mrb[61].mxu0  ;;  %v2472_v27 = vmax.f32 %v2248_v56, %v2344_v22 }
 0x267   : > { %v2361_v45 = vmul.f32 0.2, %v2254_v57  ;;  %v2187_v55 = vadd.f32 %v2186_v51, %v5263_v60  ;;  %v2188_v47 = vpop.f32.mrb[62].mxu0  ;;  %v2571_v43 = vpack.c.bf16 %v2487_v40, %v2471_v21  ;;  %v2473_v50 = vmax.f32 %v2250_v18, %v2345_v58  ;;  %v5429_v18 = vpop.permute.xlu0 %2596 }
 0x268   : > { %v2488_v11 = vmax.f32 %v2252_v31, %v2360_v63  ;;  %v2374_v25 = vmul.f32 0.2, %v2185_v38  ;;  %v2189_v61 = vadd.f32 %v2188_v47, %v5266_v53  ;;  %v2190_v33 = vpop.f32.mrb[63].mxu0 }
 0x269   : > { %v2489_v13 = vmax.f32 %v2254_v57, %v2361_v45  ;;  %v2257_v32 = vpop.f32.mrb[60].mxu1  ;;  %v2375_v17 = vmul.f32 0.2, %v2187_v55  ;;  %v2191_v62 = vadd.f32 %v2190_v33, %v5266_v53  ;;  %2952 = vmatprep.subr.bf16.mxu0 %v2571_v43 }
 0x26a   : > { %v2572_v6 = vpack.c.bf16 %v2488_v11, %v2472_v27  ;;  %v2258_v48 = vadd.f32 %v2257_v32, %v5263_v60  ;;  %v2259_v26 = vpop.f32.mrb[61].mxu1  ;;  %v2390_v10 = vmul.f32 0.2, %v2189_v61  ;;  %2953 = vmatpush1.bf16.msra.mxu0 %v2570_v35  ;;  %v2502_v39 = vmax.f32 %v2185_v38, %v2374_v25 }
 0x26b   : > { %v2260_v42 = vadd.f32 %v2259_v26, %v5263_v60  ;;  %v2261_v41 = vpop.f32.mrb[62].mxu1  ;;  %v2391_v59 = vmul.f32 0.2, %v2191_v62  ;;  %v2573_v46 = vpack.c.bf16 %v2489_v13, %v2473_v50  ;;  %v2503_v23 = vmax.f32 %v2187_v55, %v2375_v17  ;;  %v5433_v0 = vpop.permute.xlu0 %2606 }
 0x26c   : > { %v2376_v14 = vmul.f32 0.2, %v2258_v48  ;;  %v2518_v5 = vmax.f32 %v2189_v61, %v2390_v10  ;;  %v2262_v19 = vadd.f32 %v2261_v41, %v5266_v53  ;;  %v2263_v37 = vpop.f32.mrb[63].mxu1 }
 0x26d   : > { %v2377_v24 = vmul.f32 0.2, %v2260_v42  ;;  %v2519_v12 = vmax.f32 %v2191_v62, %v2391_v59  ;;  %v2264_v9 = vadd.f32 %v2263_v37, %v5266_v53  ;;  %3005 = vmatprep.subr.bf16.mxu1 %v2573_v46  ;;  %v3761_v53 = vld [vmem:[%s5689_s5] sm:$0xff]  }
 0x26e   : > { %v2586_v28 = vpack.c.bf16 %v2518_v5, %v2502_v39  ;;  %v2392_v36 = vmul.f32 0.2, %v2262_v19  ;;  %3006 = vmatpush1.bf16.msra.mxu1 %v2572_v6  ;;  %v2504_v16 = vmax.f32 %v2258_v48, %v2376_v14 }
 0x26f   : > { %v2393_v30 = vmul.f32 0.2, %v2264_v9  ;;  %v2587_v60 = vpack.c.bf16 %v2519_v12, %v2503_v23  ;;  %v2505_v54 = vmax.f32 %v2260_v42, %v2377_v24  ;;  %v5443_v45 = vpop.permute.xlu0 %3188 }
 0x270   : > { %v2520_v15 = vmax.f32 %v2262_v19, %v2392_v36 }
 0x271   : > { %v2521_v56 = vmax.f32 %v2264_v9, %v2393_v30  ;;  %2954 = vmatprep.subr.bf16.mxu0 %v2587_v60 }
 0x272   : > { %v2588_v8 = vpack.c.bf16 %v2520_v15, %v2504_v16  ;;  %2955 = vmatpush1.bf16.msra.mxu0 %v2586_v28 }
 0x273   : > { %v2589_v1 = vpack.c.bf16 %v2521_v56, %v2505_v54 }
 0x275   : > { %3007 = vmatprep.subr.bf16.mxu1 %v2589_v1  ;;  %3689 = vmatmul.mubr.msk.bf16.vlgmr.msra.gmra.mrb[88].mxu0 %vm1669_vm0, %v5278_v20  ;;  %v5431_v20 = vpop.permute.xlu1 %2601 }
 0x276   : > { %3008 = vmatpush1.bf16.msra.mxu1 %v2588_v8  ;;  %2990 = vmatprep.mubr.bf16.mxu0 %v5849_v3 }
 0x279   : > { %3691 = vmatmul.mubr.msk.bf16.vlgmr.msra.gmra.mrb[88].mxu1 %vm1669_vm0, %v3761_v53  ;;  %v5436_v22 = vpop.permute.xlu1 %2611 }
 0x27a   : > { %3043 = vmatprep.mubr.bf16.mxu1 %v5849_v3 }
 0x27d   : > { %3690 = vmatmul.mubr.msk.bf16.gmra.mrb[92].mxu0 %vm1669_vm0, %v5296_v34  ;;  %v5448_v13 = vpop.permute.xlu1 %3193 }
 0x281   : > { %3692 = vmatmul.mubr.msk.bf16.gmra.mrb[92].mxu1 %vm1669_vm0, %v5296_v34 }
 0x2b7   : > { %v2664_v4 = vpop.f32.mrb[64].mxu0 }
 0x2b8   : > { %v2665_v2 = vadd.f32 %v2664_v4, %v5429_v18  ;;  %v2666_v49 = vpop.f32.mrb[65].mxu0  ;;  %v5462_v4 = vpop.permute.xlu0 %3198 }
 0x2b9   : > { %v2667_v3 = vadd.f32 %v2666_v49, %v5429_v18  ;;  %v2668_v7 = vpop.f32.mrb[66].mxu0 }
 0x2ba   : > { %v3054_v31 = vmul.f32 0.2, %v2665_v2  ;;  %v2717_v44 = vpop.f32.mrb[64].mxu1  ;;  %v2669_v21 = vadd.f32 %v2668_v7, %v5431_v20  ;;  %v2670_v34 = vpop.f32.mrb[67].mxu0 }
 0x2bb   : > { %v2718_v58 = vadd.f32 %v2717_v44, %v5429_v18  ;;  %v3055_v40 = vmul.f32 0.2, %v2667_v3  ;;  %v2719_v57 = vpop.f32.mrb[65].mxu1  ;;  %v2671_v52 = vadd.f32 %v2670_v34, %v5431_v20 }
 0x2bc   : > { %v3118_v35 = vmax.f32 %v2665_v2, %v3054_v31  ;;  %v2720_v63 = vadd.f32 %v2719_v57, %v5429_v18  ;;  %v3070_v38 = vmul.f32 0.2, %v2669_v21  ;;  %v2721_v51 = vpop.f32.mrb[66].mxu1 }
 0x2bd   : > { %v3056_v55 = vmul.f32 0.2, %v2718_v58  ;;  %v3119_v47 = vmax.f32 %v2667_v3, %v3055_v40  ;;  %v2722_v43 = vadd.f32 %v2721_v51, %v5431_v20  ;;  %v3071_v27 = vmul.f32 0.2, %v2671_v52  ;;  %v2723_v11 = vpop.f32.mrb[67].mxu1 }
 0x2be   : > { %v3206_v25 = vmul.f32 %v5443_v45, %v3118_v35  ;;  %v3057_v61 = vmul.f32 0.2, %v2720_v63  ;;  %v3134_v33 = vmax.f32 %v2669_v21, %v3070_v38  ;;  %v2724_v50 = vadd.f32 %v2723_v11, %v5431_v20 }
 0x2bf   : > { %v3120_v32 = vmax.f32 %v2718_v58, %v3056_v55  ;;  %v3207_v17 = vmul.f32 %v5443_v45, %v3119_v47  ;;  %v3072_v62 = vmul.f32 0.2, %v2722_v43  ;;  %v3135_v6 = vmax.f32 %v2671_v52, %v3071_v27  ;;  %v2674_v48 = vpop.f32.mrb[68].mxu0  ;;  %v5469_v47 = vpop.permute.xlu1 %3203 }
 0x2c0   : > { %v3121_v26 = vmax.f32 %v2720_v63, %v3057_v61  ;;  %v3222_v10 = vmul.f32 %v5448_v13, %v3134_v33  ;;  %v3073_v42 = vmul.f32 0.2, %v2724_v50  ;;  %v2675_v41 = vadd.f32 %v2674_v48, %v5433_v0  ;;  %v2676_v59 = vpop.f32.mrb[69].mxu0 }
 0x2c1   : > { %v3208_v46 = vmul.f32 %v5443_v45, %v3120_v32  ;;  %v3136_v39 = vmax.f32 %v2722_v43, %v3072_v62  ;;  %v3223_v14 = vmul.f32 %v5448_v13, %v3135_v6  ;;  %v2677_v5 = vadd.f32 %v2676_v59, %v5433_v0  ;;  %v2678_v19 = vpop.f32.mrb[70].mxu0 }
 0x2c2   : > { %v3209_v37 = vmul.f32 %v5443_v45, %v3121_v26  ;;  %v3270_v23 = vadd.f32 %v3222_v10, %v3206_v25  ;;  %v3137_v24 = vmax.f32 %v2724_v50, %v3073_v42  ;;  %v3086_v12 = vmul.f32 0.2, %v2675_v41  ;;  %v2727_v9 = vpop.f32.mrb[68].mxu1  ;;  %v2680_v28 = vpop.f32.mrb[71].mxu0 }
 0x2c3   : > { %v3224_v36 = vmul.f32 %v5448_v13, %v3136_v39  ;;  %v3279_v30 = vadd.f32 %v3223_v14, %v3207_v17  ;;  %v2728_v60 = vadd.f32 %v2727_v9, %v5433_v0  ;;  %v3087_v16 = vmul.f32 0.2, %v2677_v5  ;;  %v2729_v15 = vpop.f32.mrb[69].mxu1 }
 0x2c4   : > { %v3225_v54 = vmul.f32 %v5448_v13, %v3137_v24  ;;  %v3150_v56 = vmax.f32 %v2675_v41, %v3086_v12  ;;  %v2730_v8 = vadd.f32 %v2729_v15, %v5433_v0  ;;  %v2679_v1 = vadd.f32 %v2678_v19, %v5436_v22  ;;  %v2731_v53 = vpop.f32.mrb[70].mxu1 }
 0x2c5   : > { %v3288_v2 = vadd.f32 %v3224_v36, %v3208_v46  ;;  %v3088_v49 = vmul.f32 0.2, %v2728_v60  ;;  %v3151_v3 = vmax.f32 %v2677_v5, %v3087_v16  ;;  %v2732_v7 = vadd.f32 %v2731_v53, %v5436_v22  ;;  %v2733_v31 = vpop.f32.mrb[71].mxu1 }
 0x2c6   : > { %v3297_v44 = vadd.f32 %v3225_v54, %v3209_v37  ;;  %v3238_v21 = vmul.f32 %v5462_v4, %v3150_v56  ;;  %v3089_v34 = vmul.f32 0.2, %v2730_v8  ;;  %v3102_v58 = vmul.f32 0.2, %v2679_v1 }
 0x2c7   : > { %v3152_v40 = vmax.f32 %v2728_v60, %v3088_v49  ;;  %v3239_v57 = vmul.f32 %v5462_v4, %v3151_v3  ;;  %v3104_v52 = vmul.f32 0.2, %v2732_v7  ;;  %v2681_v35 = vadd.f32 %v2680_v28, %v5436_v22 }
 0x2c8   : > { %v3271_v63 = vadd.f32 %v3270_v23, %v3238_v21  ;;  %v3153_v38 = vmax.f32 %v2730_v8, %v3089_v34  ;;  %v3166_v51 = vmax.f32 %v2679_v1, %v3102_v58  ;;  %v2734_v55 = vadd.f32 %v2733_v31, %v5436_v22 }
 0x2c9   : > { %v3240_v43 = vmul.f32 %v5462_v4, %v3152_v40  ;;  %v3280_v27 = vadd.f32 %v3279_v30, %v3239_v57  ;;  %v3168_v11 = vmax.f32 %v2732_v7, %v3104_v52  ;;  %v3103_v25 = vmul.f32 0.2, %v2681_v35 }
 0x2ca   : > { %v3241_v61 = vmul.f32 %v5462_v4, %v3153_v38  ;;  %v3254_v33 = vmul.f32 %v5469_v47, %v3166_v51  ;;  %v3105_v50 = vmul.f32 0.2, %v2734_v55 }
 0x2cb   : > { %v3289_v32 = vadd.f32 %v3288_v2, %v3240_v43  ;;  %v3256_v17 = vmul.f32 %v5469_v47, %v3168_v11  ;;  %v3167_v62 = vmax.f32 %v2681_v35, %v3103_v25  ;;  %v3418_v2 = vpop.permute.xlu0 %3417 }
 0x2cc   : > { %v3298_v6 = vadd.f32 %v3297_v44, %v3241_v61  ;;  %v3272_v48 = vadd.f32 %v3271_v63, %v3254_v33  ;;  %v3169_v26 = vmax.f32 %v2734_v55, %v3105_v50  ;;  %v5478_v44 = vrot.slane %v3418_v2, %v5879_v29 }
 0x2cd   : > { %v3290_v10 = vadd.f32 %v3289_v32, %v3256_v17  ;;  %v3255_v42 = vmul.f32 %v5469_v47, %v3167_v62 }
 0x2ce   : > { %v3273_v41 = vrot.slane %v3272_v48, 4  ;;  %v3257_v59 = vmul.f32 %v5469_v47, %v3169_v26 }
 0x2cf   : > { %v3291_v46 = vrot.slane %v3290_v10, 4  ;;  %v3281_v39 = vadd.f32 %v3280_v27, %v3255_v42 }
 0x2d0   : > { %v3274_v14 = vadd.f32 %v3273_v41, %v3272_v48  ;;  %v3299_v5 = vadd.f32 %v3298_v6, %v3257_v59 }
 0x2d1   : > { %v3292_v19 = vadd.f32 %v3291_v46, %v3290_v10  ;;  %v3282_v37 = vrot.slane %v3281_v39, 4 }
 0x2d2   : > { %v3275_v23 = vrot.slane %v3274_v14, 2  ;;  %v3300_v24 = vrot.slane %v3299_v5, 4 }
 0x2d3   : > { %v3293_v12 = vrot.slane %v3292_v19, 2  ;;  %v3283_v9 = vadd.f32 %v3282_v37, %v3281_v39 }
 0x2d4   : > { %v3276_v28 = vadd.f32 %v3275_v23, %v3274_v14  ;;  %v3301_v36 = vadd.f32 %v3300_v24, %v3299_v5 }
 0x2d5   : > { %v3294_v30 = vadd.f32 %v3293_v12, %v3292_v19  ;;  %v3284_v60 = vrot.slane %v3283_v9, 2 }
 0x2d6   : > { %v3302_v16 = vrot.slane %v3301_v36, 2  ;;  %v3277_v54 = vrot.slane %v3276_v28, 1 }
 0x2d7   : > { %v3285_v15 = vadd.f32 %v3284_v60, %v3283_v9  ;;  %v3295_v56 = vrot.slane %v3294_v30, 1 }
 0x2d8   : > { %v3303_v8 = vadd.f32 %v3302_v16, %v3301_v36  ;;  %v3278_v49 = vadd.f32 %v3277_v54, %v3276_v28 }
 0x2d9   : > { %v3286_v1 = vrot.slane %v3285_v15, 1  ;;  %v3296_v3 = vadd.f32 %v3295_v56, %v3294_v30 }
 0x2da   : > { %v3304_v53 = vrot.slane %v3303_v8, 1  ;;  %v5483_v52 = vadd.f32 %v5478_v44, %v3278_v49 }
 0x2db   : > { %v3287_v7 = vadd.f32 %v3286_v1, %v3285_v15  ;;  %v5486_v35 = vadd.f32 %v5478_v44, %v3296_v3 }
 0x2dc   : > { %v3305_v21 = vadd.f32 %v3304_v53, %v3303_v8 }
 0x2dd   : > { %v2770_v31 = vpop.f32.mrb[72].mxu0  ;;  %v5490_v29 = vadd.f32 %v5478_v44, %v3287_v7 }
 0x2de   : > { %v2771_v34 = vadd.f32 %v2770_v31, %v5429_v18  ;;  %v2772_v58 = vpop.f32.mrb[73].mxu0  ;;  %v5495_v61 = vadd.f32 %v5478_v44, %v3305_v21 }
 0x2df   : > { %v2773_v40 = vadd.f32 %v2772_v58, %v5429_v18  ;;  %v2774_v57 = vpop.f32.mrb[74].mxu0 }
 0x2e0   : > { %v3058_v63 = vmul.f32 0.2, %v2771_v34  ;;  %v2823_v38 = vpop.f32.mrb[72].mxu1  ;;  %v2775_v51 = vadd.f32 %v2774_v57, %v5431_v20  ;;  %v2776_v55 = vpop.f32.mrb[75].mxu0 }
 0x2e1   : > { %v2824_v43 = vadd.f32 %v2823_v38, %v5429_v18  ;;  %v3059_v27 = vmul.f32 0.2, %v2773_v40  ;;  %v2825_v11 = vpop.f32.mrb[73].mxu1  ;;  %v2777_v25 = vadd.f32 %v2776_v55, %v5431_v20 }
 0x2e2   : > { %v3122_v33 = vmax.f32 %v2771_v34, %v3058_v63  ;;  %v2826_v50 = vadd.f32 %v2825_v11, %v5429_v18  ;;  %v3074_v32 = vmul.f32 0.2, %v2775_v51  ;;  %v2827_v17 = vpop.f32.mrb[74].mxu1 }
 0x2e3   : > { %v3060_v62 = vmul.f32 0.2, %v2824_v43  ;;  %v3123_v6 = vmax.f32 %v2773_v40, %v3059_v27  ;;  %v2828_v48 = vadd.f32 %v2827_v17, %v5431_v20  ;;  %v3075_v26 = vmul.f32 0.2, %v2777_v25  ;;  %v2829_v10 = vpop.f32.mrb[75].mxu1 }
 0x2e4   : > { %v3210_v42 = vmul.f32 %v5443_v45, %v3122_v33  ;;  %v3061_v41 = vmul.f32 0.2, %v2826_v50  ;;  %v3138_v59 = vmax.f32 %v2775_v51, %v3074_v32  ;;  %v2830_v46 = vadd.f32 %v2829_v10, %v5431_v20 }
 0x2e5   : > { %v3124_v39 = vmax.f32 %v2824_v43, %v3060_v62  ;;  %v3211_v14 = vmul.f32 %v5443_v45, %v3123_v6  ;;  %v3076_v5 = vmul.f32 0.2, %v2828_v48  ;;  %v3139_v19 = vmax.f32 %v2777_v25, %v3075_v26  ;;  %v2780_v37 = vpop.f32.mrb[76].mxu0 }
 0x2e6   : > { %v3125_v23 = vmax.f32 %v2826_v50, %v3061_v41  ;;  %v3226_v24 = vmul.f32 %v5448_v13, %v3138_v59  ;;  %v3077_v12 = vmul.f32 0.2, %v2830_v46  ;;  %v2781_v9 = vadd.f32 %v2780_v37, %v5433_v0  ;;  %v2782_v28 = vpop.f32.mrb[77].mxu0 }
 0x2e7   : > { %v3212_v36 = vmul.f32 %v5443_v45, %v3124_v39  ;;  %v3140_v30 = vmax.f32 %v2828_v48, %v3076_v5  ;;  %v3227_v60 = vmul.f32 %v5448_v13, %v3139_v19  ;;  %v2783_v16 = vadd.f32 %v2782_v28, %v5433_v0  ;;  %v2784_v15 = vpop.f32.mrb[78].mxu0 }
 0x2e8   : > { %v3213_v54 = vmul.f32 %v5443_v45, %v3125_v23  ;;  %v3306_v56 = vadd.f32 %v3226_v24, %v3210_v42  ;;  %v3141_v8 = vmax.f32 %v2830_v46, %v3077_v12  ;;  %v3090_v1 = vmul.f32 0.2, %v2781_v9  ;;  %v2833_v53 = vpop.f32.mrb[76].mxu1  ;;  %v2786_v2 = vpop.f32.mrb[79].mxu0 }
 0x2e9   : > { %v3228_v49 = vmul.f32 %v5448_v13, %v3140_v30  ;;  %v3315_v3 = vadd.f32 %v3227_v60, %v3211_v14  ;;  %v2834_v7 = vadd.f32 %v2833_v53, %v5433_v0  ;;  %v3091_v31 = vmul.f32 0.2, %v2783_v16  ;;  %v2835_v21 = vpop.f32.mrb[77].mxu1 }
 0x2ea   : > { %v3229_v34 = vmul.f32 %v5448_v13, %v3141_v8  ;;  %v3154_v58 = vmax.f32 %v2781_v9, %v3090_v1  ;;  %v2836_v40 = vadd.f32 %v2835_v21, %v5433_v0  ;;  %v2785_v57 = vadd.f32 %v2784_v15, %v5436_v22  ;;  %v2837_v63 = vpop.f32.mrb[78].mxu1 }
 0x2eb   : > { %v3324_v38 = vadd.f32 %v3228_v49, %v3212_v36  ;;  %v3092_v51 = vmul.f32 0.2, %v2834_v7  ;;  %v3155_v55 = vmax.f32 %v2783_v16, %v3091_v31  ;;  %v2838_v43 = vadd.f32 %v2837_v63, %v5436_v22  ;;  %v2839_v27 = vpop.f32.mrb[79].mxu1 }
 0x2ec   : > { %v3333_v11 = vadd.f32 %v3229_v34, %v3213_v54  ;;  %v3242_v25 = vmul.f32 %v5462_v4, %v3154_v58  ;;  %v3093_v33 = vmul.f32 0.2, %v2836_v40  ;;  %v3106_v50 = vmul.f32 0.2, %v2785_v57 }
 0x2ed   : > { %v3156_v32 = vmax.f32 %v2834_v7, %v3092_v51  ;;  %v3243_v17 = vmul.f32 %v5462_v4, %v3155_v55  ;;  %v3108_v62 = vmul.f32 0.2, %v2838_v43  ;;  %v2787_v6 = vadd.f32 %v2786_v2, %v5436_v22  ;;  %v5886_v7 = vld [vmem:[#allocation6_spill] sm:$0xff] }
 0x2ee   : > { %v3307_v48 = vadd.f32 %v3306_v56, %v3242_v25  ;;  %v3157_v26 = vmax.f32 %v2836_v40, %v3093_v33  ;;  %v3170_v10 = vmax.f32 %v2785_v57, %v3106_v50  ;;  %v2840_v42 = vadd.f32 %v2839_v27, %v5436_v22 }
 0x2ef   : > { %v3244_v41 = vmul.f32 %v5462_v4, %v3156_v32  ;;  %v3316_v59 = vadd.f32 %v3315_v3, %v3243_v17  ;;  %v3172_v46 = vmax.f32 %v2838_v43, %v3108_v62  ;;  %v3107_v39 = vmul.f32 0.2, %v2787_v6 }
 0x2f0   : > { %v3245_v14 = vmul.f32 %v5462_v4, %v3157_v26  ;;  %v3258_v5 = vmul.f32 %v5469_v47, %v3170_v10  ;;  %v3109_v19 = vmul.f32 0.2, %v2840_v42  ;;  %v3456_v37 = vcombine.low %v5483_v52, %v5490_v29 }
 0x2f1   : > { %v3325_v23 = vadd.f32 %v3324_v38, %v3244_v41  ;;  %v3260_v24 = vmul.f32 %v5469_v47, %v3172_v46  ;;  %v3171_v12 = vmax.f32 %v2787_v6, %v3107_v39  ;;  %v3457_v9 = vcombine.low %v5486_v35, %v5495_v61 }
 0x2f2   : > { %v3334_v28 = vadd.f32 %v3333_v11, %v3245_v14  ;;  %v3308_v36 = vadd.f32 %v3307_v48, %v3258_v5  ;;  %v3173_v30 = vmax.f32 %v2840_v42, %v3109_v19  ;;  %v3828_v15 = vmov 1966171168  }
 0x2f3   : > { %v3326_v60 = vadd.f32 %v3325_v23, %v3260_v24  ;;  %v3259_v16 = vmul.f32 %v5469_v47, %v3171_v12  ;;  %v3461_v54 = vunpack.c.l.s4 %v3828_v15 }
 0x2f4   : > { %v3309_v56 = vrot.slane %v3308_v36, 4  ;;  %v3261_v8 = vmul.f32 %v5469_v47, %v3173_v30 }
 0x2f5   : > { %v3327_v1 = vrot.slane %v3326_v60, 4  ;;  %v3317_v52 = vadd.f32 %v3316_v59, %v3259_v16  ;;  %v3462_v29 = vunpack.c.0.s8 %v3461_v54 }
 0x2f6   : > { %v3310_v53 = vadd.f32 %v3309_v56, %v3308_v36  ;;  %v3335_v2 = vadd.f32 %v3334_v28, %v3261_v8 }
 0x2f7   : > { %v3328_v49 = vadd.f32 %v3327_v1, %v3326_v60  ;;  %v3318_v3 = vrot.slane %v3317_v52, 4  ;;  %v5529_v35 = vsub.s32 %v3462_v29, %v5886_v7 }
 0x2f8   : > { %v3311_v61 = vrot.slane %v3310_v53, 2  ;;  %v3336_v31 = vrot.slane %v3335_v2, 4 }
 0x2f9   : > { %v3329_v21 = vrot.slane %v3328_v49, 2  ;;  %v3319_v34 = vadd.f32 %v3318_v3, %v3317_v52  ;;  %v3466_v58 = vrot.slane %v3456_v37, %v5529_v35  ;;  %v3473_v40 = vrot.slane %v3457_v9, %v5529_v35 }
 0x2fa   : > { %v3312_v57 = vadd.f32 %v3311_v61, %v3310_v53  ;;  %v3337_v63 = vadd.f32 %v3336_v31, %v3335_v2 }
 0x2fb   : > { %v3330_v38 = vadd.f32 %v3329_v21, %v3328_v49  ;;  %v3320_v51 = vrot.slane %v3319_v34, 2  ;;  %v3488_v55 = vcombine.low %v3466_v58, %v3473_v40 }
 0x2fc   : > { %v3313_v43 = vrot.slane %v3312_v57, 1  ;;  %v3338_v27 = vrot.slane %v3337_v63, 2 }
 0x2fd   : > { %v3331_v11 = vrot.slane %v3330_v38, 1  ;;  %v3321_v25 = vadd.f32 %v3320_v51, %v3319_v34  ;;  %v3496_v19 = vrot.slane %v3488_v55, %v5529_v35 }
 0x2fe   : > { %v3314_v33 = vadd.f32 %v3313_v43, %v3312_v57  ;;  %v3339_v50 = vadd.f32 %v3338_v27, %v3337_v63 }
 0x2ff   : > { %v3332_v32 = vadd.f32 %v3331_v11, %v3330_v38  ;;  %v3322_v17 = vrot.slane %v3321_v25, 1 }
 0x300   : > { %v3340_v62 = vrot.slane %v3339_v50, 1  ;;  %v3428_v6 = vadd.f32 %v5478_v44, %v3314_v33 }
 0x301   : > { %v3323_v48 = vadd.f32 %v3322_v17, %v3321_v25  ;;  %v3430_v26 = vadd.f32 %v5478_v44, %v3332_v32 }
 0x302   : > { %v3341_v10 = vadd.f32 %v3340_v62, %v3339_v50 }
 0x303   : > { %v3429_v42 = vadd.f32 %v5478_v44, %v3323_v48 }
 0x304   : > { %v3431_v41 = vadd.f32 %v5478_v44, %v3341_v10 }
 0x305   : > { %v3458_v59 = vcombine.low %v3428_v6, %v3429_v42 }
 0x306   : > { %v3459_v46 = vcombine.low %v3430_v26, %v3431_v41 }
 0x307   : > { %v3480_v39 = vrot.slane %v3458_v59, %v5529_v35 }
 0x308   : > { %v3487_v14 = vrot.slane %v3459_v46, %v5529_v35 }
 0x30a   : > { %v3489_v5 = vcombine.low %v3480_v39, %v3487_v14 }
 0x30c   : > { %v3503_v37 = vrot.slane %v3489_v5, %v5529_v35 }
 0x30e   : > { %v3504_v23 = vcombine.low %v3496_v19, %v3503_v37 }
 0x310   : > { %3556 = vst [vmem:[%s5544_s24] sm:$0xff] %v3504_v23 }
 0x311   : > { %v2876_v24 = vpop.f32.mrb[80].mxu0 }
 0x312   : > { %v2877_v12 = vadd.f32 %v2876_v24, %v5429_v18  ;;  %v2878_v9 = vpop.f32.mrb[81].mxu0 }
 0x313   : > { %v2879_v28 = vadd.f32 %v2878_v9, %v5429_v18  ;;  %v2880_v36 = vpop.f32.mrb[82].mxu0 }
 0x314   : > { %v3062_v30 = vmul.f32 0.2, %v2877_v12  ;;  %v2929_v60 = vpop.f32.mrb[80].mxu1  ;;  %v2881_v16 = vadd.f32 %v2880_v36, %v5431_v20  ;;  %v2882_v15 = vpop.f32.mrb[83].mxu0 }
 0x315   : > { %v2930_v54 = vadd.f32 %v2929_v60, %v5429_v18  ;;  %v3063_v56 = vmul.f32 0.2, %v2879_v28  ;;  %v2931_v8 = vpop.f32.mrb[81].mxu1  ;;  %v2883_v1 = vadd.f32 %v2882_v15, %v5431_v20 }
 0x316   : > { %v3126_v52 = vmax.f32 %v2877_v12, %v3062_v30  ;;  %v2932_v29 = vadd.f32 %v2931_v8, %v5429_v18  ;;  %v3078_v53 = vmul.f32 0.2, %v2881_v16  ;;  %v2933_v2 = vpop.f32.mrb[82].mxu1 }
 0x317   : > { %v3064_v49 = vmul.f32 0.2, %v2930_v54  ;;  %v3127_v3 = vmax.f32 %v2879_v28, %v3063_v56  ;;  %v2934_v7 = vadd.f32 %v2933_v2, %v5431_v20  ;;  %v3079_v61 = vmul.f32 0.2, %v2883_v1  ;;  %v2935_v31 = vpop.f32.mrb[83].mxu1 }
 0x318   : > { %v3214_v21 = vmul.f32 %v5443_v45, %v3126_v52  ;;  %v3065_v34 = vmul.f32 0.2, %v2932_v29  ;;  %v3142_v58 = vmax.f32 %v2881_v16, %v3078_v53  ;;  %v2936_v40 = vadd.f32 %v2935_v31, %v5431_v20 }
 0x319   : > { %v3128_v57 = vmax.f32 %v2930_v54, %v3064_v49  ;;  %v3215_v63 = vmul.f32 %v5443_v45, %v3127_v3  ;;  %v3080_v38 = vmul.f32 0.2, %v2934_v7  ;;  %v3143_v51 = vmax.f32 %v2883_v1, %v3079_v61  ;;  %v2886_v55 = vpop.f32.mrb[84].mxu0 }
 0x31a   : > { %v3129_v43 = vmax.f32 %v2932_v29, %v3065_v34  ;;  %v3230_v27 = vmul.f32 %v5448_v13, %v3142_v58  ;;  %v3081_v11 = vmul.f32 0.2, %v2936_v40  ;;  %v2887_v25 = vadd.f32 %v2886_v55, %v5433_v0  ;;  %v2888_v33 = vpop.f32.mrb[85].mxu0 }
 0x31b   : > { %v3216_v50 = vmul.f32 %v5443_v45, %v3128_v57  ;;  %v3144_v32 = vmax.f32 %v2934_v7, %v3080_v38  ;;  %v3231_v17 = vmul.f32 %v5448_v13, %v3143_v51  ;;  %v2889_v62 = vadd.f32 %v2888_v33, %v5433_v0  ;;  %v2890_v6 = vpop.f32.mrb[86].mxu0 }
 0x31c   : > { %v3217_v48 = vmul.f32 %v5443_v45, %v3129_v43  ;;  %v3342_v26 = vadd.f32 %v3230_v27, %v3214_v21  ;;  %v3145_v10 = vmax.f32 %v2936_v40, %v3081_v11  ;;  %v3094_v42 = vmul.f32 0.2, %v2887_v25  ;;  %v2939_v41 = vpop.f32.mrb[84].mxu1  ;;  %v2892_v59 = vpop.f32.mrb[87].mxu0 }
 0x31d   : > { %v3232_v46 = vmul.f32 %v5448_v13, %v3144_v32  ;;  %v3351_v39 = vadd.f32 %v3231_v17, %v3215_v63  ;;  %v2940_v14 = vadd.f32 %v2939_v41, %v5433_v0  ;;  %v3095_v5 = vmul.f32 0.2, %v2889_v62  ;;  %v2941_v19 = vpop.f32.mrb[85].mxu1 }
 0x31e   : > { %v3233_v37 = vmul.f32 %v5448_v13, %v3145_v10  ;;  %v3158_v23 = vmax.f32 %v2887_v25, %v3094_v42  ;;  %v2942_v24 = vadd.f32 %v2941_v19, %v5433_v0  ;;  %v2891_v12 = vadd.f32 %v2890_v6, %v5436_v22  ;;  %v2943_v9 = vpop.f32.mrb[86].mxu1 }
 0x31f   : > { %v3360_v28 = vadd.f32 %v3232_v46, %v3216_v50  ;;  %v3096_v36 = vmul.f32 0.2, %v2940_v14  ;;  %v3159_v30 = vmax.f32 %v2889_v62, %v3095_v5  ;;  %v2944_v60 = vadd.f32 %v2943_v9, %v5436_v22  ;;  %v2945_v16 = vpop.f32.mrb[87].mxu1 }
 0x320   : > { %v3369_v15 = vadd.f32 %v3233_v37, %v3217_v48  ;;  %v3246_v54 = vmul.f32 %v5462_v4, %v3158_v23  ;;  %v3097_v56 = vmul.f32 0.2, %v2942_v24  ;;  %v3110_v8 = vmul.f32 0.2, %v2891_v12 }
 0x321   : > { %v3160_v1 = vmax.f32 %v2940_v14, %v3096_v36  ;;  %v3247_v52 = vmul.f32 %v5462_v4, %v3159_v30  ;;  %v3112_v29 = vmul.f32 0.2, %v2944_v60  ;;  %v2893_v53 = vadd.f32 %v2892_v59, %v5436_v22 }
 0x322   : > { %v3343_v2 = vadd.f32 %v3342_v26, %v3246_v54  ;;  %v3161_v49 = vmax.f32 %v2942_v24, %v3097_v56  ;;  %v3174_v3 = vmax.f32 %v2891_v12, %v3110_v8  ;;  %v2946_v7 = vadd.f32 %v2945_v16, %v5436_v22 }
 0x323   : > { %v3248_v61 = vmul.f32 %v5462_v4, %v3160_v1  ;;  %v3352_v31 = vadd.f32 %v3351_v39, %v3247_v52  ;;  %v3176_v21 = vmax.f32 %v2944_v60, %v3112_v29  ;;  %v3111_v34 = vmul.f32 0.2, %v2893_v53 }
 0x324   : > { %v3249_v58 = vmul.f32 %v5462_v4, %v3161_v49  ;;  %v3262_v40 = vmul.f32 %v5469_v47, %v3174_v3  ;;  %v3113_v57 = vmul.f32 0.2, %v2946_v7 }
 0x325   : > { %v3361_v63 = vadd.f32 %v3360_v28, %v3248_v61  ;;  %v3264_v38 = vmul.f32 %v5469_v47, %v3176_v21  ;;  %v3175_v51 = vmax.f32 %v2893_v53, %v3111_v34 }
 0x326   : > { %v3370_v55 = vadd.f32 %v3369_v15, %v3249_v58  ;;  %v3344_v43 = vadd.f32 %v3343_v2, %v3262_v40  ;;  %v3177_v27 = vmax.f32 %v2946_v7, %v3113_v57 }
 0x327   : > { %v3362_v11 = vadd.f32 %v3361_v63, %v3264_v38  ;;  %v3263_v25 = vmul.f32 %v5469_v47, %v3175_v51 }
 0x328   : > { %v3345_v33 = vrot.slane %v3344_v43, 4  ;;  %v3265_v50 = vmul.f32 %v5469_v47, %v3177_v27 }
 0x329   : > { %v3363_v32 = vrot.slane %v3362_v11, 4  ;;  %v3353_v17 = vadd.f32 %v3352_v31, %v3263_v25 }
 0x32a   : > { %v3346_v62 = vadd.f32 %v3345_v33, %v3344_v43  ;;  %v3371_v6 = vadd.f32 %v3370_v55, %v3265_v50 }
 0x32b   : > { %v3364_v48 = vadd.f32 %v3363_v32, %v3362_v11  ;;  %v3354_v26 = vrot.slane %v3353_v17, 4 }
 0x32c   : > { %v3347_v10 = vrot.slane %v3346_v62, 2  ;;  %v3372_v42 = vrot.slane %v3371_v6, 4 }
 0x32d   : > { %v3365_v41 = vrot.slane %v3364_v48, 2  ;;  %v3355_v59 = vadd.f32 %v3354_v26, %v3353_v17 }
 0x32e   : > { %v3348_v46 = vadd.f32 %v3347_v10, %v3346_v62  ;;  %v3373_v39 = vadd.f32 %v3372_v42, %v3371_v6 }
 0x32f   : > { %v3366_v14 = vadd.f32 %v3365_v41, %v3364_v48  ;;  %v3356_v5 = vrot.slane %v3355_v59, 2 }
 0x330   : > { %v3349_v19 = vrot.slane %v3348_v46, 1  ;;  %v3374_v37 = vrot.slane %v3373_v39, 2 }
 0x331   : > { %v3367_v23 = vrot.slane %v3366_v14, 1  ;;  %v3357_v24 = vadd.f32 %v3356_v5, %v3355_v59 }
 0x332   : > { %v3350_v12 = vadd.f32 %v3349_v19, %v3348_v46  ;;  %v3375_v9 = vadd.f32 %v3374_v37, %v3373_v39 }
 0x333   : > { %v3368_v28 = vadd.f32 %v3367_v23, %v3366_v14  ;;  %v3358_v36 = vrot.slane %v3357_v24, 1 }
 0x334   : > { %v3376_v30 = vrot.slane %v3375_v9, 1  ;;  %v3432_v60 = vadd.f32 %v5478_v44, %v3350_v12 }
 0x335   : > { %v3359_v16 = vadd.f32 %v3358_v36, %v3357_v24  ;;  %v3434_v15 = vadd.f32 %v5478_v44, %v3368_v28 }
 0x336   : > { %v3377_v54 = vadd.f32 %v3376_v30, %v3375_v9 }
 0x337   : > { %v3433_v56 = vadd.f32 %v5478_v44, %v3359_v16 }
 0x338   : > { %v3435_v8 = vadd.f32 %v5478_v44, %v3377_v54 }
 0x339   : > { %v3505_v1 = vcombine.low %v3432_v60, %v3433_v56 }
 0x33a   : > { %v3506_v52 = vcombine.low %v3434_v15, %v3435_v8 }
 0x33b   : > { %v5584_v29 = vrot.slane %v3505_v1, %v5529_v35 }
 0x33c   : > { %v5587_v53 = vrot.slane %v3506_v52, %v5529_v35 }
 0x33e   : > { %v3537_v2 = vcombine.low %v5584_v29, %v5587_v53 }
 0x348   : > { %v2982_v49 = vpop.f32.mrb[88].mxu0 }
 0x349   : > { %v2983_v3 = vadd.f32 %v2982_v49, %v5429_v18  ;;  %v2984_v7 = vpop.f32.mrb[89].mxu0 }
 0x34a   : > { %v2985_v61 = vadd.f32 %v2984_v7, %v5429_v18  ;;  %v2986_v31 = vpop.f32.mrb[90].mxu0 }
 0x34b   : > { %v3066_v21 = vmul.f32 0.2, %v2983_v3  ;;  %v2987_v34 = vadd.f32 %v2986_v31, %v5431_v20  ;;  %v2988_v58 = vpop.f32.mrb[91].mxu0 }
 0x34c   : > { %v3035_v40 = vpop.f32.mrb[88].mxu1  ;;  %v3067_v57 = vmul.f32 0.2, %v2985_v61  ;;  %v2989_v63 = vadd.f32 %v2988_v58, %v5431_v20 }
 0x34d   : > { %v3130_v38 = vmax.f32 %v2983_v3, %v3066_v21  ;;  %v3036_v51 = vadd.f32 %v3035_v40, %v5429_v18  ;;  %v3037_v55 = vpop.f32.mrb[89].mxu1  ;;  %v3082_v43 = vmul.f32 0.2, %v2987_v34 }
 0x34e   : > { %v3131_v27 = vmax.f32 %v2985_v61, %v3067_v57  ;;  %v3038_v11 = vadd.f32 %v3037_v55, %v5429_v18  ;;  %v3039_v25 = vpop.f32.mrb[90].mxu1  ;;  %v3083_v33 = vmul.f32 0.2, %v2989_v63 }
 0x34f   : > { %v3218_v50 = vmul.f32 %v5443_v45, %v3130_v38  ;;  %v3068_v32 = vmul.f32 0.2, %v3036_v51  ;;  %v3146_v17 = vmax.f32 %v2987_v34, %v3082_v43  ;;  %v3040_v62 = vadd.f32 %v3039_v25, %v5431_v20  ;;  %v3041_v6 = vpop.f32.mrb[91].mxu1 }
 0x350   : > { %v3219_v48 = vmul.f32 %v5443_v45, %v3131_v27  ;;  %v3069_v26 = vmul.f32 0.2, %v3038_v11  ;;  %v3147_v10 = vmax.f32 %v2989_v63, %v3083_v33  ;;  %v3042_v42 = vadd.f32 %v3041_v6, %v5431_v20  ;;  %v2992_v41 = vpop.f32.mrb[92].mxu0 }
 0x351   : > { %v3132_v59 = vmax.f32 %v3036_v51, %v3068_v32  ;;  %v3234_v46 = vmul.f32 %v5448_v13, %v3146_v17  ;;  %v3084_v18 = vmul.f32 0.2, %v3040_v62  ;;  %v2993_v39 = vadd.f32 %v2992_v41, %v5433_v0  ;;  %v2994_v14 = vpop.f32.mrb[93].mxu0 }
 0x352   : > { %v3133_v5 = vmax.f32 %v3038_v11, %v3069_v26  ;;  %v3235_v19 = vmul.f32 %v5448_v13, %v3147_v10  ;;  %v3085_v37 = vmul.f32 0.2, %v3042_v42  ;;  %v2995_v23 = vadd.f32 %v2994_v14, %v5433_v0  ;;  %v2996_v24 = vpop.f32.mrb[94].mxu0 }
 0x353   : > { %v3220_v12 = vmul.f32 %v5443_v45, %v3132_v59  ;;  %v3378_v9 = vadd.f32 %v3234_v46, %v3218_v50  ;;  %v3148_v28 = vmax.f32 %v3040_v62, %v3084_v18  ;;  %v3098_v20 = vmul.f32 0.2, %v2993_v39  ;;  %v2998_v36 = vpop.f32.mrb[95].mxu0 }
 0x354   : > { %v3221_v30 = vmul.f32 %v5443_v45, %v3133_v5  ;;  %v3387_v60 = vadd.f32 %v3235_v19, %v3219_v48  ;;  %v3149_v16 = vmax.f32 %v3042_v42, %v3085_v37  ;;  %v3045_v15 = vpop.f32.mrb[92].mxu1  ;;  %v3099_v54 = vmul.f32 0.2, %v2995_v23 }
 0x355   : > { %v3236_v56 = vmul.f32 %v5448_v13, %v3148_v28  ;;  %v3162_v8 = vmax.f32 %v2993_v39, %v3098_v20  ;;  %v3046_v1 = vadd.f32 %v3045_v15, %v5433_v0  ;;  %v3047_v52 = vpop.f32.mrb[93].mxu1  ;;  %v2997_v49 = vadd.f32 %v2996_v24, %v5436_v22 }
 0x356   : > { %v3237_v3 = vmul.f32 %v5448_v13, %v3149_v16  ;;  %v3163_v7 = vmax.f32 %v2995_v23, %v3099_v54  ;;  %v3048_v61 = vadd.f32 %v3047_v52, %v5433_v0  ;;  %v3049_v31 = vpop.f32.mrb[94].mxu1  ;;  %v2999_v45 = vadd.f32 %v2998_v36, %v5436_v22 }
 0x357   : > { %v3396_v21 = vadd.f32 %v3236_v56, %v3220_v12  ;;  %v3250_v34 = vmul.f32 %v5462_v4, %v3162_v8  ;;  %v3100_v58 = vmul.f32 0.2, %v3046_v1  ;;  %v3114_v40 = vmul.f32 0.2, %v2997_v49  ;;  %v3051_v57 = vpop.f32.mrb[95].mxu1 }
 0x358   : > { %v3405_v63 = vadd.f32 %v3237_v3, %v3221_v30  ;;  %v3251_v38 = vmul.f32 %v5462_v4, %v3163_v7  ;;  %v3101_v51 = vmul.f32 0.2, %v3048_v61  ;;  %v3050_v55 = vadd.f32 %v3049_v31, %v5436_v22 }
 0x359   : > { %v3379_v43 = vadd.f32 %v3378_v9, %v3250_v34  ;;  %v3164_v13 = vmax.f32 %v3046_v1, %v3100_v58  ;;  %v3178_v27 = vmax.f32 %v2997_v49, %v3114_v40  ;;  %v3115_v11 = vmul.f32 0.2, %v2999_v45 }
 0x35a   : > { %v3388_v0 = vadd.f32 %v3387_v60, %v3251_v38  ;;  %v3165_v25 = vmax.f32 %v3048_v61, %v3101_v51  ;;  %v3116_v33 = vmul.f32 0.2, %v3050_v55  ;;  %v3052_v50 = vadd.f32 %v3051_v57, %v5436_v22 }
 0x35b   : > { %v3252_v32 = vmul.f32 %v5462_v4, %v3164_v13  ;;  %v3266_v17 = vmul.f32 %v5469_v47, %v3178_v27  ;;  %v3179_v62 = vmax.f32 %v2999_v45, %v3115_v11  ;;  %v3545_v51 = vrot.slane %v3537_v2, %v5529_v35 }
 0x35c   : > { %v3253_v6 = vmul.f32 %v5462_v4, %v3165_v25  ;;  %v3180_v48 = vmax.f32 %v3050_v55, %v3116_v33  ;;  %v3117_v26 = vmul.f32 0.2, %v3052_v50 }
 0x35d   : > { %v3397_v10 = vadd.f32 %v3396_v21, %v3252_v32  ;;  %v3380_v42 = vadd.f32 %v3379_v43, %v3266_v17  ;;  %v3267_v41 = vmul.f32 %v5469_v47, %v3179_v62 }
 0x35e   : > { %v3406_v59 = vadd.f32 %v3405_v63, %v3253_v6  ;;  %v3268_v46 = vmul.f32 %v5469_v47, %v3180_v48  ;;  %v3181_v18 = vmax.f32 %v3052_v50, %v3117_v26 }
 0x35f   : > { %v3381_v39 = vrot.slane %v3380_v42, 4  ;;  %v3389_v14 = vadd.f32 %v3388_v0, %v3267_v41 }
 0x360   : > { %v3398_v22 = vadd.f32 %v3397_v10, %v3268_v46  ;;  %v3269_v5 = vmul.f32 %v5469_v47, %v3181_v18 }
 0x361   : > { %v3382_v19 = vadd.f32 %v3381_v39, %v3380_v42  ;;  %v3390_v37 = vrot.slane %v3389_v14, 4 }
 0x362   : > { %v3399_v23 = vrot.slane %v3398_v22, 4  ;;  %v3407_v24 = vadd.f32 %v3406_v59, %v3269_v5 }
 0x363   : > { %v3383_v4 = vrot.slane %v3382_v19, 2  ;;  %v3391_v12 = vadd.f32 %v3390_v37, %v3389_v14 }
 0x364   : > { %v3400_v9 = vadd.f32 %v3399_v23, %v3398_v22  ;;  %v3408_v28 = vrot.slane %v3407_v24, 4 }
 0x365   : > { %v3384_v20 = vadd.f32 %v3383_v4, %v3382_v19  ;;  %v3392_v36 = vrot.slane %v3391_v12, 2 }
 0x366   : > { %v3401_v30 = vrot.slane %v3400_v9, 2  ;;  %v3409_v60 = vadd.f32 %v3408_v28, %v3407_v24 }
 0x367   : > { %v3385_v16 = vrot.slane %v3384_v20, 1  ;;  %v3393_v15 = vadd.f32 %v3392_v36, %v3391_v12 }
 0x368   : > { %v3402_v54 = vadd.f32 %v3401_v30, %v3400_v9  ;;  %v3410_v56 = vrot.slane %v3409_v60, 2 }
 0x369   : > { %v3386_v8 = vadd.f32 %v3385_v16, %v3384_v20  ;;  %v3394_v1 = vrot.slane %v3393_v15, 1 }
 0x36a   : > { %v3403_v47 = vrot.slane %v3402_v54, 1  ;;  %v3411_v52 = vadd.f32 %v3410_v56, %v3409_v60 }
 0x36b   : > { %v3436_v49 = vadd.f32 %v5478_v44, %v3386_v8  ;;  %v3395_v3 = vadd.f32 %v3394_v1, %v3393_v15 }
 0x36c   : > { %v3404_v7 = vadd.f32 %v3403_v47, %v3402_v54  ;;  %v3412_v61 = vrot.slane %v3411_v52, 1 }
 0x36d   : > { %v3437_v31 = vadd.f32 %v5478_v44, %v3395_v3 }
 0x36e   : > { %v3438_v45 = vadd.f32 %v5478_v44, %v3404_v7  ;;  %v3413_v21 = vadd.f32 %v3412_v61, %v3411_v52 }
 0x36f   : > { %v3507_v34 = vcombine.low %v3436_v49, %v3437_v31 }
 0x370   : > { %v3439_v58 = vadd.f32 %v5478_v44, %v3413_v21 }
 0x371   : > { %v3529_v57 = vrot.slane %v3507_v34, %v5529_v35 }
 0x372   : > { %v3508_v40 = vcombine.low %v3438_v45, %v3439_v58 }
 0x374   : > { %v3536_v63 = vrot.slane %v3508_v40, %v5529_v35 }
 0x376   : > { %v3538_v38 = vcombine.low %v3529_v57, %v3536_v63 }
 0x378   : > { %v3552_v55 = vrot.slane %v3538_v38, %v5529_v35 }
 0x37a   : > { %v3553_v43 = vcombine.low %v3545_v51, %v3552_v55 }
 0x37c   : > { %3557 = vst [vmem:[%s5544_s24 + $0x8] sm:$0xff] %v3553_v43 }
 0x37d   : > { %3775 = shalt.err (!%p3772_p3)
}
 0x37e   : > { %s3776_s18 = scalar_lea.hbm %s5639_s29, 256  ;;  %s3780_s24 = scalar_lea.hbm %s5693_s9, 512 }
 0x37f   : > { %p3777_p4 = scmp.ne.s32.totalorder %s5639_s29, %s3776_s18  ;;  %p3781_p9 = scmp.lt.u32.totalorder %s5639_s29, %s5693_s9 }
 0x380   : > { %p3782_p10 = scmp.lt.u32.totalorder %s3780_s24, %s3776_s18  ;;  %p3784_p12 = scmp.lt.u32.totalorder %s3776_s18, %s5639_s29 }
 0x381   : > { %p3778_p7 = pnand %p3777_p4, %p3921_p5 }
 0x382   : > { %p3783_p11 = por %p3782_p10, %p3781_p9 }
 0x383   : > { %p3779_p8 = pneg %p3778_p7 }
 0x384   : > { %p3785_p13 = por %p3784_p12, %p3783_p11 }
 0x386   : > { %p3786_p0 = pnand %p3785_p13, %p3779_p8 }
 0x388   : > { %3789 = shalt.err (!%p3786_p0)
}
 0x389   : > { %3699 = dma.vmem_to_hbm [thread:$0]  (%p3921_p5), %s5641_s26, 256, %s5639_s29, %s3559_s8  }
 0x38a PF: > { %p3705_p1 = scmp.ge.s32.totalorder %s3824_s14, 2  ;;  %s3585_s28 = sand.u32 1, %s3812_s11  }
 0x38b   : > { %s3586_s30 = scalar_lea.sflag [#allocation4], %s3585_s28 }
 0x38c   : > { %p3702_p2 = pnand %p3705_p1, %p3925_p6 }
 0x38e   : > { %3807 = dma.done.wait (!%p3702_p2), %s3586_s30, 256  }
 0x38f   : > { %3809 = vsyncadd (!%p3702_p2), %s3586_s30, 4294967040  ;;  %p21_p3 = scmp.ge.s32.totalorder %s3908_s16, 4   ;;  %s5887_s11 = smov %s3816_s12 }
 0x390   : > { %s5888_s12 = smov %s3820_s13  ;;  %s5889_s13 = smov %s3919_s19 }
 0x391   : > { %s5890_s14 = smov %s3908_s16  ;;  %23 = sbr.rel (!%p21_p3) target bundleno = 6 (0x6), region = 91 }
 0x398   :  { %3591 = vsyncpa [#allocation4], 1 }
 0x399   :  { %3593 = vsyncpa [#allocation4 + $0x1], 1 }

</bundles_post_ra>
